<compile_context>
chip_gen: v6e
topology: v6e:2x2x1
jax: 0.10.0
libtpu: 0.0.40
codegen_flags: <defaults>
</compile_context>

<pallas_src>
import functools

import jax
import jax.numpy as jnp
from jax.experimental import pallas as pl
from jax.experimental.pallas import tpu as pltpu


def _round_up(x, m):
    return (x + m - 1) // m * m


def _default_act_dtype():
    """bf16 elementwise only on chips with a bf16 VALU (v6e / v7x)."""
    try:
        kind = jax.devices()[0].device_kind.lower()
    except Exception:
        return jnp.float32
    return jnp.bfloat16 if ("v6" in kind or "v7" in kind) else jnp.float32


def _mlp_kernel(x_ref,
                w1_ref, b1_ref,
                w2_ref, b2_ref,
                w3_ref, b3_ref,
                w4_ref, b4_ref,
                o_ref, *, act_dtype):
    """4-layer MLP + activations for one batch tile (weights stay resident)."""

    def leaky_relu(h):
        # maximum(): 2 VALU ops vs 3 for where(); identical math since slope>0.
        return jnp.maximum(h, h * 0.02)

    def dense(h, w_ref, b_ref):
        # bf16 operands into the MXU, f32 accumulation + f32 bias add, then
        # the activation runs in act_dtype (bf16 on v6e/v7x, f32 on v5e).
        acc = jnp.dot(h, w_ref[...], preferred_element_type=jnp.float32)
        return leaky_relu((acc + b_ref[...]).astype(act_dtype))

    h = dense(x_ref[...], w1_ref, b1_ref)                    # (tb, 512)
    h = dense(h.astype(jnp.bfloat16), w2_ref, b2_ref)        # (tb, 512)
    h = dense(h.astype(jnp.bfloat16), w3_ref, b3_ref)        # (tb, 2048)

    # Final layer (p3 -> 1): broadcast-multiply + f32 lane reduction (XLU)
    # instead of a 128-lane-padded skinny matmul (saves weight-DMA bytes).
    w4_row = w4_ref[...].astype(act_dtype)                   # (1, p3)
    logits = jnp.sum(h * w4_row, axis=-1, keepdims=True,
                     dtype=jnp.float32) + b4_ref[...]        # (tb, 1) f32

    # Sigmoid: exp on EUP, approx reciprocal on EUP (keeps the VALU slot
    # clear).  Padded batch rows are zero -> logits = b4, no inf/nan.
    o_ref[...] = pl.reciprocal(1.0 + jnp.exp(-logits), approx=True)


def prepare_discriminator_params(params, input_dim=784, inter_dims=(500, 500, 2000)):
    """Pad hidden dims to lane multiples of 128 (input dim 784 stays un-padded)
    and cast weights to bf16 -- ONCE, outside jit."""
    w1, b1, w2, b2, w3, b3, w4, b4 = params
    d0, d1, d2, d3 = input_dim, *inter_dims
    p1, p2, p3 = (_round_up(d, 128) for d in (d1, d2, d3))

    def pad_w(w, r, c):
        return jnp.pad(w, ((0, r - w.shape[0]), (0, c - w.shape[1]))).astype(jnp.bfloat16)

    def pad_b(b, c):
        return jnp.pad(b.reshape(1, -1), ((0, 0), (0, c - b.shape[0]))).astype(jnp.float32)

    w1p, b1p = pad_w(w1, d0, p1), pad_b(b1, p1)   # note: no 784 -> 896 row pad
    w2p, b2p = pad_w(w2, p1, p2), pad_b(b2, p2)
    w3p, b3p = pad_w(w3, p2, p3), pad_b(b3, p3)
    # Last layer weight stored as a single (1, p3) row (no 128-wide output pad).
    w4_row = w4.reshape(1, -1)                    # (1, d3)
    w4p = jnp.pad(w4_row, ((0, 0), (0, p3 - w4_row.shape[1]))).astype(jnp.bfloat16)
    b4p = b4.reshape(1, 1).astype(jnp.float32)
    return (w1p, b1p, w2p, b2p, w3p, b3p, w4p, b4p)


@functools.partial(jax.jit, static_argnames=("input_dim", "act_dtype"))
def discriminator_forward(x, padded_params, *, input_dim=784, act_dtype=None):
    """x: any shape with leading batch dim; flattened to (B, input_dim).

    For best throughput in a GAN loop, feed real+fake (and multiple
    micro-batches) through ONE call so the single weight fetch amortizes.
    """
    if act_dtype is None:
        act_dtype = _default_act_dtype()

    w1p, b1p, w2p, b2p, w3p, b3p, w4p, b4p = padded_params
    d0, p1 = w1p.shape            # d0 = 784 (un-padded input dim)
    p2 = w2p.shape[1]
    p3 = w3p.shape[1]

    B = x.shape[0]
    x2d = x.reshape(B, -1)
    assert x2d.shape[1] == input_dim == d0

    # Batch tiling: multiple of 16 (bf16 sublane packing), capped at 256.
    # B > 256 gives >= 2 "parallel" tiles -> both v7x TCs when compute-bound;
    # small B stays on one TC (weight-DMA bound, splitting duplicates the fetch).
    tile_b = min(256, _round_up(B, 16))
    bp = _round_up(B, tile_b)
    # Single fused pad+cast: bf16 halves x DMA; feature dim 784 stays un-padded.
    x_p = jnp.pad(x2d.astype(jnp.bfloat16), ((0, bp - B), (0, 0)))

    def w_spec(shape):
        # Constant block index + single buffer: fetched once, stays resident,
        # no wasted second pipeline buffer (~3.4 MiB VMEM saved).
        return pl.BlockSpec(shape, lambda i: (0, 0), pipeline_mode=pl.Buffered(1))

    grid_spec = pltpu.PrefetchScalarGridSpec(
        num_scalar_prefetch=0,
        grid=(bp // tile_b,),
        in_specs=[
            pl.BlockSpec((tile_b, d0), lambda i: (i, 0)),   # x: streamed per tile
            w_spec((d0, p1)), w_spec((1, p1)),              # weights / biases:
            w_spec((p1, p2)), w_spec((1, p2)),              #   constant index,
            w_spec((p2, p3)), w_spec((1, p3)),              #   single-buffered,
            w_spec((1, p3)), w_spec((1, 1)),                #   resident in VMEM
        ],
        # TODO(synk): if xprof ever shows a store epilogue from the lane-1
        # output, switch to a lane-dense out block and slice in the wrapper.
        out_specs=pl.BlockSpec((tile_b, 1), lambda i: (i, 0)),
    )

    out_p = pl.pallas_call(
        functools.partial(_mlp_kernel, act_dtype=act_dtype),
        out_shape=jax.ShapeDtypeStruct((bp, 1), jnp.float32),
        grid_spec=grid_spec,
        compiler_params=pltpu.CompilerParams(
            dimension_semantics=("parallel",),   # batch tiles across TCs (v7x)
            vmem_limit_bytes=16 << 20,           # footprint ~8-10 MiB @ tile_b=256
        ),
    )(x_p, w1p, b1p, w2p, b2p, w3p, b3p, w4p, b4p)

    # TODO(synk): for a tight GAN inner loop, keep the bf16 weights resident
    # across calls via a cross-call VMEM future (P10) to hide the one-time
    # ~3.4 MiB weight DMA that dominates at small batch sizes.
    return out_p[:B, :]


def init_discriminator_params(key, input_dim=784, inter_dims=(500, 500, 2000)):
    """Deterministic synthetic init (stand-in for init_weights): N(0, 0.02)."""
    dims = (input_dim, *inter_dims, 1)
    params = []
    for i in range(len(dims) - 1):
        key, kw = jax.random.split(key)
        w = 0.02 * jax.random.normal(kw, (dims[i], dims[i + 1]), dtype=jnp.float32)
        b = jnp.zeros((dims[i + 1],), dtype=jnp.float32)
        params.extend([w, b])
    return tuple(params)


def _reference_forward(x, params):
    """Plain-JAX f32 reference for correctness check."""
    w1, b1, w2, b2, w3, b3, w4, b4 = params
    h = x.reshape(x.shape[0], -1).astype(jnp.float32)
    for w, b in ((w1, b1), (w2, b2), (w3, b3)):
        h = h @ w + b
        h = jnp.where(h > 0, h, 0.02 * h)
    logits = h @ w4 + b4
    return jax.nn.sigmoid(logits)


if __name__ == "__main__":
    key = jax.random.PRNGKey(0)
    k_params, k_x = jax.random.split(key)

    input_dim = 784
    inter_dims = (500, 500, 2000)
    params = init_discriminator_params(k_params, input_dim, inter_dims)
    padded_params = prepare_discriminator_params(params, input_dim, inter_dims)

    # Input like MNIST images: (B, 1, 28, 28), flattened inside forward.
    B = 8
    x = jax.random.normal(k_x, (B, 1, 28, 28), dtype=jnp.float32)

    out = discriminator_forward(x, padded_params, input_dim=input_dim)
    out = jax.block_until_ready(out)

    ref = _reference_forward(x, params)
    assert out.shape == (B, 1), out.shape
    # bf16 weights/input/activations + approx reciprocal -> loosened tolerance
    # vs. the f32 reference (measured error is ~1e-3 on sigmoid outputs).
    assert jnp.allclose(out, ref, atol=2e-2, rtol=0), (
        f"max abs err = {jnp.max(jnp.abs(out - ref))}")

    print("KERNEL_OK")
</pallas_src>

<mosaic_0001>
module attributes {stable_mosaic.version = 11 : i64} {
  func.func @_mlp_kernel(%arg0: i32, %arg1: memref<16x784xbf16, #tpu.memory_space<vmem>>, %arg2: memref<784x512xbf16, #tpu.memory_space<vmem>>, %arg3: memref<1x512xf32, #tpu.memory_space<vmem>>, %arg4: memref<512x512xbf16, #tpu.memory_space<vmem>>, %arg5: memref<1x512xf32, #tpu.memory_space<vmem>>, %arg6: memref<512x2048xbf16, #tpu.memory_space<vmem>>, %arg7: memref<1x2048xf32, #tpu.memory_space<vmem>>, %arg8: memref<1x2048xbf16, #tpu.memory_space<vmem>>, %arg9: memref<1x1xf32, #tpu.memory_space<vmem>>, %arg10: memref<16x1xf32, #tpu.memory_space<vmem>>) attributes {dimension_semantics = [#tpu.dimension_semantics<parallel>], iteration_bounds = array<i64: 1>, scalar_prefetch = 0 : i64, scratch_operands = 0 : i64, tpu.core_type = #tpu.core_type<tc>, window_params = [{transform_indices = @transform_0, window_bounds = array<i64: 16, 784>}, {pipeline_mode = #tpu.pipeline_mode<synchronous>, transform_indices = @transform_1, window_bounds = array<i64: 784, 512>}, {pipeline_mode = #tpu.pipeline_mode<synchronous>, transform_indices = @transform_2, window_bounds = array<i64: 1, 512>}, {pipeline_mode = #tpu.pipeline_mode<synchronous>, transform_indices = @transform_3, window_bounds = array<i64: 512, 512>}, {pipeline_mode = #tpu.pipeline_mode<synchronous>, transform_indices = @transform_4, window_bounds = array<i64: 1, 512>}, {pipeline_mode = #tpu.pipeline_mode<synchronous>, transform_indices = @transform_5, window_bounds = array<i64: 512, 2048>}, {pipeline_mode = #tpu.pipeline_mode<synchronous>, transform_indices = @transform_6, window_bounds = array<i64: 1, 2048>}, {pipeline_mode = #tpu.pipeline_mode<synchronous>, transform_indices = @transform_7, window_bounds = array<i64: 1, 2048>}, {pipeline_mode = #tpu.pipeline_mode<synchronous>, transform_indices = @transform_8, window_bounds = array<i64: 1, 1>}, {transform_indices = @transform_9, window_bounds = array<i64: 16, 1>}]} {
    %c0 = arith.constant 0 : index
    %c0_0 = arith.constant 0 : index
    %0 = vector.load %arg1[%c0, %c0_0] : memref<16x784xbf16, #tpu.memory_space<vmem>>, vector<16x784xbf16>
    %c0_1 = arith.constant 0 : index
    %c0_2 = arith.constant 0 : index
    %1 = vector.load %arg2[%c0_1, %c0_2] : memref<784x512xbf16, #tpu.memory_space<vmem>>, vector<784x512xbf16>
    %cst = arith.constant dense<0.000000e+00> : vector<16x512xf32>
    %2 = tpu.matmul %0, %1, %cst {dimension_numbers = #tpu.dot_dimension_numbers<[1], [0], [0], [1], [0, 0, 1, 1], [], []>} : vector<16x784xbf16>, vector<784x512xbf16>, vector<16x512xf32> -> vector<16x512xf32>
    %c0_3 = arith.constant 0 : index
    %c0_4 = arith.constant 0 : index
    %3 = vector.load %arg3[%c0_3, %c0_4] : memref<1x512xf32, #tpu.memory_space<vmem>>, vector<1x512xf32>
    %4 = vector.broadcast %3 : vector<1x512xf32> to vector<16x512xf32>
    %5 = arith.addf %2, %4 : vector<16x512xf32>
    %cst_5 = arith.constant 2.000000e-02 : f32
    %6 = vector.broadcast %cst_5 : f32 to vector<16x512xf32>
    %7 = arith.mulf %5, %6 : vector<16x512xf32>
    %8 = arith.maximumf %5, %7 : vector<16x512xf32>
    %9 = arith.truncf %8 : vector<16x512xf32> to vector<16x512xbf16>
    %c0_6 = arith.constant 0 : index
    %c0_7 = arith.constant 0 : index
    %10 = vector.load %arg4[%c0_6, %c0_7] : memref<512x512xbf16, #tpu.memory_space<vmem>>, vector<512x512xbf16>
    %cst_8 = arith.constant dense<0.000000e+00> : vector<16x512xf32>
    %11 = tpu.matmul %9, %10, %cst_8 {dimension_numbers = #tpu.dot_dimension_numbers<[1], [0], [0], [1], [0, 0, 1, 1], [], []>} : vector<16x512xbf16>, vector<512x512xbf16>, vector<16x512xf32> -> vector<16x512xf32>
    %c0_9 = arith.constant 0 : index
    %c0_10 = arith.constant 0 : index
    %12 = vector.load %arg5[%c0_9, %c0_10] : memref<1x512xf32, #tpu.memory_space<vmem>>, vector<1x512xf32>
    %13 = vector.broadcast %12 : vector<1x512xf32> to vector<16x512xf32>
    %14 = arith.addf %11, %13 : vector<16x512xf32>
    %cst_11 = arith.constant 2.000000e-02 : f32
    %15 = vector.broadcast %cst_11 : f32 to vector<16x512xf32>
    %16 = arith.mulf %14, %15 : vector<16x512xf32>
    %17 = arith.maximumf %14, %16 : vector<16x512xf32>
    %18 = arith.truncf %17 : vector<16x512xf32> to vector<16x512xbf16>
    %c0_12 = arith.constant 0 : index
    %c0_13 = arith.constant 0 : index
    %19 = vector.load %arg6[%c0_12, %c0_13] : memref<512x2048xbf16, #tpu.memory_space<vmem>>, vector<512x2048xbf16>
    %cst_14 = arith.constant dense<0.000000e+00> : vector<16x2048xf32>
    %20 = tpu.matmul %18, %19, %cst_14 {dimension_numbers = #tpu.dot_dimension_numbers<[1], [0], [0], [1], [0, 0, 1, 1], [], []>} : vector<16x512xbf16>, vector<512x2048xbf16>, vector<16x2048xf32> -> vector<16x2048xf32>
    %c0_15 = arith.constant 0 : index
    %c0_16 = arith.constant 0 : index
    %21 = vector.load %arg7[%c0_15, %c0_16] : memref<1x2048xf32, #tpu.memory_space<vmem>>, vector<1x2048xf32>
    %22 = vector.broadcast %21 : vector<1x2048xf32> to vector<16x2048xf32>
    %23 = arith.addf %20, %22 : vector<16x2048xf32>
    %cst_17 = arith.constant 2.000000e-02 : f32
    %24 = vector.broadcast %cst_17 : f32 to vector<16x2048xf32>
    %25 = arith.mulf %23, %24 : vector<16x2048xf32>
    %26 = arith.maximumf %23, %25 : vector<16x2048xf32>
    %c0_18 = arith.constant 0 : index
    %c0_19 = arith.constant 0 : index
    %27 = vector.load %arg8[%c0_18, %c0_19] : memref<1x2048xbf16, #tpu.memory_space<vmem>>, vector<1x2048xbf16>
    %28 = arith.extf %27 : vector<1x2048xbf16> to vector<1x2048xf32>
    %29 = vector.broadcast %28 : vector<1x2048xf32> to vector<16x2048xf32>
    %30 = arith.mulf %26, %29 : vector<16x2048xf32>
    %cst_20 = arith.constant dense<0.000000e+00> : vector<16xf32>
    %31 = vector.multi_reduction <add>, %30, %cst_20 [1] : vector<16x2048xf32> to vector<16xf32>
    %32 = vector.shape_cast %31 : vector<16xf32> to vector<16x1xf32>
    %c0_21 = arith.constant 0 : index
    %c0_22 = arith.constant 0 : index
    %33 = vector.load %arg9[%c0_21, %c0_22] : memref<1x1xf32, #tpu.memory_space<vmem>>, vector<1x1xf32>
    %34 = vector.broadcast %33 : vector<1x1xf32> to vector<16x1xf32>
    %35 = arith.addf %32, %34 : vector<16x1xf32>
    %cst_23 = arith.constant 0.000000e+00 : f32
    %36 = vector.broadcast %cst_23 : f32 to vector<16x1xf32>
    %37 = arith.subf %36, %35 : vector<16x1xf32>
    %38 = math.exp %37 : vector<16x1xf32>
    %cst_24 = arith.constant 1.000000e+00 : f32
    %39 = vector.broadcast %cst_24 : f32 to vector<16x1xf32>
    %40 = arith.addf %39, %38 : vector<16x1xf32>
    %41 = tpu.reciprocal %40 {approx = true} : vector<16x1xf32> -> vector<16x1xf32>
    %c0_25 = arith.constant 0 : index
    %c0_26 = arith.constant 0 : index
    %42 = vector.load %arg10[%c0_25, %c0_26] : memref<16x1xf32, #tpu.memory_space<vmem>>, vector<16x1xf32>
    tpu.vector_store %arg10[%c0_25, %c0_26], %41 {strides = array<i32>} : memref<16x1xf32, #tpu.memory_space<vmem>>, vector<16x1xf32>,
    return
  }
  func.func @transform_0(%arg0: i32) -> (i32, i32) {
    %c0_i32 = arith.constant 0 : i32
    %c0_i32_0 = arith.constant 0 : i32
    return %arg0, %c0_i32 : i32, i32
  }
  func.func @transform_1(%arg0: i32) -> (i32, i32) {
    %c0_i32 = arith.constant 0 : i32
    %c0_i32_0 = arith.constant 0 : i32
    %c0_i32_1 = arith.constant 0 : i32
    return %c0_i32, %c0_i32_0 : i32, i32
  }
  func.func @transform_2(%arg0: i32) -> (i32, i32) {
    %c0_i32 = arith.constant 0 : i32
    %c0_i32_0 = arith.constant 0 : i32
    %c0_i32_1 = arith.constant 0 : i32
    return %c0_i32, %c0_i32_0 : i32, i32
  }
  func.func @transform_3(%arg0: i32) -> (i32, i32) {
    %c0_i32 = arith.constant 0 : i32
    %c0_i32_0 = arith.constant 0 : i32
    %c0_i32_1 = arith.constant 0 : i32
    return %c0_i32, %c0_i32_0 : i32, i32
  }
  func.func @transform_4(%arg0: i32) -> (i32, i32) {
    %c0_i32 = arith.constant 0 : i32
    %c0_i32_0 = arith.constant 0 : i32
    %c0_i32_1 = arith.constant 0 : i32
    return %c0_i32, %c0_i32_0 : i32, i32
  }
  func.func @transform_5(%arg0: i32) -> (i32, i32) {
    %c0_i32 = arith.constant 0 : i32
    %c0_i32_0 = arith.constant 0 : i32
    %c0_i32_1 = arith.constant 0 : i32
    return %c0_i32, %c0_i32_0 : i32, i32
  }
  func.func @transform_6(%arg0: i32) -> (i32, i32) {
    %c0_i32 = arith.constant 0 : i32
    %c0_i32_0 = arith.constant 0 : i32
    %c0_i32_1 = arith.constant 0 : i32
    return %c0_i32, %c0_i32_0 : i32, i32
  }
  func.func @transform_7(%arg0: i32) -> (i32, i32) {
    %c0_i32 = arith.constant 0 : i32
    %c0_i32_0 = arith.constant 0 : i32
    %c0_i32_1 = arith.constant 0 : i32
    return %c0_i32, %c0_i32_0 : i32, i32
  }
  func.func @transform_8(%arg0: i32) -> (i32, i32) {
    %c0_i32 = arith.constant 0 : i32
    %c0_i32_0 = arith.constant 0 : i32
    %c0_i32_1 = arith.constant 0 : i32
    return %c0_i32, %c0_i32_0 : i32, i32
  }
  func.func @transform_9(%arg0: i32) -> (i32, i32) {
    %c0_i32 = arith.constant 0 : i32
    %c0_i32_0 = arith.constant 0 : i32
    return %arg0, %c0_i32 : i32, i32
  }
}

</mosaic_0001>

<bundles_post_ra>
// kernel: discriminator_forward.1
= control target key start
LH: loop header
LB: loop body
LE: loop exit
PB: predicated region body
PF: predicated region fallthrough
CT: control target
= control target key end

     0   :  { %s8821_s0 = inlined_call_operand.vmem [shape: bf16[16,784], index: 0, kind: input, shape index: {}]   ;;  %s8822_s1 = inlined_call_operand.hbm [shape: bf16[784,512], index: 1, kind: input, shape index: {}]   ;;  %s8823_s2 = inlined_call_operand.hbm [shape: f32[1,512], index: 2, kind: input, shape index: {}]   ;;  %s8824_s3 = inlined_call_operand.hbm [shape: bf16[512,512], index: 3, kind: input, shape index: {}]   ;;  %s8825_s4 = inlined_call_operand.hbm [shape: f32[1,512], index: 4, kind: input, shape index: {}]   ;;  %s8826_s5 = inlined_call_operand.hbm [shape: bf16[512,2048], index: 5, kind: input, shape index: {}]   ;;  %s8827_s6 = inlined_call_operand.hbm [shape: f32[1,2048], index: 6, kind: input, shape index: {}]   ;;  %s8828_s7 = inlined_call_operand.hbm [shape: bf16[1,2048], index: 7, kind: input, shape index: {}]   ;;  %s8829_s8 = inlined_call_operand.<no memory space> [shape: f32[1,1], index: 8, kind: input, shape index: {}]   ;;  %s8830_s9 = inlined_call_operand.vmem [shape: f32[16,1], index: 9, kind: output, shape index: {}]  }
   0x1   :  { %v14_v0 = vstv %s8829_s8 }
   0x2   :  { %15 = vst [vmem:[#allocation2] sm:$0x1] %v14_v0 }
   0x3   :  { %16 = vsyncpa [#allocation4], 0 }
   0x4   :  { %17 = vsyncpa [#allocation6], 0 }
   0x5   :  { %18 = vsyncpa [#allocation9], 0 }
   0x6   :  { %19 = vsyncpa [#allocation12], 0  ;;  %s8382_s11 = smov [#allocation5]   ;;  %s8383_s13 = smov [#allocation8]  }
   0x7   :  { %s40_s12 = sshll.u32 %s8382_s11, 4  ;;  %s62_s14 = sshll.u32 %s8383_s13, 4  ;;  %s41_s12 = int_to_ptr.vmem [resolvable:$true] %s40_s12  ;;  %s63_s14 = int_to_ptr.vmem [resolvable:$true] %s62_s14 }
   0x8   :  { %s8242_s15 = scalar_lea.vmem %s41_s12, 64  ;;  %p8247_p1 = scmp.lt.s32.totalorder %s41_s12, %s41_s12 }
   0x9   :  { %p8243_p0 = scmp.ne.s32.totalorder %s41_s12, %s8242_s15  ;;  %p8248_p2 = scmp.lt.s32.totalorder %s8242_s15, %s8242_s15 }
   0xb   :  { %p8249_p3 = por %p8248_p2, %p8247_p1 }
   0xd   :  { %p8250_p4 = pnand %p8249_p3, %p8243_p0 }
   0xf   :  { %8253 = shalt.err (!%p8250_p4)
}
  0x10   :  { %43 = dma.hbm_to_vmem [thread:$0]  %s8823_s2, 64, %s41_s12, [#allocation6]  }
  0x11   :  { %s8262_s17 = scalar_lea.vmem %s63_s14, 64  ;;  %p8267_p6 = scmp.lt.s32.totalorder %s63_s14, %s63_s14 }
  0x12   :  { %p8263_p5 = scmp.ne.s32.totalorder %s63_s14, %s8262_s17  ;;  %p8268_p7 = scmp.lt.s32.totalorder %s8262_s17, %s8262_s17 }
  0x14   :  { %p8269_p8 = por %p8268_p7, %p8267_p6 }
  0x16   :  { %p8270_p9 = pnand %p8269_p8, %p8263_p5 }
  0x18   :  { %8273 = shalt.err (!%p8270_p9)
}
  0x19   :  { %65 = dma.hbm_to_vmem [thread:$0]  %s8825_s4, 64, %s63_s14, [#allocation9]  }
  0x1a   :  { %s8384_s20 = smov [#allocation11]   ;;  %s8385_s22 = smov [#allocation3]  }
  0x1b   :  { %s84_s21 = sshll.u32 %s8384_s20, 4  ;;  %s27_s23 = sshll.u32 %s8385_s22, 4  ;;  %s85_s21 = int_to_ptr.vmem [resolvable:$true] %s84_s21  ;;  %s28_s23 = int_to_ptr.vmem [resolvable:$true] %s27_s23 }
  0x1c   :  { %s8282_s24 = scalar_lea.vmem %s85_s21, 256  ;;  %p8287_p11 = scmp.lt.s32.totalorder %s85_s21, %s85_s21 }
  0x1d   :  { %p8283_p10 = scmp.ne.s32.totalorder %s85_s21, %s8282_s24  ;;  %p8288_p12 = scmp.lt.s32.totalorder %s8282_s24, %s8282_s24 }
  0x1f   :  { %p8289_p13 = por %p8288_p12, %p8287_p11 }
  0x21   :  { %p8290_p0 = pnand %p8289_p13, %p8283_p10 }
  0x23   :  { %8293 = shalt.err (!%p8290_p0)
}
  0x24   :  { %87 = dma.hbm_to_vmem [thread:$0]  %s8827_s6, 256, %s85_s21, [#allocation12]  }
  0x25   :  { %s8302_s26 = scalar_lea.vmem %s28_s23, 25088  ;;  %p8307_p2 = scmp.lt.s32.totalorder %s28_s23, %s28_s23 }
  0x26   :  { %p8303_p1 = scmp.ne.s32.totalorder %s28_s23, %s8302_s26  ;;  %p8308_p3 = scmp.lt.s32.totalorder %s8302_s26, %s8302_s26 }
  0x28   :  { %p8309_p4 = por %p8308_p3, %p8307_p2 }
  0x2a   :  { %p8310_p5 = pnand %p8309_p4, %p8303_p1 }
  0x2c   :  { %8313 = shalt.err (!%p8310_p5)
}
  0x2d   :  { %s8386_s4 = smov 256   ;;  %s8387_s27 = smov 16  }
  0x2e   :  { %33 = dma.hbm_to_vmem [thread:$0]  %s8822_s1, 25088, %s28_s23, [#allocation4], %s8386_s4, %s8386_s4, %s8387_s27  }
  0x2f   :  { %s8388_s30 = smov [#allocation7]   ;;  %s8389_s11 = smov [#allocation10]  }
  0x30   :  { %s49_s10 = sshll.u32 %s8388_s30, 4  ;;  %s71_s12 = sshll.u32 %s8389_s11, 4  ;;  %s50_s10 = int_to_ptr.vmem [resolvable:$true] %s49_s10  ;;  %s72_s12 = int_to_ptr.vmem [resolvable:$true] %s71_s12 }
  0x31   :  { %s8322_s6 = scalar_lea.vmem %s50_s10, 16384  ;;  %p8327_p7 = scmp.lt.s32.totalorder %s50_s10, %s50_s10 }
  0x32   :  { %p8323_p6 = scmp.ne.s32.totalorder %s50_s10, %s8322_s6  ;;  %p8328_p8 = scmp.lt.s32.totalorder %s8322_s6, %s8322_s6 }
  0x34   :  { %p8329_p9 = por %p8328_p8, %p8327_p7 }
  0x36   :  { %p8330_p10 = pnand %p8329_p9, %p8323_p6 }
  0x38   :  { %8333 = shalt.err (!%p8330_p10)
}
  0x39   :  { %55 = dma.hbm_to_vmem [thread:$0]  %s8824_s3, 16384, %s50_s10, [#allocation6], %s8386_s4, %s8386_s4, %s8387_s27  }
  0x3a   :  { %s8342_s15 = scalar_lea.vmem %s72_s12, 65536  ;;  %p8347_p12 = scmp.lt.s32.totalorder %s72_s12, %s72_s12 }
  0x3b   :  { %p8343_p11 = scmp.ne.s32.totalorder %s72_s12, %s8342_s15  ;;  %p8348_p13 = scmp.lt.s32.totalorder %s8342_s15, %s8342_s15 }
  0x3d   :  { %p8349_p0 = por %p8348_p13, %p8347_p12 }
  0x3f   :  { %p8350_p1 = pnand %p8349_p0, %p8343_p11 }
  0x41   :  { %8353 = shalt.err (!%p8350_p1)
}
  0x42   :  { %s8390_s1 = smov 1024   ;;  %s8391_s16 = smov 64  }
  0x43   :  { %77 = dma.hbm_to_vmem [thread:$0]  %s8826_s5, 65536, %s72_s12, [#allocation9], %s8390_s1, %s8390_s1, %s8391_s16  }
  0x44   :  { %s8392_s18 = smov [#allocation13]  }
  0x45   :  { %s94_s19 = sshll.u32 %s8392_s18, 4  ;;  %s95_s19 = int_to_ptr.vmem [resolvable:$true] %s94_s19 }
  0x46   :  { %s8362_s20 = scalar_lea.vmem %s95_s19, 256  ;;  %p8367_p3 = scmp.lt.s32.totalorder %s95_s19, %s95_s19 }
  0x47   :  { %p8363_p2 = scmp.ne.s32.totalorder %s95_s19, %s8362_s20  ;;  %p8368_p4 = scmp.lt.s32.totalorder %s8362_s20, %s8362_s20 }
  0x49   :  { %p8369_p5 = por %p8368_p4, %p8367_p3 }
  0x4b   :  { %p8370_p6 = pnand %p8369_p5, %p8363_p2 }
  0x4d   :  { %8373 = shalt.err (!%p8370_p6)
}
  0x4e   :  { %97 = dma.hbm_to_vmem [thread:$0]  %s8828_s7, 256, %s95_s19, [#allocation12]  }
  0x4f   :  { %8374 = dma.done.wait [#allocation4], 25088  }
  0x50   :  { %8375 = vsyncadd [#allocation4], 4294942208 }
  0x51   :  { %8376 = dma.done.wait [#allocation6], 16448  }
  0x52   :  { %8377 = vsyncadd [#allocation6], 4294950848 }
  0x53   :  { %8378 = dma.done.wait [#allocation9], 65600  }
  0x54   :  { %8379 = vsyncadd [#allocation9], 4294901696 }
  0x55   :  { %8380 = dma.done.wait [#allocation12], 512  }
  0x56   :  { %8381 = vsyncadd [#allocation12], 4294966784  ;;  %v7729_v1 = vld [vmem:[#allocation3 + $0xe4] ss:$16 sps:$4 sm:$0xff]   ;;  %v7733_v3 = vld [vmem:[#allocation3 + $0xe0] ss:$16 sps:$4 sm:$0xff]  }
  0x57   :  { %v7731_v2 = vld [vmem:[#allocation3 + $0x2e4] ss:$16 sps:$4 sm:$0xff]   ;;  %1367 = vmatprep.subr.bf16.mxu0 %v7729_v1  ;;  %v7734_v4 = vld [vmem:[#allocation3 + $0x2e0] ss:$16 sps:$4 sm:$0xff]   ;;  %vm1363_vm0 = vcmask 130048   ;;  %vm6860_vm1 = vcmask 7168  }
  0x58   :  { %1410 = vmatprep.subr.bf16.mxu1 %v7731_v2  ;;  %v7735_v5 = vld [vmem:[#allocation3 + $0xc4] ss:$16 sps:$4 sm:$0xff]   ;;  %1368 = vmatpush1.bf16.msra.mxu0 %v7733_v3  ;;  %v7739_v7 = vld [vmem:[#allocation3 + $0xc0] ss:$16 sps:$4 sm:$0xff]  }
  0x59   :  { %1411 = vmatpush1.bf16.msra.mxu1 %v7734_v4  ;;  %v7737_v6 = vld [vmem:[#allocation3 + $0x2c4] ss:$16 sps:$4 sm:$0xff]   ;;  %1369 = vmatprep.subr.bf16.mxu0 %v7735_v5  ;;  %v7740_v8 = vld [vmem:[#allocation3 + $0x2c0] ss:$16 sps:$4 sm:$0xff]  }
  0x5a   :  { %1412 = vmatprep.subr.bf16.mxu1 %v7737_v6  ;;  %v7741_v9 = vld [vmem:[#allocation3 + $0xa4] ss:$16 sps:$4 sm:$0xff]   ;;  %v7745_v11 = vld [vmem:[#allocation3 + $0xa0] ss:$16 sps:$4 sm:$0xff]  }
  0x5b   :  { %v7743_v10 = vld [vmem:[#allocation3 + $0x2a4] ss:$16 sps:$4 sm:$0xff]   ;;  %v7746_v12 = vld [vmem:[#allocation3 + $0x2a0] ss:$16 sps:$4 sm:$0xff]  }
  0x5c   :  { %1370 = vmatpush1.bf16.msra.mxu0 %v7739_v7  ;;  %v7747_v13 = vld [vmem:[#allocation3 + $0x84] ss:$16 sps:$4 sm:$0xff]   ;;  %v7751_v15 = vld [vmem:[#allocation3 + $0x80] ss:$16 sps:$4 sm:$0xff]  }
  0x5d   :  { %1413 = vmatpush1.bf16.msra.mxu1 %v7740_v8  ;;  %1371 = vmatprep.subr.bf16.mxu0 %v7741_v9  ;;  %v7749_v14 = vld [vmem:[#allocation3 + $0x284] ss:$16 sps:$4 sm:$0xff]   ;;  %v7752_v16 = vld [vmem:[#allocation3 + $0x280] ss:$16 sps:$4 sm:$0xff]  }
  0x5e   :  { %1414 = vmatprep.subr.bf16.mxu1 %v7743_v10  ;;  %v7753_v17 = vld [vmem:[#allocation3 + $0x64] ss:$16 sps:$4 sm:$0xff]   ;;  %v7757_v19 = vld [vmem:[#allocation3 + $0x60] ss:$16 sps:$4 sm:$0xff]   ;;  %v7842_v10 = vld [vmem:[#allocation3 + $0xec] ss:$16 sps:$4 sm:$0xff]  }
  0x5f   :  { %v7755_v18 = vld [vmem:[#allocation3 + $0x264] ss:$16 sps:$4 sm:$0xff]   ;;  %v7758_v20 = vld [vmem:[#allocation3 + $0x260] ss:$16 sps:$4 sm:$0xff]  }
  0x60   :  { %1372 = vmatpush1.bf16.msra.mxu0 %v7745_v11  ;;  %v7759_v21 = vld [vmem:[#allocation3 + $0x44] ss:$16 sps:$4 sm:$0xff]   ;;  %v7763_v23 = vld [vmem:[#allocation3 + $0x40] ss:$16 sps:$4 sm:$0xff]  }
  0x61   :  { %1415 = vmatpush1.bf16.msra.mxu1 %v7746_v12  ;;  %1373 = vmatprep.subr.bf16.mxu0 %v7747_v13  ;;  %v7761_v22 = vld [vmem:[#allocation3 + $0x244] ss:$16 sps:$4 sm:$0xff]   ;;  %v7764_v24 = vld [vmem:[#allocation3 + $0x240] ss:$16 sps:$4 sm:$0xff]   ;;  %v8393_v12 = vmov 0  }
  0x62   :  { %1416 = vmatprep.subr.bf16.mxu1 %v7749_v14  ;;  %v7765_v25 = vld [vmem:[#allocation3 + $0x24] ss:$16 sps:$4 sm:$0xff]   ;;  %v7769_v27 = vld [vmem:[#allocation3 + $0x20] ss:$16 sps:$4 sm:$0xff]   ;;  %v7840_v14 = vld [vmem:[#allocation3 + $0xe8] ss:$16 sps:$4 sm:$0xff]  }
  0x63   :  { %v7767_v26 = vld [vmem:[#allocation3 + $0x224] ss:$16 sps:$4 sm:$0xff]   ;;  %v7770_v28 = vld [vmem:[#allocation3 + $0x220] ss:$16 sps:$4 sm:$0xff]  }
  0x64   :  { %1374 = vmatpush1.bf16.msra.mxu0 %v7751_v15  ;;  %v7771_v29 = vld [vmem:[#allocation3 + $0x4] ss:$16 sps:$4 sm:$0xff]   ;;  %v7775_v31 = vld [vmem:[#allocation3] ss:$16 sps:$4 sm:$0xff]  }
  0x65   :  { %1417 = vmatpush1.bf16.msra.mxu1 %v7752_v16  ;;  %1375 = vmatprep.subr.bf16.mxu0 %v7753_v17  ;;  %v7773_v30 = vld [vmem:[#allocation3 + $0x204] ss:$16 sps:$4 sm:$0xff]   ;;  %v7776_v32 = vld [vmem:[#allocation3 + $0x200] ss:$16 sps:$4 sm:$0xff]   ;;  %v7849_v17 = vld [vmem:[#allocation3 + $0xcc] ss:$16 sps:$4 sm:$0xff]  }
  0x66   :  { %1418 = vmatprep.subr.bf16.mxu1 %v7755_v18  ;;  %v7777_v33 = vld [vmem:[#allocation3 + $0x1e4] ss:$16 sps:$4 sm:$0xff]   ;;  %v7781_v35 = vld [vmem:[#allocation3 + $0x1e0] ss:$16 sps:$4 sm:$0xff]  }
  0x67   :  { %v7779_v34 = vld [vmem:[#allocation3 + $0x3e4] ss:$16 sps:$4 sm:$0xff]   ;;  %v7782_v36 = vld [vmem:[#allocation3 + $0x3e0] ss:$16 sps:$4 sm:$0xff]  }
  0x68   :  { %1376 = vmatpush1.bf16.msra.mxu0 %v7757_v19  ;;  %v7783_v37 = vld [vmem:[#allocation3 + $0x1c4] ss:$16 sps:$4 sm:$0xff]   ;;  %v7787_v39 = vld [vmem:[#allocation3 + $0x1c0] ss:$16 sps:$4 sm:$0xff]   ;;  %v7847_v19 = vld [vmem:[#allocation3 + $0xc8] ss:$16 sps:$4 sm:$0xff]  }
  0x69   :  { %1419 = vmatpush1.bf16.msra.mxu1 %v7758_v20  ;;  %1377 = vmatprep.subr.bf16.mxu0 %v7759_v21  ;;  %v7785_v38 = vld [vmem:[#allocation3 + $0x3c4] ss:$16 sps:$4 sm:$0xff]   ;;  %v7788_v40 = vld [vmem:[#allocation3 + $0x3c0] ss:$16 sps:$4 sm:$0xff]   ;;  %v7855_v21 = vld [vmem:[#allocation3 + $0xac] ss:$16 sps:$4 sm:$0xff]  }
  0x6a   :  { %1420 = vmatprep.subr.bf16.mxu1 %v7761_v22  ;;  %v7789_v41 = vld [vmem:[#allocation3 + $0x1a4] ss:$16 sps:$4 sm:$0xff]   ;;  %v7793_v43 = vld [vmem:[#allocation3 + $0x1a0] ss:$16 sps:$4 sm:$0xff]  }
  0x6b   :  { %v7791_v42 = vld [vmem:[#allocation3 + $0x3a4] ss:$16 sps:$4 sm:$0xff]   ;;  %v7794_v44 = vld [vmem:[#allocation3 + $0x3a0] ss:$16 sps:$4 sm:$0xff]  }
  0x6c   :  { %1378 = vmatpush1.bf16.msra.mxu0 %v7763_v23  ;;  %v7795_v45 = vld [vmem:[#allocation3 + $0x184] ss:$16 sps:$4 sm:$0xff]   ;;  %v7799_v47 = vld [vmem:[#allocation3 + $0x180] ss:$16 sps:$4 sm:$0xff]   ;;  %v7853_v23 = vld [vmem:[#allocation3 + $0xa8] ss:$16 sps:$4 sm:$0xff]  }
  0x6d   :  { %1421 = vmatpush1.bf16.msra.mxu1 %v7764_v24  ;;  %1379 = vmatprep.subr.bf16.mxu0 %v7765_v25  ;;  %v7797_v46 = vld [vmem:[#allocation3 + $0x384] ss:$16 sps:$4 sm:$0xff]   ;;  %v7800_v48 = vld [vmem:[#allocation3 + $0x380] ss:$16 sps:$4 sm:$0xff]   ;;  %v7861_v25 = vld [vmem:[#allocation3 + $0x8c] ss:$16 sps:$4 sm:$0xff]  }
  0x6e   :  { %1422 = vmatprep.subr.bf16.mxu1 %v7767_v26  ;;  %v7801_v49 = vld [vmem:[#allocation3 + $0x164] ss:$16 sps:$4 sm:$0xff]   ;;  %v7805_v53 = vld [vmem:[#allocation3 + $0x160] ss:$16 sps:$4 sm:$0xff]  }
  0x6f   :  { %v8471_v50 = vld [vmem:[%s8821_s0 + $0x4] ss:$28 sps:$4 sm:$0xff]   ;;  %v8476_v52 = vld [vmem:[%s8821_s0 + $0xc] ss:$28 sps:$4 sm:$0xff]   ;;  %v8493_v15 = vld [vmem:[%s8821_s0 + $0x18] ss:$28 sps:$4 sm:$0xff]  }
  0x70   :  { %1380 = vmatpush1.bf16.msra.mxu0 %v7769_v27  ;;  %v7803_v51 = vld [vmem:[#allocation3 + $0x364] ss:$16 sps:$4 sm:$0xff]   ;;  %1399 = vmatprep.mubr.bf16.mxu0 %v8471_v50  ;;  %v7806_v54 = vld [vmem:[#allocation3 + $0x360] ss:$16 sps:$4 sm:$0xff]   ;;  %v7859_v27 = vld [vmem:[#allocation3 + $0x88] ss:$16 sps:$4 sm:$0xff]  }
  0x71   :  { %1423 = vmatpush1.bf16.msra.mxu1 %v7770_v28  ;;  %1381 = vmatprep.subr.bf16.mxu0 %v7771_v29  ;;  %v7807_v55 = vld [vmem:[#allocation3 + $0x144] ss:$16 sps:$4 sm:$0xff]   ;;  %v7811_v57 = vld [vmem:[#allocation3 + $0x140] ss:$16 sps:$4 sm:$0xff]   ;;  %v7867_v29 = vld [vmem:[#allocation3 + $0x6c] ss:$16 sps:$4 sm:$0xff]  }
  0x72   :  { %1424 = vmatprep.subr.bf16.mxu1 %v7773_v30  ;;  %1442 = vmatprep.mubr.bf16.mxu1 %v8476_v52  ;;  %v7809_v56 = vld [vmem:[#allocation3 + $0x344] ss:$16 sps:$4 sm:$0xff]   ;;  %v7812_v58 = vld [vmem:[#allocation3 + $0x340] ss:$16 sps:$4 sm:$0xff]  }
  0x73   :  { %v7813_v59 = vld [vmem:[#allocation3 + $0x124] ss:$16 sps:$4 sm:$0xff]   ;;  %v7817_v61 = vld [vmem:[#allocation3 + $0x120] ss:$16 sps:$4 sm:$0xff]  }
  0x74   :  { %1382 = vmatpush1.bf16.msra.mxu0 %v7775_v31  ;;  %v7815_v60 = vld [vmem:[#allocation3 + $0x324] ss:$16 sps:$4 sm:$0xff]   ;;  %v7818_v62 = vld [vmem:[#allocation3 + $0x320] ss:$16 sps:$4 sm:$0xff]   ;;  %v7865_v31 = vld [vmem:[#allocation3 + $0x68] ss:$16 sps:$4 sm:$0xff]  }
  0x75   :  { %1425 = vmatpush1.bf16.msra.mxu1 %v7776_v32  ;;  %1383 = vmatprep.subr.bf16.mxu0 %v7777_v33  ;;  %v7819_v63 = vld [vmem:[#allocation3 + $0x104] ss:$16 sps:$4 sm:$0xff]   ;;  %v7823_v1 = vld [vmem:[#allocation3 + $0x100] ss:$16 sps:$4 sm:$0xff]   ;;  %v7873_v33 = vld [vmem:[#allocation3 + $0x4c] ss:$16 sps:$4 sm:$0xff]  }
  0x76   :  { %1426 = vmatprep.subr.bf16.mxu1 %v7779_v34  ;;  %v7821_v0 = vld [vmem:[#allocation3 + $0x304] ss:$16 sps:$4 sm:$0xff]   ;;  %v7824_v2 = vld [vmem:[#allocation3 + $0x300] ss:$16 sps:$4 sm:$0xff]  }
  0x77   :  { %v7833_v3 = vld [vmem:[#allocation3 + $0x4e4] ss:$16 sps:$4 sm:$0xff]   ;;  %v8483_v5 = vld [vmem:[%s8821_s0] ss:$28 sps:$4 sm:$0xff]  }
  0x78   :  { %1384 = vmatpush2.bf16.msra.mxu0 %v7781_v35  ;;  %v7836_v4 = vld [vmem:[#allocation3 + $0x604] ss:$16 sps:$4 sm:$0xff]   ;;  %v7831_v7 = vld [vmem:[#allocation3 + $0x4e0] ss:$16 sps:$4 sm:$0xff]  }
  0x79   :  { %1427 = vmatpush2.bf16.msra.mxu1 %v7782_v36  ;;  %1385 = vmatprep.subr.bf16.mxu0 %v7783_v37  ;;  %v7828_v6 = vld [vmem:[%s8821_s0 + $0x8] ss:$28 sps:$4 sm:$0xff]   ;;  %v8501_v34 = vld [vmem:[%s8821_s0 + $0x14] ss:$28 sps:$4 sm:$0xff]  }
  0x7a   :  { %1428 = vmatprep.subr.bf16.mxu1 %v7785_v38  ;;  %v7834_v8 = vld [vmem:[#allocation3 + $0x600] ss:$16 sps:$4 sm:$0xff]   ;;  %v7839_v9 = vld [vmem:[#allocation3 + $0x4c4] ss:$16 sps:$4 sm:$0xff]   ;;  %v7871_v36 = vld [vmem:[#allocation3 + $0x48] ss:$16 sps:$4 sm:$0xff]  }
  0x7b   :  { %v7837_v11 = vld [vmem:[#allocation3 + $0x4c0] ss:$16 sps:$4 sm:$0xff]   ;;  %v7845_v13 = vld [vmem:[#allocation3 + $0x4a4] ss:$16 sps:$4 sm:$0xff]   ;;  %v7879_v38 = vld [vmem:[#allocation3 + $0x2c] ss:$16 sps:$4 sm:$0xff]  }
  0x7c   :  { %1386 = vmatpush2.bf16.msra.mxu0 %v7787_v39  ;;  %v7843_v16 = vld [vmem:[#allocation3 + $0x4a0] ss:$16 sps:$4 sm:$0xff]   ;;  %v7852_v18 = vld [vmem:[#allocation3 + $0x484] ss:$16 sps:$4 sm:$0xff]  }
  0x7d   :  { %1429 = vmatpush2.bf16.msra.mxu1 %v7788_v40  ;;  %1387 = vmatprep.subr.bf16.mxu0 %v7789_v41  ;;  %v7850_v20 = vld [vmem:[#allocation3 + $0x480] ss:$16 sps:$4 sm:$0xff]   ;;  %v7858_v22 = vld [vmem:[#allocation3 + $0x464] ss:$16 sps:$4 sm:$0xff]   ;;  %v7877_v40 = vld [vmem:[#allocation3 + $0x28] ss:$16 sps:$4 sm:$0xff]  }
  0x7e   :  { %1430 = vmatprep.subr.bf16.mxu1 %v7791_v42  ;;  %v7856_v24 = vld [vmem:[#allocation3 + $0x460] ss:$16 sps:$4 sm:$0xff]   ;;  %v7864_v26 = vld [vmem:[#allocation3 + $0x444] ss:$16 sps:$4 sm:$0xff]   ;;  %v7885_v42 = vld [vmem:[#allocation3 + $0xc] ss:$16 sps:$4 sm:$0xff]  }
  0x7f   :  { %v7862_v28 = vld [vmem:[#allocation3 + $0x440] ss:$16 sps:$4 sm:$0xff]   ;;  %v7870_v30 = vld [vmem:[#allocation3 + $0x424] ss:$16 sps:$4 sm:$0xff]  }
  0x80   :  { %1388 = vmatpush2.bf16.msra.mxu0 %v7793_v43  ;;  %v7868_v32 = vld [vmem:[#allocation3 + $0x420] ss:$16 sps:$4 sm:$0xff]   ;;  %v7876_v35 = vld [vmem:[#allocation3 + $0x404] ss:$16 sps:$4 sm:$0xff]  }
  0x81   :  { %1431 = vmatpush2.bf16.msra.mxu1 %v7794_v44  ;;  %1389 = vmatprep.subr.bf16.mxu0 %v7795_v45  ;;  %v7874_v37 = vld [vmem:[#allocation3 + $0x400] ss:$16 sps:$4 sm:$0xff]   ;;  %v7882_v39 = vld [vmem:[#allocation3 + $0x5e4] ss:$16 sps:$4 sm:$0xff]   ;;  %v7883_v44 = vld [vmem:[#allocation3 + $0x8] ss:$16 sps:$4 sm:$0xff]  }
  0x82   :  { %1432 = vmatprep.subr.bf16.mxu1 %v7797_v46  ;;  %v7880_v41 = vld [vmem:[#allocation3 + $0x5e0] ss:$16 sps:$4 sm:$0xff]   ;;  %v7888_v43 = vld [vmem:[#allocation3 + $0x5c4] ss:$16 sps:$4 sm:$0xff]   ;;  %v7891_v46 = vld [vmem:[#allocation3 + $0x1ec] ss:$16 sps:$4 sm:$0xff]  }
  0x83   :  { %v7886_v45 = vld [vmem:[#allocation3 + $0x5c0] ss:$16 sps:$4 sm:$0xff]  }
  0x84   :  { %1390 = vmatpush2.bf16.msra.mxu0 %v7799_v47  ;;  %v7894_v47 = vld [vmem:[#allocation3 + $0x5a4] ss:$16 sps:$4 sm:$0xff]  }
  0x85   :  { %1433 = vmatpush2.bf16.msra.mxu1 %v7800_v48  ;;  %1391 = vmatprep.subr.bf16.mxu0 %v7801_v49  ;;  %v7889_v48 = vld [vmem:[#allocation3 + $0x1e8] ss:$16 sps:$4 sm:$0xff]   ;;  %v7892_v49 = vld [vmem:[#allocation3 + $0x5a0] ss:$16 sps:$4 sm:$0xff]  }
  0x86   :  { %1434 = vmatprep.subr.bf16.mxu1 %v7803_v51  ;;  %v7900_v51 = vld [vmem:[#allocation3 + $0x584] ss:$16 sps:$4 sm:$0xff]  }
  0x88   :  { %1392 = vmatpush2.bf16.msra.mxu0 %v7805_v53  ;;  %v7895_v53 = vld [vmem:[#allocation3 + $0x1c8] ss:$16 sps:$4 sm:$0xff]  }
  0x89   :  { %1435 = vmatpush2.bf16.msra.mxu1 %v7806_v54  ;;  %1393 = vmatprep.subr.bf16.mxu0 %v7807_v55  ;;  %v7898_v54 = vld [vmem:[#allocation3 + $0x580] ss:$16 sps:$4 sm:$0xff]   ;;  %v7903_v55 = vld [vmem:[#allocation3 + $0x1ac] ss:$16 sps:$4 sm:$0xff]  }
  0x8a   :  { %1436 = vmatprep.subr.bf16.mxu1 %v7809_v56  ;;  %v7906_v56 = vld [vmem:[#allocation3 + $0x564] ss:$16 sps:$4 sm:$0xff]  }
  0x8c   :  { %1394 = vmatpush2.bf16.msra.mxu0 %v7811_v57  ;;  %v7901_v57 = vld [vmem:[#allocation3 + $0x1a8] ss:$16 sps:$4 sm:$0xff]  }
  0x8d   :  { %1437 = vmatpush2.bf16.msra.mxu1 %v7812_v58  ;;  %1395 = vmatprep.subr.bf16.mxu0 %v7813_v59  ;;  %v7904_v58 = vld [vmem:[#allocation3 + $0x560] ss:$16 sps:$4 sm:$0xff]   ;;  %v7909_v59 = vld [vmem:[#allocation3 + $0x18c] ss:$16 sps:$4 sm:$0xff]  }
  0x8e   :  { %1438 = vmatprep.subr.bf16.mxu1 %v7815_v60  ;;  %v7912_v60 = vld [vmem:[#allocation3 + $0x544] ss:$16 sps:$4 sm:$0xff]  }
  0x90   :  { %1396 = vmatpush2.bf16.msra.mxu0 %v7817_v61  ;;  %v7907_v61 = vld [vmem:[#allocation3 + $0x188] ss:$16 sps:$4 sm:$0xff]  }
  0x91   :  { %1439 = vmatpush2.bf16.msra.mxu1 %v7818_v62  ;;  %1397 = vmatprep.subr.bf16.mxu0 %v7819_v63  ;;  %v7910_v62 = vld [vmem:[#allocation3 + $0x540] ss:$16 sps:$4 sm:$0xff]   ;;  %v7915_v63 = vld [vmem:[#allocation3 + $0x16c] ss:$16 sps:$4 sm:$0xff]  }
  0x92   :  { %1440 = vmatprep.subr.bf16.mxu1 %v7821_v0  ;;  %v7918_v0 = vld [vmem:[#allocation3 + $0x524] ss:$16 sps:$4 sm:$0xff]  }
  0x94   :  { %1398 = vmatpush2.bf16.msra.mxu0 %v7823_v1  ;;  %v7913_v1 = vld [vmem:[#allocation3 + $0x168] ss:$16 sps:$4 sm:$0xff]  }
  0x95   :  { %1441 = vmatpush2.bf16.msra.mxu1 %v7824_v2  ;;  %1453 = vmatprep.subr.bf16.mxu0 %v7833_v3  ;;  %v7916_v2 = vld [vmem:[#allocation3 + $0x520] ss:$16 sps:$4 sm:$0xff]   ;;  %v7921_v3 = vld [vmem:[#allocation3 + $0x14c] ss:$16 sps:$4 sm:$0xff]  }
  0x96   :  { %1510 = vmatprep.subr.bf16.mxu1 %v7836_v4  ;;  %v7924_v4 = vld [vmem:[#allocation3 + $0x504] ss:$16 sps:$4 sm:$0xff]  }
  0x97   :  { %1400 = vmatmul.mubr.bf16.vlgmr.msra.gmra.mxu0 %v8483_v5 }
  0x98   :  { %1443 = vmatmul.mubr.bf16.vlgmr.msra.gmra.mxu1 %v7828_v6  ;;  %1454 = vmatpush1.bf16.msra.mxu0 %v7831_v7  ;;  %v7919_v6 = vld [vmem:[#allocation3 + $0x148] ss:$16 sps:$4 sm:$0xff]   ;;  %v7922_v7 = vld [vmem:[#allocation3 + $0x500] ss:$16 sps:$4 sm:$0xff]  }
  0x99   :  { %1511 = vmatpush1.bf16.msra.mxu1 %v7834_v8  ;;  %1455 = vmatprep.subr.bf16.mxu0 %v7839_v9  ;;  %v7930_v8 = vld [vmem:[#allocation3 + $0x12c] ss:$16 sps:$4 sm:$0xff]  }
  0x9a   :  { %1528 = vmatprep.mubr.bf16.mxu1 %v8393_v12  ;;  %1539 = vmatprep.subr.bf16.mxu1 %v7842_v10  ;;  %v7933_v9 = vld [vmem:[#allocation3 + $0x2ec] ss:$16 sps:$4 sm:$0xff]  }
  0x9b   :  { %1485 = vmatprep.mubr.bf16.mxu0 %v8501_v34  ;;  %v8507_v10 = vld [vmem:[%s8821_s0 + $0x10] ss:$28 sps:$4 sm:$0xff]  }
  0x9c   :  { %1456 = vmatpush1.bf16.msra.mxu0 %v7837_v11  ;;  %v7928_v11 = vld [vmem:[#allocation3 + $0x128] ss:$16 sps:$4 sm:$0xff]  }
  0x9d   :  { %1457 = vmatprep.subr.bf16.mxu0 %v7845_v13  ;;  %v7931_v13 = vld [vmem:[#allocation3 + $0x2e8] ss:$16 sps:$4 sm:$0xff]  }
  0xa0   :  { %7074 = vmatmul.mubr.msk.bf16.vlgmr.msra.gmra.mxu1 %vm1363_vm0, %v8493_v15  ;;  %1458 = vmatpush1.bf16.msra.mxu0 %v7843_v16  ;;  %v7939_v16 = vld [vmem:[#allocation3 + $0x2cc] ss:$16 sps:$4 sm:$0xff]  }
  0xa1   :  { %1540 = vmatpush1.bf16.msra.mxu1 %v7840_v14  ;;  %1459 = vmatprep.subr.bf16.mxu0 %v7852_v18  ;;  %v7936_v14 = vld [vmem:[#allocation3 + $0x10c] ss:$16 sps:$4 sm:$0xff]   ;;  %v7937_v18 = vld [vmem:[#allocation3 + $0x2c8] ss:$16 sps:$4 sm:$0xff]  }
  0xa2   :  { %1541 = vmatprep.subr.bf16.mxu1 %v7849_v17  ;;  %1571 = vmatprep.mubr.bf16.mxu1 %v8471_v50  ;;  %v7897_v50 = vld [vmem:[#allocation3 + $0x1cc] ss:$16 sps:$4 sm:$0xff]   ;;  %v7934_v17 = vld [vmem:[#allocation3 + $0x108] ss:$16 sps:$4 sm:$0xff]  }
  0xa4   :  { %1460 = vmatpush1.bf16.msra.mxu0 %v7850_v20  ;;  %v7945_v20 = vld [vmem:[#allocation3 + $0x2ac] ss:$16 sps:$4 sm:$0xff]  }
  0xa5   :  { %1542 = vmatpush1.bf16.msra.mxu1 %v7847_v19  ;;  %1461 = vmatprep.subr.bf16.mxu0 %v7858_v22  ;;  %v7942_v19 = vld [vmem:[#allocation3 + $0x4ec] ss:$16 sps:$4 sm:$0xff]   ;;  %v7943_v22 = vld [vmem:[#allocation3 + $0x2a8] ss:$16 sps:$4 sm:$0xff]  }
  0xa6   :  { %1543 = vmatprep.subr.bf16.mxu1 %v7855_v21  ;;  %v7940_v21 = vld [vmem:[#allocation3 + $0x4e8] ss:$16 sps:$4 sm:$0xff]  }
  0xa8   :  { %1462 = vmatpush1.bf16.msra.mxu0 %v7856_v24  ;;  %v7951_v24 = vld [vmem:[#allocation3 + $0x28c] ss:$16 sps:$4 sm:$0xff]  }
  0xa9   :  { %1544 = vmatpush1.bf16.msra.mxu1 %v7853_v23  ;;  %1463 = vmatprep.subr.bf16.mxu0 %v7864_v26  ;;  %v7948_v23 = vld [vmem:[#allocation3 + $0x4cc] ss:$16 sps:$4 sm:$0xff]   ;;  %v7949_v26 = vld [vmem:[#allocation3 + $0x288] ss:$16 sps:$4 sm:$0xff]  }
  0xaa   :  { %1545 = vmatprep.subr.bf16.mxu1 %v7861_v25  ;;  %v7946_v25 = vld [vmem:[#allocation3 + $0x4c8] ss:$16 sps:$4 sm:$0xff]  }
  0xac   :  { %1464 = vmatpush1.bf16.msra.mxu0 %v7862_v28  ;;  %v7957_v28 = vld [vmem:[#allocation3 + $0x26c] ss:$16 sps:$4 sm:$0xff]  }
  0xad   :  { %1546 = vmatpush1.bf16.msra.mxu1 %v7859_v27  ;;  %1465 = vmatprep.subr.bf16.mxu0 %v7870_v30  ;;  %v7954_v27 = vld [vmem:[#allocation3 + $0x4ac] ss:$16 sps:$4 sm:$0xff]   ;;  %v7955_v30 = vld [vmem:[#allocation3 + $0x268] ss:$16 sps:$4 sm:$0xff]  }
  0xae   :  { %1547 = vmatprep.subr.bf16.mxu1 %v7867_v29  ;;  %v7952_v29 = vld [vmem:[#allocation3 + $0x4a8] ss:$16 sps:$4 sm:$0xff]  }
  0xb0   :  { %1466 = vmatpush1.bf16.msra.mxu0 %v7868_v32  ;;  %v7958_v32 = vld [vmem:[#allocation3 + $0x488] ss:$16 sps:$4 sm:$0xff]  }
  0xb1   :  { %1548 = vmatpush1.bf16.msra.mxu1 %v7865_v31  ;;  %1467 = vmatprep.subr.bf16.mxu0 %v7876_v35  ;;  %v7963_v31 = vld [vmem:[#allocation3 + $0x24c] ss:$16 sps:$4 sm:$0xff]  }
  0xb2   :  { %1549 = vmatprep.subr.bf16.mxu1 %v7873_v33  ;;  %v7966_v33 = vld [vmem:[#allocation3 + $0x46c] ss:$16 sps:$4 sm:$0xff]  }
  0xb3   :  { %v7969_v35 = vld [vmem:[#allocation3 + $0x22c] ss:$16 sps:$4 sm:$0xff]  }
  0xb4   :  { %1468 = vmatpush1.bf16.msra.mxu0 %v7874_v37  ;;  %v7967_v37 = vld [vmem:[#allocation3 + $0x228] ss:$16 sps:$4 sm:$0xff]  }
  0xb5   :  { %1550 = vmatpush1.bf16.msra.mxu1 %v7871_v36  ;;  %1469 = vmatprep.subr.bf16.mxu0 %v7882_v39  ;;  %v7964_v36 = vld [vmem:[#allocation3 + $0x468] ss:$16 sps:$4 sm:$0xff]  }
  0xb6   :  { %1551 = vmatprep.subr.bf16.mxu1 %v7879_v38  ;;  %v7972_v38 = vld [vmem:[#allocation3 + $0x44c] ss:$16 sps:$4 sm:$0xff]   ;;  %v7970_v39 = vld [vmem:[#allocation3 + $0x448] ss:$16 sps:$4 sm:$0xff]  }
  0xb8   :  { %1470 = vmatpush2.bf16.msra.mxu0 %v7880_v41  ;;  %v7978_v41 = vld [vmem:[#allocation3 + $0x42c] ss:$16 sps:$4 sm:$0xff]  }
  0xb9   :  { %1552 = vmatpush1.bf16.msra.mxu1 %v7877_v40  ;;  %1471 = vmatprep.subr.bf16.mxu0 %v7888_v43  ;;  %v7973_v40 = vld [vmem:[#allocation3 + $0x208] ss:$16 sps:$4 sm:$0xff]  }
  0xba   :  { %1553 = vmatprep.subr.bf16.mxu1 %v7885_v42  ;;  %v7981_v42 = vld [vmem:[#allocation3 + $0x3ec] ss:$16 sps:$4 sm:$0xff]   ;;  %v7976_v43 = vld [vmem:[#allocation3 + $0x428] ss:$16 sps:$4 sm:$0xff]  }
  0xbc   :  { %1472 = vmatpush2.bf16.msra.mxu0 %v7886_v45  ;;  %v7984_v45 = vld [vmem:[#allocation3 + $0x40c] ss:$16 sps:$4 sm:$0xff]  }
  0xbd   :  { %1554 = vmatpush1.bf16.msra.mxu1 %v7883_v44  ;;  %1473 = vmatprep.subr.bf16.mxu0 %v7894_v47  ;;  %v7979_v44 = vld [vmem:[#allocation3 + $0x3e8] ss:$16 sps:$4 sm:$0xff]  }
  0xbe   :  { %1555 = vmatprep.subr.bf16.mxu1 %v7891_v46  ;;  %v7987_v46 = vld [vmem:[#allocation3 + $0x3cc] ss:$16 sps:$4 sm:$0xff]   ;;  %v7982_v47 = vld [vmem:[#allocation3 + $0x408] ss:$16 sps:$4 sm:$0xff]  }
  0xc0   :  { %1474 = vmatpush2.bf16.msra.mxu0 %v7892_v49  ;;  %v7990_v49 = vld [vmem:[#allocation3 + $0x5ec] ss:$16 sps:$4 sm:$0xff]  }
  0xc1   :  { %1556 = vmatpush2.bf16.msra.mxu1 %v7889_v48  ;;  %1475 = vmatprep.subr.bf16.mxu0 %v7900_v51  ;;  %v7985_v48 = vld [vmem:[#allocation3 + $0x3c8] ss:$16 sps:$4 sm:$0xff]  }
  0xc2   :  { %1557 = vmatprep.subr.bf16.mxu1 %v7897_v50  ;;  %v7993_v50 = vld [vmem:[#allocation3 + $0x3ac] ss:$16 sps:$4 sm:$0xff]   ;;  %v7988_v51 = vld [vmem:[#allocation3 + $0x5e8] ss:$16 sps:$4 sm:$0xff]  }
  0xc4   :  { %1476 = vmatpush2.bf16.msra.mxu0 %v7898_v54  ;;  %v7996_v54 = vld [vmem:[#allocation3 + $0x5cc] ss:$16 sps:$4 sm:$0xff]  }
  0xc5   :  { %1558 = vmatpush2.bf16.msra.mxu1 %v7895_v53  ;;  %1477 = vmatprep.subr.bf16.mxu0 %v7906_v56  ;;  %v7991_v53 = vld [vmem:[#allocation3 + $0x3a8] ss:$16 sps:$4 sm:$0xff]  }
  0xc6   :  { %1559 = vmatprep.subr.bf16.mxu1 %v7903_v55  ;;  %v7999_v55 = vld [vmem:[#allocation3 + $0x38c] ss:$16 sps:$4 sm:$0xff]   ;;  %v7994_v56 = vld [vmem:[#allocation3 + $0x5c8] ss:$16 sps:$4 sm:$0xff]  }
  0xc8   :  { %1478 = vmatpush2.bf16.msra.mxu0 %v7904_v58  ;;  %v8002_v58 = vld [vmem:[#allocation3 + $0x5ac] ss:$16 sps:$4 sm:$0xff]  }
  0xc9   :  { %1560 = vmatpush2.bf16.msra.mxu1 %v7901_v57  ;;  %1479 = vmatprep.subr.bf16.mxu0 %v7912_v60  ;;  %v7997_v57 = vld [vmem:[#allocation3 + $0x388] ss:$16 sps:$4 sm:$0xff]  }
  0xca   :  { %1561 = vmatprep.subr.bf16.mxu1 %v7909_v59  ;;  %v8005_v59 = vld [vmem:[#allocation3 + $0x36c] ss:$16 sps:$4 sm:$0xff]   ;;  %v8000_v60 = vld [vmem:[#allocation3 + $0x5a8] ss:$16 sps:$4 sm:$0xff]  }
  0xcc   :  { %1480 = vmatpush2.bf16.msra.mxu0 %v7910_v62  ;;  %v8008_v62 = vld [vmem:[#allocation3 + $0x58c] ss:$16 sps:$4 sm:$0xff]  }
  0xcd   :  { %1562 = vmatpush2.bf16.msra.mxu1 %v7907_v61  ;;  %1481 = vmatprep.subr.bf16.mxu0 %v7918_v0  ;;  %v8003_v61 = vld [vmem:[#allocation3 + $0x368] ss:$16 sps:$4 sm:$0xff]  }
  0xce   :  { %1563 = vmatprep.subr.bf16.mxu1 %v7915_v63  ;;  %v8011_v63 = vld [vmem:[#allocation3 + $0x34c] ss:$16 sps:$4 sm:$0xff]   ;;  %v8006_v0 = vld [vmem:[#allocation3 + $0x588] ss:$16 sps:$4 sm:$0xff]  }
  0xd0   :  { %1482 = vmatpush2.bf16.msra.mxu0 %v7916_v2  ;;  %v8014_v2 = vld [vmem:[#allocation3 + $0x56c] ss:$16 sps:$4 sm:$0xff]  }
  0xd1   :  { %1564 = vmatpush2.bf16.msra.mxu1 %v7913_v1  ;;  %1483 = vmatprep.subr.bf16.mxu0 %v7924_v4  ;;  %v8009_v1 = vld [vmem:[#allocation3 + $0x348] ss:$16 sps:$4 sm:$0xff]  }
  0xd2   :  { %1565 = vmatprep.subr.bf16.mxu1 %v7921_v3  ;;  %v8017_v3 = vld [vmem:[#allocation3 + $0x32c] ss:$16 sps:$4 sm:$0xff]   ;;  %v8012_v4 = vld [vmem:[#allocation3 + $0x568] ss:$16 sps:$4 sm:$0xff]  }
  0xd4   :  { %1484 = vmatpush2.bf16.msra.mxu0 %v7922_v7  ;;  %v8020_v7 = vld [vmem:[#allocation3 + $0x54c] ss:$16 sps:$4 sm:$0xff]  }
  0xd5   :  { %1566 = vmatpush2.bf16.msra.mxu1 %v7919_v6  ;;  %1582 = vmatprep.subr.bf16.mxu0 %v7933_v9  ;;  %v8015_v6 = vld [vmem:[#allocation3 + $0x328] ss:$16 sps:$4 sm:$0xff]  }
  0xd6   :  { %1567 = vmatprep.subr.bf16.mxu1 %v7930_v8  ;;  %v8023_v8 = vld [vmem:[#allocation3 + $0x30c] ss:$16 sps:$4 sm:$0xff]   ;;  %v8018_v9 = vld [vmem:[#allocation3 + $0x548] ss:$16 sps:$4 sm:$0xff]  }
  0xd7   :  { %1486 = vmatmul.mubr.bf16.vlgmr.msra.gmra.mxu0 %v8507_v10 }
  0xd8   :  { %1583 = vmatpush1.bf16.msra.mxu0 %v7931_v13  ;;  %1614 = vmatprep.mubr.bf16.mxu0 %v8476_v52  ;;  %v7960_v52 = vld [vmem:[#allocation3 + $0x48c] ss:$16 sps:$4 sm:$0xff]  }
  0xd9   :  { %1568 = vmatpush2.bf16.msra.mxu1 %v7928_v11  ;;  %1584 = vmatprep.subr.bf16.mxu0 %v7939_v16  ;;  %v8021_v11 = vld [vmem:[#allocation3 + $0x308] ss:$16 sps:$4 sm:$0xff]   ;;  %v8026_v13 = vld [vmem:[#allocation3 + $0x52c] ss:$16 sps:$4 sm:$0xff]  }
  0xda   :  { %1569 = vmatprep.subr.bf16.mxu1 %v7936_v14  ;;  %v8029_v14 = vld [vmem:[#allocation3 + $0x60c] ss:$16 sps:$4 sm:$0xff]   ;;  %v8024_v16 = vld [vmem:[#allocation3 + $0x528] ss:$16 sps:$4 sm:$0xff]  }
  0xdc   :  { %1585 = vmatpush1.bf16.msra.mxu0 %v7937_v18  ;;  %v8032_v18 = vld [vmem:[#allocation3 + $0x50c] ss:$16 sps:$4 sm:$0xff]  }
  0xdd   :  { %1570 = vmatpush2.bf16.msra.mxu1 %v7934_v17  ;;  %1586 = vmatprep.subr.bf16.mxu0 %v7945_v20  ;;  %v8027_v17 = vld [vmem:[#allocation3 + $0x608] ss:$16 sps:$4 sm:$0xff]  }
  0xde   :  { %1625 = vmatprep.subr.bf16.mxu1 %v7942_v19  ;;  %v8035_v19 = vld [vmem:[#allocation7 + $0xe4] ss:$16 sps:$4 sm:$0xff]  }
  0xdf   :  { %v8233_v20 = vld [vmem:[%s8821_s0 + $0x8] ss:$28 sps:$4 sm:$0xff]  }
  0xe0   :  { %1572 = vmatmul.mubr.bf16.vlgmr.msra.gmra.mxu1 %v8483_v5  ;;  %1587 = vmatpush1.bf16.msra.mxu0 %v7943_v22  ;;  %v7961_v5 = vld [vmem:[#allocation3 + $0x248] ss:$16 sps:$4 sm:$0xff]   ;;  %v8033_v22 = vld [vmem:[#allocation7 + $0xe0] ss:$16 sps:$4 sm:$0xff]  }
  0xe1   :  { %1626 = vmatpush1.bf16.msra.mxu1 %v7940_v21  ;;  %1588 = vmatprep.subr.bf16.mxu0 %v7951_v24  ;;  %v8030_v21 = vld [vmem:[#allocation3 + $0x508] ss:$16 sps:$4 sm:$0xff]   ;;  %v8036_v24 = vld [vmem:[#allocation7 + $0xc0] ss:$16 sps:$4 sm:$0xff]  }
  0xe2   :  { %1627 = vmatprep.subr.bf16.mxu1 %v7948_v23  ;;  %1657 = vmatprep.mubr.bf16.mxu1 %v8501_v34  ;;  %v7975_v34 = vld [vmem:[#allocation3 + $0x20c] ss:$16 sps:$4 sm:$0xff]   ;;  %v8038_v23 = vld [vmem:[#allocation7 + $0xc4] ss:$16 sps:$4 sm:$0xff]  }
  0xe4   :  { %1589 = vmatpush1.bf16.msra.mxu0 %v7949_v26  ;;  %v8039_v26 = vld [vmem:[#allocation7 + $0xa0] ss:$16 sps:$4 sm:$0xff]  }
  0xe5   :  { %1628 = vmatpush1.bf16.msra.mxu1 %v7946_v25  ;;  %1590 = vmatprep.subr.bf16.mxu0 %v7957_v28  ;;  %v8041_v25 = vld [vmem:[#allocation7 + $0xa4] ss:$16 sps:$4 sm:$0xff]   ;;  %v8042_v28 = vld [vmem:[#allocation7 + $0x80] ss:$16 sps:$4 sm:$0xff]  }
  0xe6   :  { %1629 = vmatprep.subr.bf16.mxu1 %v7954_v27  ;;  %v8044_v27 = vld [vmem:[#allocation7 + $0x84] ss:$16 sps:$4 sm:$0xff]  }
  0xe8   :  { %1591 = vmatpush1.bf16.msra.mxu0 %v7955_v30  ;;  %v8050_v30 = vld [vmem:[#allocation7 + $0x44] ss:$16 sps:$4 sm:$0xff]  }
  0xe9   :  { %1630 = vmatpush1.bf16.msra.mxu1 %v7952_v29  ;;  %1592 = vmatprep.subr.bf16.mxu0 %v7963_v31  ;;  %v8045_v29 = vld [vmem:[#allocation7 + $0x60] ss:$16 sps:$4 sm:$0xff]   ;;  %v8053_v31 = vld [vmem:[#allocation7 + $0x24] ss:$16 sps:$4 sm:$0xff]  }
  0xea   :  { %1631 = vmatprep.subr.bf16.mxu1 %v7960_v52  ;;  %v8089_v52 = vld [vmem:[#allocation7 + $0x2e4] ss:$16 sps:$4 sm:$0xff]  }
  0xec   :  { %1593 = vmatpush1.bf16.msra.mxu0 %v7961_v5  ;;  %v8095_v5 = vld [vmem:[#allocation7 + $0x2c4] ss:$16 sps:$4 sm:$0xff]  }
  0xed   :  { %1632 = vmatpush1.bf16.msra.mxu1 %v7958_v32  ;;  %1594 = vmatprep.subr.bf16.mxu0 %v7969_v35  ;;  %v8093_v32 = vld [vmem:[#allocation7 + $0x2c0] ss:$16 sps:$4 sm:$0xff]   ;;  %v8056_v35 = vld [vmem:[#allocation7 + $0x4] ss:$16 sps:$4 sm:$0xff]  }
  0xee   :  { %1633 = vmatprep.subr.bf16.mxu1 %v7966_v33  ;;  %v8051_v33 = vld [vmem:[#allocation7 + $0x20] ss:$16 sps:$4 sm:$0xff]  }
  0xf0   :  { %1595 = vmatpush1.bf16.msra.mxu0 %v7967_v37  ;;  %v8101_v37 = vld [vmem:[#allocation7 + $0x2a4] ss:$16 sps:$4 sm:$0xff]  }
  0xf1   :  { %1634 = vmatpush1.bf16.msra.mxu1 %v7964_v36  ;;  %1596 = vmatprep.subr.bf16.mxu0 %v7975_v34  ;;  %v8099_v36 = vld [vmem:[#allocation7 + $0x2a0] ss:$16 sps:$4 sm:$0xff]   ;;  %v8059_v34 = vld [vmem:[#allocation7 + $0x1e4] ss:$16 sps:$4 sm:$0xff]  }
  0xf2   :  { %1635 = vmatprep.subr.bf16.mxu1 %v7972_v38  ;;  %v8054_v38 = vld [vmem:[#allocation7] ss:$16 sps:$4 sm:$0xff]  }
  0xf4   :  { %1597 = vmatpush1.bf16.msra.mxu0 %v7973_v40  ;;  %v8107_v40 = vld [vmem:[#allocation7 + $0x284] ss:$16 sps:$4 sm:$0xff]  }
  0xf5   :  { %1636 = vmatpush1.bf16.msra.mxu1 %v7970_v39  ;;  %1598 = vmatprep.subr.bf16.mxu0 %v7981_v42  ;;  %v8105_v39 = vld [vmem:[#allocation7 + $0x280] ss:$16 sps:$4 sm:$0xff]   ;;  %v8062_v42 = vld [vmem:[#allocation7 + $0x1c4] ss:$16 sps:$4 sm:$0xff]  }
  0xf6   :  { %1637 = vmatprep.subr.bf16.mxu1 %v7978_v41  ;;  %v8057_v41 = vld [vmem:[#allocation7 + $0x1e0] ss:$16 sps:$4 sm:$0xff]  }
  0xf8   :  { %1599 = vmatpush2.bf16.msra.mxu0 %v7979_v44  ;;  %v8113_v44 = vld [vmem:[#allocation7 + $0x264] ss:$16 sps:$4 sm:$0xff]  }
  0xf9   :  { %1638 = vmatpush1.bf16.msra.mxu1 %v7976_v43  ;;  %1600 = vmatprep.subr.bf16.mxu0 %v7987_v46  ;;  %v8111_v43 = vld [vmem:[#allocation7 + $0x260] ss:$16 sps:$4 sm:$0xff]   ;;  %v8065_v46 = vld [vmem:[#allocation7 + $0x1a4] ss:$16 sps:$4 sm:$0xff]  }
  0xfa   :  { %1639 = vmatprep.subr.bf16.mxu1 %v7984_v45  ;;  %v8060_v45 = vld [vmem:[#allocation7 + $0x1c0] ss:$16 sps:$4 sm:$0xff]  }
  0xfc   :  { %1601 = vmatpush2.bf16.msra.mxu0 %v7985_v48  ;;  %v8119_v48 = vld [vmem:[#allocation7 + $0x244] ss:$16 sps:$4 sm:$0xff]  }
  0xfd   :  { %1640 = vmatpush1.bf16.msra.mxu1 %v7982_v47  ;;  %1602 = vmatprep.subr.bf16.mxu0 %v7993_v50  ;;  %v8117_v47 = vld [vmem:[#allocation7 + $0x240] ss:$16 sps:$4 sm:$0xff]   ;;  %v8068_v50 = vld [vmem:[#allocation7 + $0x184] ss:$16 sps:$4 sm:$0xff]  }
  0xfe   :  { %1641 = vmatprep.subr.bf16.mxu1 %v7990_v49  ;;  %v8063_v49 = vld [vmem:[#allocation7 + $0x1a0] ss:$16 sps:$4 sm:$0xff]  }
 0x100   :  { %1603 = vmatpush2.bf16.msra.mxu0 %v7991_v53  ;;  %v8125_v53 = vld [vmem:[#allocation7 + $0x224] ss:$16 sps:$4 sm:$0xff]  }
 0x101   :  { %1642 = vmatpush2.bf16.msra.mxu1 %v7988_v51  ;;  %1604 = vmatprep.subr.bf16.mxu0 %v7999_v55  ;;  %v8123_v51 = vld [vmem:[#allocation7 + $0x220] ss:$16 sps:$4 sm:$0xff]   ;;  %v8071_v55 = vld [vmem:[#allocation7 + $0x164] ss:$16 sps:$4 sm:$0xff]  }
 0x102   :  { %1643 = vmatprep.subr.bf16.mxu1 %v7996_v54  ;;  %v8066_v54 = vld [vmem:[#allocation7 + $0x180] ss:$16 sps:$4 sm:$0xff]  }
 0x104   :  { %1605 = vmatpush2.bf16.msra.mxu0 %v7997_v57  ;;  %v8131_v57 = vld [vmem:[#allocation7 + $0x204] ss:$16 sps:$4 sm:$0xff]  }
 0x105   :  { %1644 = vmatpush2.bf16.msra.mxu1 %v7994_v56  ;;  %1606 = vmatprep.subr.bf16.mxu0 %v8005_v59  ;;  %v8129_v56 = vld [vmem:[#allocation7 + $0x200] ss:$16 sps:$4 sm:$0xff]   ;;  %v8074_v59 = vld [vmem:[#allocation7 + $0x144] ss:$16 sps:$4 sm:$0xff]  }
 0x106   :  { %1645 = vmatprep.subr.bf16.mxu1 %v8002_v58  ;;  %v8069_v58 = vld [vmem:[#allocation7 + $0x160] ss:$16 sps:$4 sm:$0xff]  }
 0x108   :  { %1607 = vmatpush2.bf16.msra.mxu0 %v8003_v61  ;;  %v8137_v61 = vld [vmem:[#allocation7 + $0x3e4] ss:$16 sps:$4 sm:$0xff]  }
 0x109   :  { %1646 = vmatpush2.bf16.msra.mxu1 %v8000_v60  ;;  %1608 = vmatprep.subr.bf16.mxu0 %v8011_v63  ;;  %v8135_v60 = vld [vmem:[#allocation7 + $0x3e0] ss:$16 sps:$4 sm:$0xff]   ;;  %v8077_v63 = vld [vmem:[#allocation7 + $0x124] ss:$16 sps:$4 sm:$0xff]  }
 0x10a   :  { %1647 = vmatprep.subr.bf16.mxu1 %v8008_v62  ;;  %v8072_v62 = vld [vmem:[#allocation7 + $0x140] ss:$16 sps:$4 sm:$0xff]  }
 0x10c   :  { %1609 = vmatpush2.bf16.msra.mxu0 %v8009_v1  ;;  %v8143_v1 = vld [vmem:[#allocation7 + $0x3c4] ss:$16 sps:$4 sm:$0xff]  }
 0x10d   :  { %1648 = vmatpush2.bf16.msra.mxu1 %v8006_v0  ;;  %1610 = vmatprep.subr.bf16.mxu0 %v8017_v3  ;;  %v8141_v0 = vld [vmem:[#allocation7 + $0x3c0] ss:$16 sps:$4 sm:$0xff]   ;;  %v8080_v3 = vld [vmem:[#allocation7 + $0x104] ss:$16 sps:$4 sm:$0xff]  }
 0x10e   :  { %1649 = vmatprep.subr.bf16.mxu1 %v8014_v2  ;;  %v8075_v2 = vld [vmem:[#allocation7 + $0x120] ss:$16 sps:$4 sm:$0xff]  }
 0x110   :  { %1611 = vmatpush2.bf16.msra.mxu0 %v8015_v6  ;;  %v8147_v6 = vld [vmem:[#allocation7 + $0x3a0] ss:$16 sps:$4 sm:$0xff]  }
 0x111   :  { %1650 = vmatpush2.bf16.msra.mxu1 %v8012_v4  ;;  %1612 = vmatprep.subr.bf16.mxu0 %v8023_v8  ;;  %v8149_v4 = vld [vmem:[#allocation7 + $0x3a4] ss:$16 sps:$4 sm:$0xff]   ;;  %v8083_v8 = vld [vmem:[#allocation7 + $0xec] ss:$16 sps:$4 sm:$0xff]  }
 0x112   :  { %1651 = vmatprep.subr.bf16.mxu1 %v8020_v7  ;;  %v8078_v7 = vld [vmem:[#allocation7 + $0x100] ss:$16 sps:$4 sm:$0xff]  }
 0x114   :  { %1613 = vmatpush2.bf16.msra.mxu0 %v8021_v11  ;;  %v8153_v11 = vld [vmem:[#allocation7 + $0x380] ss:$16 sps:$4 sm:$0xff]  }
 0x115   :  { %1652 = vmatpush2.bf16.msra.mxu1 %v8018_v9  ;;  %1682 = vmatprep.subr.bf16.mxu0 %v8029_v14  ;;  %v8155_v9 = vld [vmem:[#allocation7 + $0x384] ss:$16 sps:$4 sm:$0xff]   ;;  %v8159_v14 = vld [vmem:[#allocation7 + $0x360] ss:$16 sps:$4 sm:$0xff]  }
 0x116   :  { %1653 = vmatprep.subr.bf16.mxu1 %v8026_v13  ;;  %v8161_v13 = vld [vmem:[#allocation7 + $0x364] ss:$16 sps:$4 sm:$0xff]  }
 0x117   :  { %1615 = vmatmul.mubr.bf16.vlgmr.msra.gmra.mxu0 %v8233_v20  ;;  %v8176_v20 = vld [vmem:[#allocation7 + $0x304] ss:$16 sps:$4 sm:$0xff]  }
 0x118   :  { %1683 = vmatpush1.bf16.msra.mxu0 %v8027_v17  ;;  %1700 = vmatprep.mubr.bf16.mxu0 %v8393_v12  ;;  %v8047_v12 = vld [vmem:[#allocation7 + $0x64] ss:$16 sps:$4 sm:$0xff]   ;;  %v8165_v17 = vld [vmem:[#allocation7 + $0x340] ss:$16 sps:$4 sm:$0xff]  }
 0x119   :  { %1654 = vmatpush2.bf16.msra.mxu1 %v8024_v16  ;;  %2521 = vmatprep.subr.bf16.mxu0 %v8035_v19  ;;  %v8167_v16 = vld [vmem:[#allocation7 + $0x344] ss:$16 sps:$4 sm:$0xff]   ;;  %v8171_v19 = vld [vmem:[#allocation7 + $0x320] ss:$16 sps:$4 sm:$0xff]  }
 0x11a   :  { %1655 = vmatprep.subr.bf16.mxu1 %v8032_v18  ;;  %v8173_v18 = vld [vmem:[#allocation7 + $0x324] ss:$16 sps:$4 sm:$0xff]  }
 0x11d   :  { %1656 = vmatpush2.bf16.msra.mxu1 %v8030_v21  ;;  %v8174_v21 = vld [vmem:[#allocation7 + $0x300] ss:$16 sps:$4 sm:$0xff]  }
 0x11e   :  { %2564 = vmatprep.subr.bf16.mxu1 %v8089_v52 }
 0x11f   :  { %7075 = vmatmul.mubr.msk.bf16.vlgmr.msra.gmra.mxu0 %vm1363_vm0, %v8493_v15  ;;  %v8048_v15 = vld [vmem:[#allocation7 + $0x40] ss:$16 sps:$4 sm:$0xff]  }
 0x120   :  { %1658 = vmatmul.mubr.bf16.vlgmr.msra.gmra.mxu1 %v8507_v10  ;;  %2522 = vmatpush1.bf16.msra.mxu0 %v8033_v22  ;;  %v8087_v10 = vld [vmem:[#allocation7 + $0x2e0] ss:$16 sps:$4 sm:$0xff]   ;;  %v8179_v22 = vld [vmem:[#allocation7 + $0x2ec] ss:$16 sps:$4 sm:$0xff]  }
 0x121   :  { %2523 = vmatprep.subr.bf16.mxu0 %v8038_v23  ;;  %2565 = vmatpush1.bf16.msra.mxu1 %v8087_v10  ;;  %v328_v23 = vlaneseq }
 0x122   :  { %2566 = vmatprep.subr.bf16.mxu1 %v8095_v5 }
 0x124   :  { %2524 = vmatpush1.bf16.msra.mxu0 %v8036_v24 }
 0x125   :  { %2525 = vmatprep.subr.bf16.mxu0 %v8041_v25  ;;  %2567 = vmatpush1.bf16.msra.mxu1 %v8093_v32  ;;  %v8520_v25 = vshrl.u32 %v328_v23, 7  ;;  %v8128_v23 = vld [vmem:[#allocation7 + $0x1ec] ss:$16 sps:$4 sm:$0xff]  }
 0x126   :  { %2568 = vmatprep.subr.bf16.mxu1 %v8101_v37 }
 0x128   :  { %2526 = vmatpush1.bf16.msra.mxu0 %v8039_v26 }
 0x129   :  { %2527 = vmatprep.subr.bf16.mxu0 %v8044_v27  ;;  %2569 = vmatpush1.bf16.msra.mxu1 %v8099_v36 }
 0x12a   :  { %2570 = vmatprep.subr.bf16.mxu1 %v8107_v40 }
 0x12c   :  { %2528 = vmatpush1.bf16.msra.mxu0 %v8042_v28  ;;  %v8523_v28 = vsub.s32 0, %v8520_v25 }
 0x12d   :  { %2529 = vmatprep.subr.bf16.mxu0 %v8047_v12  ;;  %2571 = vmatpush1.bf16.msra.mxu1 %v8105_v39 }
 0x12e   :  { %2572 = vmatprep.subr.bf16.mxu1 %v8113_v44 }
 0x130   :  { %2530 = vmatpush1.bf16.msra.mxu0 %v8045_v29  ;;  %v8525_v29 = vld [vmem:[#allocation5] sm:$0xf] }
 0x131   :  { %2531 = vmatprep.subr.bf16.mxu0 %v8050_v30  ;;  %2573 = vmatpush1.bf16.msra.mxu1 %v8111_v43  ;;  %v8528_v30 = vsub.s32 1, %v8520_v25  ;;  %v331_v52 = vrot.slane %v8525_v29, %v8523_v28 }
 0x132   :  { %2574 = vmatprep.subr.bf16.mxu1 %v8119_v48 }
 0x134   :  { %2532 = vmatpush1.bf16.msra.mxu0 %v8048_v15 }
 0x135   :  { %2533 = vmatprep.subr.bf16.mxu0 %v8053_v31  ;;  %2575 = vmatpush1.bf16.msra.mxu1 %v8117_v47  ;;  %v335_v31 = vrot.slane %v8525_v29, %v8528_v30 }
 0x136   :  { %2576 = vmatprep.subr.bf16.mxu1 %v8125_v53 }
 0x138   :  { %2534 = vmatpush1.bf16.msra.mxu0 %v8051_v33 }
 0x139   :  { %2535 = vmatprep.subr.bf16.mxu0 %v8056_v35  ;;  %2577 = vmatpush1.bf16.msra.mxu1 %v8123_v51 }
 0x13a   :  { %2578 = vmatprep.subr.bf16.mxu1 %v8131_v57 }
 0x13c   :  { %2536 = vmatpush1.bf16.msra.mxu0 %v8054_v38 }
 0x13d   :  { %2537 = vmatprep.subr.bf16.mxu0 %v8059_v34  ;;  %2579 = vmatpush1.bf16.msra.mxu1 %v8129_v56 }
 0x13e   :  { %2580 = vmatprep.subr.bf16.mxu1 %v8137_v61 }
 0x140   :  { %2538 = vmatpush2.bf16.msra.mxu0 %v8057_v41 }
 0x141   :  { %2539 = vmatprep.subr.bf16.mxu0 %v8062_v42  ;;  %2581 = vmatpush2.bf16.msra.mxu1 %v8135_v60 }
 0x142   :  { %2582 = vmatprep.subr.bf16.mxu1 %v8143_v1 }
 0x144   :  { %2540 = vmatpush2.bf16.msra.mxu0 %v8060_v45 }
 0x145   :  { %2541 = vmatprep.subr.bf16.mxu0 %v8065_v46  ;;  %2583 = vmatpush2.bf16.msra.mxu1 %v8141_v0 }
 0x146   :  { %2584 = vmatprep.subr.bf16.mxu1 %v8149_v4 }
 0x148   :  { %2542 = vmatpush2.bf16.msra.mxu0 %v8063_v49 }
 0x149   :  { %2543 = vmatprep.subr.bf16.mxu0 %v8068_v50  ;;  %2585 = vmatpush2.bf16.msra.mxu1 %v8147_v6  ;;  %v8086_v6 = vld [vmem:[#allocation7 + $0xcc] ss:$16 sps:$4 sm:$0xff]  }
 0x14a   :  { %2586 = vmatprep.subr.bf16.mxu1 %v8155_v9  ;;  %v8090_v9 = vld [vmem:[#allocation7 + $0xa8] ss:$16 sps:$4 sm:$0xff]  }
 0x14c   :  { %2544 = vmatpush2.bf16.msra.mxu0 %v8066_v54 }
 0x14d   :  { %2545 = vmatprep.subr.bf16.mxu0 %v8071_v55  ;;  %2587 = vmatpush2.bf16.msra.mxu1 %v8153_v11  ;;  %v8098_v11 = vld [vmem:[#allocation7 + $0x8c] ss:$16 sps:$4 sm:$0xff]  }
 0x14e   :  { %2588 = vmatprep.subr.bf16.mxu1 %v8161_v13  ;;  %v8096_v13 = vld [vmem:[#allocation7 + $0x88] ss:$16 sps:$4 sm:$0xff]  }
 0x150   :  { %2546 = vmatpush2.bf16.msra.mxu0 %v8069_v58 }
 0x151   :  { %2547 = vmatprep.subr.bf16.mxu0 %v8074_v59  ;;  %2589 = vmatpush2.bf16.msra.mxu1 %v8159_v14  ;;  %v8104_v14 = vld [vmem:[#allocation7 + $0x6c] ss:$16 sps:$4 sm:$0xff]  }
 0x152   :  { %2590 = vmatprep.subr.bf16.mxu1 %v8167_v16  ;;  %v8102_v16 = vld [vmem:[#allocation7 + $0x68] ss:$16 sps:$4 sm:$0xff]  }
 0x154   :  { %2548 = vmatpush2.bf16.msra.mxu0 %v8072_v62 }
 0x155   :  { %2549 = vmatprep.subr.bf16.mxu0 %v8077_v63  ;;  %2591 = vmatpush2.bf16.msra.mxu1 %v8165_v17  ;;  %v8110_v17 = vld [vmem:[#allocation7 + $0x4c] ss:$16 sps:$4 sm:$0xff]  }
 0x156   :  { %2592 = vmatprep.subr.bf16.mxu1 %v8173_v18  ;;  %v8108_v18 = vld [vmem:[#allocation7 + $0x48] ss:$16 sps:$4 sm:$0xff]  }
 0x157   :  { %v1401_v27 = vpop.f32.mrf.mxu0 }
 0x158   :  { %2550 = vmatpush2.bf16.msra.mxu0 %v8075_v2  ;;  %v1444_v24 = vpop.f32.mrf.mxu1  ;;  %v1402_v5 = vadd.f32 %v1401_v27, %v331_v52  ;;  %v8132_v27 = vld [vmem:[#allocation7 + $0x1c8] ss:$16 sps:$4 sm:$0xff]  }
 0x159   :  { %2551 = vmatprep.subr.bf16.mxu0 %v8080_v3  ;;  %2593 = vmatpush2.bf16.msra.mxu1 %v8171_v19  ;;  %v1403_v10 = vpop.f32.mrf.mxu0  ;;  %v8081_v3 = vld [vmem:[#allocation7 + $0xe8] ss:$16 sps:$4 sm:$0xff]   ;;  %v8116_v19 = vld [vmem:[#allocation7 + $0x2c] ss:$16 sps:$4 sm:$0xff]  }
 0x15a   :  { %2594 = vmatprep.subr.bf16.mxu1 %v8176_v20  ;;  %v1446_v26 = vpop.f32.mrf.mxu1  ;;  %v1404_v35 = vadd.f32 %v1403_v10, %v335_v31  ;;  %v1445_v38 = vadd.f32 %v1444_v24, %v1402_v5  ;;  %v8114_v20 = vld [vmem:[#allocation7 + $0x28] ss:$16 sps:$4 sm:$0xff]   ;;  %v8538_v5 = vsub.s32 2, %v8520_v25 }
 0x15b   :  { %v1405_v32 = vpop.f32.mrf.mxu0  ;;  %v8126_v24 = vld [vmem:[#allocation7 + $0x1e8] ss:$16 sps:$4 sm:$0xff]  }
 0x15c   :  { %2552 = vmatpush2.bf16.msra.mxu0 %v8078_v7  ;;  %v1448_v12 = vpop.f32.mrf.mxu1  ;;  %v1406_v37 = vadd.f32 %v1405_v32, %v331_v52  ;;  %v1447_v40 = vadd.f32 %v1446_v26, %v1404_v35  ;;  %v8084_v7 = vld [vmem:[#allocation7 + $0xc8] ss:$16 sps:$4 sm:$0xff]   ;;  %v8134_v26 = vld [vmem:[#allocation7 + $0x1cc] ss:$16 sps:$4 sm:$0xff]   ;;  %v8541_v35 = vsub.s32 3, %v8520_v25 }
 0x15d   :  { %2607 = vmatprep.subr.bf16.mxu0 %v8083_v8  ;;  %2595 = vmatpush2.bf16.msra.mxu1 %v8174_v21  ;;  %v1407_v36 = vpop.f32.mrf.mxu0  ;;  %v8092_v8 = vld [vmem:[#allocation7 + $0xac] ss:$16 sps:$4 sm:$0xff]   ;;  %v8138_v10 = vld [vmem:[#allocation7 + $0x1a8] ss:$16 sps:$4 sm:$0xff]  }
 0x15e   :  { %2650 = vmatprep.subr.bf16.mxu1 %v8179_v22  ;;  %v1450_v15 = vpop.f32.mrf.mxu1  ;;  %v1408_v41 = vadd.f32 %v1407_v36, %v335_v31  ;;  %v1449_v44 = vadd.f32 %v1448_v12, %v1406_v37  ;;  %v8122_v21 = vld [vmem:[#allocation7 + $0xc] ss:$16 sps:$4 sm:$0xff]   ;;  %v8120_v22 = vld [vmem:[#allocation7 + $0x8] ss:$16 sps:$4 sm:$0xff]  }
 0x15f   :  { %v8140_v12 = vld [vmem:[#allocation7 + $0x1ac] ss:$16 sps:$4 sm:$0xff]   ;;  %v8144_v31 = vld [vmem:[#allocation7 + $0x188] ss:$16 sps:$4 sm:$0xff]  }
 0x160   :  { %v1530_v33 = vpop.f32.mrf.mxu1  ;;  %v1451_v48 = vadd.f32 %v1450_v15, %v1408_v41  ;;  %v8146_v52 = vld [vmem:[#allocation7 + $0x18c] ss:$16 sps:$4 sm:$0xff]   ;;  %v8150_v36 = vld [vmem:[#allocation7 + $0x168] ss:$16 sps:$4 sm:$0xff]   ;;  %v343_v41 = vrot.slane %v8525_v29, %v8541_v35 }
 0x161   :  { %v8152_v32 = vld [vmem:[#allocation7 + $0x16c] ss:$16 sps:$4 sm:$0xff]  }
 0x162   :  { %v1532_v34 = vpop.f32.mrf.mxu1 }
 0x164   :  { %v1534_v46 = vpop.f32.mrf.mxu1 }
 0x166   :  { %v1536_v56 = vpop.f32.mrf.mxu1 }
 0x197   :  { %v1487_v39 = vpop.f32.mrf.mxu0 }
 0x198   :  { %v1488_v42 = vadd.f32 %v1487_v39, %v1445_v38  ;;  %v8158_v38 = vld [vmem:[#allocation7 + $0x14c] ss:$16 sps:$4 sm:$0xff]  }
 0x199   :  { %v1489_v43 = vpop.f32.mrf.mxu0 }
 0x19a   :  { %v1490_v45 = vadd.f32 %v1489_v43, %v1447_v40  ;;  %v1531_v51 = vadd.f32 %v1530_v33, %v1488_v42  ;;  %v8156_v42 = vld [vmem:[#allocation7 + $0x148] ss:$16 sps:$4 sm:$0xff]  }
 0x19b   :  { %v1491_v47 = vpop.f32.mrf.mxu0 }
 0x19c   :  { %v1533_v49 = vadd.f32 %v1532_v34, %v1490_v45  ;;  %v1492_v50 = vadd.f32 %v1491_v47, %v1449_v44  ;;  %v1711_v60 = vmul.f32 0.02, %v1531_v51  ;;  %v339_v34 = vrot.slane %v8525_v29, %v8538_v5  ;;  %v8164_v44 = vld [vmem:[#allocation7 + $0x12c] ss:$16 sps:$4 sm:$0xff]  }
 0x19d   :  { %v1493_v53 = vpop.f32.mrf.mxu0 }
 0x19e   :  { %v1535_v54 = vadd.f32 %v1534_v46, %v1492_v50  ;;  %v1494_v55 = vadd.f32 %v1493_v53, %v1451_v48  ;;  %v1712_v57 = vmul.f32 0.02, %v1533_v49  ;;  %v1719_v1 = vmax.f32 %v1531_v51, %v1711_v60 }
 0x1a0   :  { %v1715_v58 = vmul.f32 0.02, %v1535_v54  ;;  %v1537_v59 = vadd.f32 %v1536_v56, %v1494_v55  ;;  %v1720_v63 = vmax.f32 %v1533_v49, %v1712_v57  ;;  %v1573_v15 = vpop.f32.mrf.mxu1  ;;  %v8162_v49 = vld [vmem:[#allocation7 + $0x128] ss:$16 sps:$4 sm:$0xff]  }
 0x1a1   :  { %v1574_v45 = vadd.f32 %v1573_v15, %v339_v34 }
 0x1a2   :  { %v1716_v61 = vmul.f32 0.02, %v1537_v59  ;;  %v1723_v62 = vmax.f32 %v1535_v54, %v1715_v58  ;;  %v1575_v33 = vpop.f32.mrf.mxu1  ;;  %v8170_v54 = vld [vmem:[#allocation7 + $0x10c] ss:$16 sps:$4 sm:$0xff]  }
 0x1a3   :  { %v1576_v48 = vadd.f32 %v1575_v33, %v343_v41 }
 0x1a4   :  { %v1724_v0 = vmax.f32 %v1537_v59, %v1716_v61  ;;  %v8534_v4 = vpack.c.bf16 %v1723_v62, %v1719_v1  ;;  %v1577_v39 = vpop.f32.mrf.mxu1  ;;  %v8168_v62 = vld [vmem:[#allocation7 + $0x108] ss:$16 sps:$4 sm:$0xff]  }
 0x1a5   :  { %v1578_v55 = vadd.f32 %v1577_v39, %v339_v34 }
 0x1a6   :  { %v1728_v2 = vpack.c.bf16 %v1724_v0, %v1720_v63  ;;  %v1579_v46 = vpop.f32.mrf.mxu1 }
 0x1a7   :  { %v1580_v59 = vadd.f32 %v1579_v46, %v343_v41  ;;  %v2777_v41 = vld [vmem:[#allocation10 + $0x200] sm:$0xff] }
 0x1a8   :  { %2553 = vmatprep.mubr.bf16.mxu0 %v1728_v2  ;;  %v8186_v46 = vld [vmem:[#allocation7 + $0x288] ss:$16 sps:$4 sm:$0xff]  }
 0x1a9   :  { %2554 = vmatmul.mubr.bf16.vlgmr.msra.gmra.mxu0 %v8534_v4 }
 0x1aa   :  { %2608 = vmatpush1.bf16.msra.mxu0 %v8081_v3  ;;  %2639 = vmatprep.mubr.bf16.mxu0 %v1728_v2 }
 0x1ab   :  { %2609 = vmatprep.subr.bf16.mxu0 %v8086_v6 }
 0x1ae   :  { %2610 = vmatpush1.bf16.msra.mxu0 %v8084_v7 }
 0x1af   :  { %2611 = vmatprep.subr.bf16.mxu0 %v8092_v8 }
 0x1b2   :  { %2612 = vmatpush1.bf16.msra.mxu0 %v8090_v9 }
 0x1b3   :  { %2613 = vmatprep.subr.bf16.mxu0 %v8098_v11 }
 0x1b6   :  { %2614 = vmatpush1.bf16.msra.mxu0 %v8096_v13 }
 0x1b7   :  { %2615 = vmatprep.subr.bf16.mxu0 %v8104_v14 }
 0x1ba   :  { %2616 = vmatpush1.bf16.msra.mxu0 %v8102_v16 }
 0x1bb   :  { %2617 = vmatprep.subr.bf16.mxu0 %v8110_v17 }
 0x1be   :  { %2618 = vmatpush1.bf16.msra.mxu0 %v8108_v18 }
 0x1bf   :  { %2619 = vmatprep.subr.bf16.mxu0 %v8116_v19 }
 0x1c2   :  { %2620 = vmatpush1.bf16.msra.mxu0 %v8114_v20 }
 0x1c3   :  { %2621 = vmatprep.subr.bf16.mxu0 %v8122_v21 }
 0x1c6   :  { %2622 = vmatpush1.bf16.msra.mxu0 %v8120_v22 }
 0x1c7   :  { %2623 = vmatprep.subr.bf16.mxu0 %v8128_v23 }
 0x1ca   :  { %2624 = vmatpush2.bf16.msra.mxu0 %v8126_v24  ;;  %v8177_v24 = vld [vmem:[#allocation7 + $0x2e8] ss:$16 sps:$4 sm:$0xff]  }
 0x1cb   :  { %2625 = vmatprep.subr.bf16.mxu0 %v8134_v26 }
 0x1ce   :  { %2626 = vmatpush2.bf16.msra.mxu0 %v8132_v27  ;;  %v8182_v27 = vld [vmem:[#allocation7 + $0x2cc] ss:$16 sps:$4 sm:$0xff]  }
 0x1cf   :  { %2627 = vmatprep.subr.bf16.mxu0 %v8140_v12  ;;  %v2825_v12 = vld [vmem:[#allocation10 + $0x380] sm:$0xff] }
 0x1d2   :  { %2628 = vmatpush2.bf16.msra.mxu0 %v8138_v10  ;;  %v2833_v10 = vld [vmem:[#allocation10 + $0x3c0] sm:$0xff] }
 0x1d3   :  { %2629 = vmatprep.subr.bf16.mxu0 %v8146_v52  ;;  %v2809_v52 = vld [vmem:[#allocation10 + $0x300] sm:$0xff]  ;;  %v7316_v15 = vcombine.low %v2825_v12, %v2833_v10 }
 0x1d6   :  { %2630 = vmatpush2.bf16.msra.mxu0 %v8144_v31  ;;  %v7317_v31 = vcombine.high %v2825_v12, %v2833_v10  ;;  %v8209_v12 = vld [vmem:[#allocation7 + $0x3ac] ss:$16 sps:$4 sm:$0xff]  }
 0x1d7   :  { %v1616_v37 = vpop.f32.mrf.mxu0  ;;  %2631 = vmatprep.subr.bf16.mxu0 %v8152_v32  ;;  %v2817_v32 = vld [vmem:[#allocation10 + $0x340] sm:$0xff] }
 0x1d8   :  { %v1617_v50 = vadd.f32 %v1616_v37, %v1574_v45  ;;  %v7301_v33 = vcombine.high %v2809_v52, %v2817_v32  ;;  %v2801_v37 = vld [vmem:[#allocation10 + $0x2c0] sm:$0xff]  ;;  %v7300_v34 = vcombine.low %v2809_v52, %v2817_v32 }
 0x1d9   :  { %v1618_v40 = vpop.f32.mrf.mxu0 }
 0x1da   :  { %2632 = vmatpush2.bf16.msra.mxu0 %v8150_v36  ;;  %v1619_v56 = vadd.f32 %v1618_v40, %v1576_v48  ;;  %v2793_v36 = vld [vmem:[#allocation10 + $0x280] sm:$0xff] }
 0x1db   :  { %v1620_v43 = vpop.f32.mrf.mxu0  ;;  %2633 = vmatprep.subr.bf16.mxu0 %v8158_v38  ;;  %v8185_v38 = vld [vmem:[#allocation7 + $0x2ac] ss:$16 sps:$4 sm:$0xff]   ;;  %v7285_v39 = vcombine.high %v2793_v36, %v2801_v37  ;;  %v8183_v40 = vld [vmem:[#allocation7 + $0x2a8] ss:$16 sps:$4 sm:$0xff]  }
 0x1dc   :  { %v1621_v60 = vadd.f32 %v1620_v43, %v1578_v55  ;;  %v8188_v43 = vld [vmem:[#allocation7 + $0x28c] ss:$16 sps:$4 sm:$0xff]   ;;  %v2769_v48 = vld [vmem:[#allocation10 + $0x1c0] sm:$0xff] }
 0x1dd   :  { %v1622_v47 = vpop.f32.mrf.mxu0  ;;  %v2753_v55 = vld [vmem:[#allocation10 + $0x140] sm:$0xff] }
 0x1de   :  { %2634 = vmatpush2.bf16.msra.mxu0 %v8156_v42  ;;  %v1623_v1 = vadd.f32 %v1622_v47, %v1580_v59  ;;  %v2785_v42 = vld [vmem:[#allocation10 + $0x240] sm:$0xff] }
 0x1df   :  { %v1702_v53 = vpop.f32.mrf.mxu0  ;;  %2635 = vmatprep.subr.bf16.mxu0 %v8164_v44  ;;  %v7284_v44 = vcombine.low %v2793_v36, %v2801_v37  ;;  %v7269_v45 = vcombine.high %v2777_v41, %v2785_v42  ;;  %v2761_v47 = vld [vmem:[#allocation10 + $0x180] sm:$0xff]  ;;  %v8218_v37 = vld [vmem:[#allocation7 + $0x34c] ss:$16 sps:$4 sm:$0xff]  }
 0x1e0   :  { %v1659_v51 = vpop.f32.mrf.mxu1  ;;  %v2729_v59 = vld [vmem:[#allocation10 + $0x80] sm:$0xff] }
 0x1e1   :  { %v1660_v57 = vadd.f32 %v1659_v51, %v1617_v50  ;;  %v1704_v58 = vpop.f32.mrf.mxu0  ;;  %v7268_v50 = vcombine.low %v2777_v41, %v2785_v42  ;;  %v7253_v51 = vcombine.high %v2761_v47, %v2769_v48  ;;  %v8213_v36 = vld [vmem:[#allocation7 + $0x368] ss:$16 sps:$4 sm:$0xff]  }
 0x1e2   :  { %v1661_v29 = vpop.f32.mrf.mxu1  ;;  %2636 = vmatpush2.bf16.msra.mxu0 %v8162_v49  ;;  %v8191_v49 = vld [vmem:[#allocation7 + $0x26c] ss:$16 sps:$4 sm:$0xff]   ;;  %v8222_v41 = vld [vmem:[#allocation7 + $0x308] ss:$16 sps:$4 sm:$0xff]  }
 0x1e3   :  { %v1662_v61 = vadd.f32 %v1661_v29, %v1619_v56  ;;  %v1706_v0 = vpop.f32.mrf.mxu0  ;;  %2637 = vmatprep.subr.bf16.mxu0 %v8170_v54  ;;  %v1703_v6 = vadd.f32 %v1702_v53, %v1660_v57  ;;  %v8189_v53 = vld [vmem:[#allocation7 + $0x268] ss:$16 sps:$4 sm:$0xff]   ;;  %v8194_v56 = vld [vmem:[#allocation7 + $0x24c] ss:$16 sps:$4 sm:$0xff]   ;;  %v7252_v57 = vcombine.low %v2761_v47, %v2769_v48 }
 0x1e4   :  { %v1663_v63 = vpop.f32.mrf.mxu1  ;;  %v2745_v54 = vld [vmem:[#allocation10 + $0x100] sm:$0xff] }
 0x1e5   :  { %v1705_v2 = vadd.f32 %v1704_v58, %v1662_v61  ;;  %v1664_v3 = vadd.f32 %v1663_v63, %v1621_v60  ;;  %v1708_v8 = vpop.f32.mrf.mxu0  ;;  %v1713_v17 = vmul.f32 0.02, %v1703_v6  ;;  %v7237_v29 = vcombine.high %v2745_v54, %v2753_v55  ;;  %v8192_v58 = vld [vmem:[#allocation7 + $0x248] ss:$16 sps:$4 sm:$0xff]   ;;  %v8197_v61 = vld [vmem:[#allocation7 + $0x22c] ss:$16 sps:$4 sm:$0xff]  }
 0x1e6   :  { %v1665_v7 = vpop.f32.mrf.mxu1  ;;  %2638 = vmatpush2.bf16.msra.mxu0 %v8168_v62  ;;  %v2737_v60 = vld [vmem:[#allocation10 + $0xc0] sm:$0xff]  ;;  %v7236_v62 = vcombine.low %v2745_v54, %v2753_v55 }
 0x1e7   :  { %v1707_v9 = vadd.f32 %v1706_v0, %v1664_v3  ;;  %v1666_v11 = vadd.f32 %v1665_v7, %v1623_v1  ;;  %v1714_v13 = vmul.f32 0.02, %v1705_v2  ;;  %v1721_v22 = vmax.f32 %v1703_v6, %v1713_v17  ;;  %5869 = vmatprep.subr.bf16.mxu0 %v7317_v31  ;;  %v8195_v0 = vld [vmem:[#allocation7 + $0x228] ss:$16 sps:$4 sm:$0xff]   ;;  %v8200_v3 = vld [vmem:[#allocation7 + $0x20c] ss:$16 sps:$4 sm:$0xff]  }
 0x1e8   :  { %v7221_v63 = vcombine.high %v2729_v59, %v2737_v60  ;;  %v2713_v1 = vld [vmem:[#allocation10] sm:$0xff]  ;;  %v7220_v6 = vcombine.low %v2729_v59, %v2737_v60  ;;  %v8212_v31 = vld [vmem:[#allocation7 + $0x38c] ss:$16 sps:$4 sm:$0xff]  }
 0x1e9   :  { %v1717_v14 = vmul.f32 0.02, %v1707_v9  ;;  %v1709_v16 = vadd.f32 %v1708_v8, %v1666_v11  ;;  %2640 = vmatmul.mubr.bf16.vlgmr.msra.gmra.mxu0 %v8534_v4  ;;  %v1722_v20 = vmax.f32 %v1705_v2, %v1714_v13  ;;  %v8180_v4 = vld [vmem:[#allocation7 + $0x2c8] ss:$16 sps:$4 sm:$0xff]   ;;  %v8203_v13 = vld [vmem:[#allocation7 + $0x3ec] ss:$16 sps:$4 sm:$0xff]  }
 0x1ea   :  { %5870 = vmatpush1.bf16.msra.mxu0 %v7316_v15  ;;  %v2721_v2 = vld [vmem:[#allocation10 + $0x40] sm:$0xff] }
 0x1eb   :  { %v1718_v18 = vmul.f32 0.02, %v1709_v16  ;;  %v1725_v19 = vmax.f32 %v1707_v9, %v1717_v14  ;;  %5871 = vmatprep.subr.bf16.mxu0 %v7301_v33  ;;  %v7205_v7 = vcombine.high %v2713_v1, %v2721_v2  ;;  %v8198_v8 = vld [vmem:[#allocation7 + $0x208] ss:$16 sps:$4 sm:$0xff]   ;;  %v7204_v14 = vcombine.low %v2713_v1, %v2721_v2  ;;  %v8215_v33 = vld [vmem:[#allocation7 + $0x36c] ss:$16 sps:$4 sm:$0xff]  }
 0x1ec   :  { %v2953_v9 = vld [vmem:[#allocation10 + $0x780] sm:$0xff]  ;;  %v8552_v1 = vld [vmem:[#allocation10 + $0x388] sm:$0xff] }
 0x1ed   :  { %v1726_v21 = vmax.f32 %v1709_v16, %v1718_v18  ;;  %v8548_v26 = vpack.c.bf16 %v1725_v19, %v1721_v22  ;;  %v2961_v11 = vld [vmem:[#allocation10 + $0x7c0] sm:$0xff]  ;;  %v8554_v2 = vld [vmem:[#allocation10 + $0x3c8] sm:$0xff] }
 0x1ee   :  { %5872 = vmatpush1.bf16.msra.mxu0 %v7300_v34  ;;  %v7445_v16 = vcombine.high %v2953_v9, %v2961_v11  ;;  %v8201_v17 = vld [vmem:[#allocation7 + $0x3e8] ss:$16 sps:$4 sm:$0xff]   ;;  %v8221_v34 = vld [vmem:[#allocation7 + $0x32c] ss:$16 sps:$4 sm:$0xff]  }
 0x1ef   :  { %v1730_v23 = vpack.c.bf16 %v1726_v21, %v1722_v20  ;;  %5873 = vmatprep.subr.bf16.mxu0 %v7285_v39  ;;  %v2937_v18 = vld [vmem:[#allocation10 + $0x700] sm:$0xff]  ;;  %v8206_v20 = vld [vmem:[#allocation7 + $0x3cc] ss:$16 sps:$4 sm:$0xff]   ;;  %v7444_v21 = vcombine.low %v2953_v9, %v2961_v11 }
 0x1f0   :  { %v2945_v19 = vld [vmem:[#allocation10 + $0x740] sm:$0xff] }
 0x1f1   :  { %2596 = vmatprep.mubr.bf16.mxu1 %v1730_v23  ;;  %v7429_v22 = vcombine.high %v2937_v18, %v2945_v19  ;;  %v7428_v10 = vcombine.low %v2937_v18, %v2945_v19  ;;  %v8207_v15 = vld [vmem:[#allocation7 + $0x3a8] ss:$16 sps:$4 sm:$0xff]  }
 0x1f2   :  { %2597 = vmatmul.mubr.bf16.vlgmr.msra.gmra.mxu1 %v8548_v26  ;;  %5874 = vmatpush1.bf16.msra.mxu0 %v7284_v44  ;;  %v8219_v39 = vld [vmem:[#allocation7 + $0x328] ss:$16 sps:$4 sm:$0xff]  }
 0x1f3   :  { %2651 = vmatpush1.bf16.msra.mxu1 %v8177_v24  ;;  %2682 = vmatprep.mubr.bf16.mxu1 %v1730_v23  ;;  %v8204_v23 = vld [vmem:[#allocation7 + $0x3c8] ss:$16 sps:$4 sm:$0xff]  }
 0x1f4   :  { %2652 = vmatprep.subr.bf16.mxu1 %v8182_v27  ;;  %5875 = vmatprep.subr.bf16.mxu0 %v7269_v45  ;;  %v2921_v24 = vld [vmem:[#allocation10 + $0x680] sm:$0xff] }
 0x1f5   :  { %v2929_v27 = vld [vmem:[#allocation10 + $0x6c0] sm:$0xff] }
 0x1f6   :  { %5876 = vmatpush1.bf16.msra.mxu0 %v7268_v50  ;;  %v7413_v52 = vcombine.high %v2921_v24, %v2929_v27  ;;  %v7412_v32 = vcombine.low %v2921_v24, %v2929_v27  ;;  %v2905_v42 = vld [vmem:[#allocation10 + $0x600] sm:$0xff] }
 0x1f7   :  { %2653 = vmatpush1.bf16.msra.mxu1 %v8180_v4  ;;  %5877 = vmatprep.subr.bf16.mxu0 %v7253_v51  ;;  %v8210_v4 = vld [vmem:[#allocation7 + $0x388] ss:$16 sps:$4 sm:$0xff]  }
 0x1f8   :  { %2654 = vmatprep.subr.bf16.mxu1 %v8185_v38  ;;  %v8216_v38 = vld [vmem:[#allocation7 + $0x348] ss:$16 sps:$4 sm:$0xff]  }
 0x1f9   :  { %v2897_v47 = vld [vmem:[#allocation10 + $0x5c0] sm:$0xff] }
 0x1fa   :  { %5878 = vmatpush1.bf16.msra.mxu0 %v7252_v57  ;;  %v2873_v50 = vld [vmem:[#allocation10 + $0x500] sm:$0xff] }
 0x1fb   :  { %2655 = vmatpush1.bf16.msra.mxu1 %v8183_v40  ;;  %5879 = vmatprep.subr.bf16.mxu0 %v7237_v29  ;;  %v8224_v40 = vld [vmem:[#allocation7 + $0x30c] ss:$16 sps:$4 sm:$0xff]   ;;  %v2881_v51 = vld [vmem:[#allocation10 + $0x540] sm:$0xff] }
 0x1fc   :  { %2656 = vmatprep.subr.bf16.mxu1 %v8188_v43  ;;  %v2913_v43 = vld [vmem:[#allocation10 + $0x640] sm:$0xff]  ;;  %v7364_v54 = vcombine.low %v2873_v50, %v2881_v51 }
 0x1fd   :  { %v7397_v44 = vcombine.high %v2905_v42, %v2913_v43  ;;  %v7396_v45 = vcombine.low %v2905_v42, %v2913_v43  ;;  %v2857_v55 = vld [vmem:[#allocation10 + $0x480] sm:$0xff] }
 0x1fe   :  { %5880 = vmatpush1.bf16.msra.mxu0 %v7236_v62  ;;  %v2849_v59 = vld [vmem:[#allocation10 + $0x440] sm:$0xff] }
 0x1ff   :  { %2657 = vmatpush1.bf16.msra.mxu1 %v8186_v46  ;;  %5881 = vmatprep.subr.bf16.mxu0 %v7221_v63  ;;  %v2889_v46 = vld [vmem:[#allocation10 + $0x580] sm:$0xff] }
 0x200   :  { %2658 = vmatprep.subr.bf16.mxu1 %v8191_v49  ;;  %v7381_v48 = vcombine.high %v2889_v46, %v2897_v47  ;;  %v7380_v49 = vcombine.low %v2889_v46, %v2897_v47  ;;  %v3089_v62 = vld [vmem:[#allocation10 + $0xbc0] sm:$0xff] }
 0x201   :  { %v3033_v18 = vld [vmem:[#allocation10 + $0xa00] sm:$0xff] }
 0x202   :  { %5882 = vmatpush1.bf16.msra.mxu0 %v7220_v6  ;;  %v7318_v6 = vcombine.low %v8552_v1, %v8554_v2  ;;  %v3041_v19 = vld [vmem:[#allocation10 + $0xa40] sm:$0xff] }
 0x203   :  { %2659 = vmatpush1.bf16.msra.mxu1 %v8189_v53  ;;  %5883 = vmatprep.subr.bf16.mxu0 %v7205_v7  ;;  %v7365_v53 = vcombine.high %v2873_v50, %v2881_v51  ;;  %v3065_v7 = vld [vmem:[#allocation10 + $0xb00] sm:$0xff] }
 0x204   :  { %2660 = vmatprep.subr.bf16.mxu1 %v8194_v56  ;;  %v2865_v56 = vld [vmem:[#allocation10 + $0x4c0] sm:$0xff] }
 0x205   :  { %v7349_v57 = vcombine.high %v2857_v55, %v2865_v56  ;;  %v7348_v29 = vcombine.low %v2857_v55, %v2865_v56  ;;  %v3193_v43 = vld [vmem:[#allocation10 + $0xf00] sm:$0xff] }
 0x206   :  { %5884 = vmatpush1.bf16.msra.mxu0 %v7204_v14  ;;  %v3057_v14 = vld [vmem:[#allocation10 + $0xac0] sm:$0xff] }
 0x207   :  { %2661 = vmatpush1.bf16.msra.mxu1 %v8192_v58  ;;  %5885 = vmatprep.subr.bf16.mxu0 %v7445_v16  ;;  %v2841_v58 = vld [vmem:[#allocation10 + $0x400] sm:$0xff] }
 0x208   :  { %2662 = vmatprep.subr.bf16.mxu1 %v8197_v61  ;;  %v7333_v60 = vcombine.high %v2841_v58, %v2849_v59  ;;  %v7332_v61 = vcombine.low %v2841_v58, %v2849_v59  ;;  %v3177_v47 = vld [vmem:[#allocation10 + $0xe80] sm:$0xff] }
 0x209   :  { %v3161_v51 = vld [vmem:[#allocation10 + $0xe00] sm:$0xff] }
 0x20a   :  { %5886 = vmatpush2.bf16.msra.mxu0 %v7444_v21  ;;  %v7525_v21 = vcombine.high %v3033_v18, %v3041_v19  ;;  %v3145_v56 = vld [vmem:[#allocation10 + $0xd80] sm:$0xff] }
 0x20b   :  { %2663 = vmatpush1.bf16.msra.mxu1 %v8195_v0  ;;  %5887 = vmatprep.subr.bf16.mxu0 %v7429_v22  ;;  %v3017_v22 = vld [vmem:[#allocation10 + $0x980] sm:$0xff] }
 0x20c   :  { %2664 = vmatprep.subr.bf16.mxu1 %v8200_v3  ;;  %v7319_v3 = vcombine.high %v8552_v1, %v8554_v2  ;;  %v3129_v59 = vld [vmem:[#allocation10 + $0xd00] sm:$0xff]  ;;  %v2754_v1 = vld [vmem:[#allocation10 + $0x148] sm:$0xff] }
 0x20e   :  { %5888 = vmatpush2.bf16.msra.mxu0 %v7428_v10  ;;  %v3009_v10 = vld [vmem:[#allocation10 + $0x940] sm:$0xff] }
 0x20f   :  { %2665 = vmatpush1.bf16.msra.mxu1 %v8198_v8  ;;  %5889 = vmatprep.subr.bf16.mxu0 %v7413_v52  ;;  %v3073_v8 = vld [vmem:[#allocation10 + $0xb40] sm:$0xff] }
 0x210   :  { %2666 = vmatprep.subr.bf16.mxu1 %v8203_v13  ;;  %v7556_v9 = vcombine.low %v3065_v7, %v3073_v8  ;;  %v7557_v11 = vcombine.high %v3065_v7, %v3073_v8  ;;  %v3049_v13 = vld [vmem:[#allocation10 + $0xa80] sm:$0xff] }
 0x211   :  { %v7540_v16 = vcombine.low %v3049_v13, %v3057_v14  ;;  %v3097_v7 = vld [vmem:[#allocation10 + $0xc00] sm:$0xff] }
 0x212   :  { %5890 = vmatpush2.bf16.msra.mxu0 %v7412_v32  ;;  %v2993_v32 = vld [vmem:[#allocation10 + $0x8c0] sm:$0xff] }
 0x213   :  { %2667 = vmatpush2.bf16.msra.mxu1 %v8201_v17  ;;  %5891 = vmatprep.subr.bf16.mxu0 %v7397_v44  ;;  %v7541_v17 = vcombine.high %v3049_v13, %v3057_v14  ;;  %v3201_v44 = vld [vmem:[#allocation10 + $0xf40] sm:$0xff]  ;;  %v8560_v13 = vld [vmem:[#allocation10 + $0xb88] sm:$0xff] }
 0x214   :  { %2668 = vmatprep.subr.bf16.mxu1 %v8206_v20  ;;  %v7524_v20 = vcombine.low %v3033_v18, %v3041_v19  ;;  %v7685_v46 = vcombine.high %v3193_v43, %v3201_v44  ;;  %v3105_v8 = vld [vmem:[#allocation10 + $0xc40] sm:$0xff]  ;;  %v8562_v14 = vld [vmem:[#allocation10 + $0xbc8] sm:$0xff] }
 0x216   :  { %5892 = vmatpush2.bf16.msra.mxu0 %v7396_v45  ;;  %v7684_v45 = vcombine.low %v3193_v43, %v3201_v44 }
 0x217   :  { %2669 = vmatpush2.bf16.msra.mxu1 %v8204_v23  ;;  %5893 = vmatprep.subr.bf16.mxu0 %v7381_v48  ;;  %v3025_v23 = vld [vmem:[#allocation10 + $0x9c0] sm:$0xff] }
 0x218   :  { %2670 = vmatprep.subr.bf16.mxu1 %v8209_v12  ;;  %v7508_v24 = vcombine.low %v3017_v22, %v3025_v23  ;;  %v7509_v27 = vcombine.high %v3017_v22, %v3025_v23  ;;  %v3001_v12 = vld [vmem:[#allocation10 + $0x900] sm:$0xff] }
 0x219   :  { %v7492_v52 = vcombine.low %v3001_v12, %v3009_v10  ;;  %v3185_v48 = vld [vmem:[#allocation10 + $0xec0] sm:$0xff] }
 0x21a   :  { %5894 = vmatpush2.bf16.msra.mxu0 %v7380_v49  ;;  %v7668_v49 = vcombine.low %v3177_v47, %v3185_v48  ;;  %v7669_v50 = vcombine.high %v3177_v47, %v3185_v48 }
 0x21b   :  { %2671 = vmatpush2.bf16.msra.mxu1 %v8207_v15  ;;  %5895 = vmatprep.subr.bf16.mxu0 %v7365_v53  ;;  %v7493_v15 = vcombine.high %v3001_v12, %v3009_v10  ;;  %v3169_v53 = vld [vmem:[#allocation10 + $0xe40] sm:$0xff] }
 0x21c   :  { %2672 = vmatprep.subr.bf16.mxu1 %v8212_v31  ;;  %v2985_v31 = vld [vmem:[#allocation10 + $0x880] sm:$0xff]  ;;  %v7653_v55 = vcombine.high %v3161_v51, %v3169_v53 }
 0x21e   :  { %5896 = vmatpush2.bf16.msra.mxu0 %v7364_v54  ;;  %v7652_v54 = vcombine.low %v3161_v51, %v3169_v53  ;;  %v2794_v51 = vld [vmem:[#allocation10 + $0x288] sm:$0xff] }
 0x21f   :  { %2673 = vmatpush2.bf16.msra.mxu1 %v8210_v4  ;;  %5897 = vmatprep.subr.bf16.mxu0 %v7349_v57  ;;  %v7476_v4 = vcombine.low %v2985_v31, %v2993_v32  ;;  %v3153_v57 = vld [vmem:[#allocation10 + $0xdc0] sm:$0xff]  ;;  %v2802_v53 = vld [vmem:[#allocation10 + $0x2c8] sm:$0xff] }
 0x220   :  { %2674 = vmatprep.subr.bf16.mxu1 %v8215_v33  ;;  %v7477_v33 = vcombine.high %v2985_v31, %v2993_v32  ;;  %v7637_v58 = vcombine.high %v3145_v56, %v3153_v57 }
 0x222   :  { %5898 = vmatpush2.bf16.msra.mxu0 %v7348_v29  ;;  %v7636_v29 = vcombine.low %v3145_v56, %v3153_v57  ;;  %v2778_v56 = vld [vmem:[#allocation10 + $0x208] sm:$0xff] }
 0x223   :  { %2675 = vmatpush2.bf16.msra.mxu1 %v8213_v36  ;;  %5899 = vmatprep.subr.bf16.mxu0 %v7333_v60  ;;  %v2969_v36 = vld [vmem:[#allocation10 + $0x800] sm:$0xff]  ;;  %v2786_v57 = vld [vmem:[#allocation10 + $0x248] sm:$0xff] }
 0x224   :  { %2676 = vmatprep.subr.bf16.mxu1 %v8218_v37  ;;  %v2977_v37 = vld [vmem:[#allocation10 + $0x840] sm:$0xff] }
 0x225   :  { %v3137_v60 = vld [vmem:[#allocation10 + $0xd40] sm:$0xff] }
 0x226   :  { %5900 = vmatpush2.bf16.msra.mxu0 %v7332_v61  ;;  %v7621_v61 = vcombine.high %v3129_v59, %v3137_v60 }
 0x227   :  { %2677 = vmatpush2.bf16.msra.mxu1 %v8216_v38  ;;  %5955 = vmatprep.subr.bf16.mxu0 %v7319_v3  ;;  %v7460_v38 = vcombine.low %v2969_v36, %v2977_v37 }
 0x228   :  { %2678 = vmatprep.subr.bf16.mxu1 %v8221_v34  ;;  %v7461_v34 = vcombine.high %v2969_v36, %v2977_v37 }
 0x22b   :  { %2679 = vmatpush2.bf16.msra.mxu1 %v8219_v39  ;;  %v3209_v39 = vld [vmem:[#allocation10 + $0xf80] sm:$0xff] }
 0x22c   :  { %2680 = vmatprep.subr.bf16.mxu1 %v8224_v40  ;;  %v3217_v40 = vld [vmem:[#allocation10 + $0xfc0] sm:$0xff] }
 0x22d   :  { %v7701_v42 = vcombine.high %v3209_v39, %v3217_v40 }
 0x22f   :  { %2681 = vmatpush2.bf16.msra.mxu1 %v8222_v41  ;;  %v7700_v41 = vcombine.low %v3209_v39, %v3217_v40 }
 0x232   :  { %2683 = vmatmul.mubr.bf16.vlgmr.msra.gmra.mxu1 %v8548_v26  ;;  %v3081_v26 = vld [vmem:[#allocation10 + $0xb80] sm:$0xff] }
 0x233   :  { %v7572_v63 = vcombine.low %v3081_v26, %v3089_v62  ;;  %v7573_v0 = vcombine.high %v3081_v26, %v3089_v62  ;;  %v7620_v26 = vcombine.low %v3129_v59, %v3137_v60  ;;  %v3113_v62 = vld [vmem:[#allocation10 + $0xc80] sm:$0xff]  ;;  %v2762_v59 = vld [vmem:[#allocation10 + $0x188] sm:$0xff] }
 0x234   :  { %v2770_v60 = vld [vmem:[#allocation10 + $0x1c8] sm:$0xff] }
 0x235   :  { %5912 = vmatprep.subr.bf16.mxu1 %v7573_v0  ;;  %v7254_v2 = vcombine.low %v2762_v59, %v2770_v60 }
 0x236   :  { %5913 = vmatpush1.bf16.msra.mxu1 %v7572_v63  ;;  %v3121_v63 = vld [vmem:[#allocation10 + $0xcc0] sm:$0xff] }
 0x237   :  { %5914 = vmatprep.subr.bf16.mxu1 %v7557_v11  ;;  %v7605_v0 = vcombine.high %v3113_v62, %v3121_v63  ;;  %v7604_v3 = vcombine.low %v3113_v62, %v3121_v63  ;;  %v7588_v11 = vcombine.low %v3097_v7, %v3105_v8  ;;  %v2746_v62 = vld [vmem:[#allocation10 + $0x108] sm:$0xff] }
 0x238   :  { %v2730_v63 = vld [vmem:[#allocation10 + $0x88] sm:$0xff] }
 0x23a   :  { %5915 = vmatpush1.bf16.msra.mxu1 %v7556_v9  ;;  %v7589_v9 = vcombine.high %v3097_v7, %v3105_v8  ;;  %v2714_v8 = vld [vmem:[#allocation10 + $0x8] sm:$0xff] }
 0x23b   :  { %5916 = vmatprep.subr.bf16.mxu1 %v7541_v17  ;;  %v7574_v17 = vcombine.low %v8560_v13, %v8562_v14 }
 0x23e   :  { %5917 = vmatpush1.bf16.msra.mxu1 %v7540_v16  ;;  %v7575_v16 = vcombine.high %v8560_v13, %v8562_v14 }
 0x23f   :  { %5918 = vmatprep.subr.bf16.mxu1 %v7525_v21 }
 0x242   :  { %5919 = vmatpush1.bf16.msra.mxu1 %v7524_v20  ;;  %v8568_v20 = vld [vmem:[#allocation8] sm:$0xf] }
 0x243   :  { %5920 = vmatprep.subr.bf16.mxu1 %v7509_v27  ;;  %v1868_v21 = vrot.slane %v8568_v20, %v8528_v30  ;;  %v1864_v22 = vrot.slane %v8568_v20, %v8523_v28 }
 0x246   :  { %5921 = vmatpush1.bf16.msra.mxu1 %v7508_v24 }
 0x247   :  { %5922 = vmatprep.subr.bf16.mxu1 %v7493_v15 }
 0x24a   :  { %5923 = vmatpush1.bf16.msra.mxu1 %v7492_v52 }
 0x24b   :  { %5924 = vmatprep.subr.bf16.mxu1 %v7477_v33 }
 0x24e   :  { %5925 = vmatpush1.bf16.msra.mxu1 %v7476_v4 }
 0x24f   :  { %5926 = vmatprep.subr.bf16.mxu1 %v7461_v34 }
 0x252   :  { %5927 = vmatpush1.bf16.msra.mxu1 %v7460_v38 }
 0x253   :  { %5928 = vmatprep.subr.bf16.mxu1 %v7701_v42 }
 0x256   :  { %5929 = vmatpush2.bf16.msra.mxu1 %v7700_v41 }
 0x257   :  { %5930 = vmatprep.subr.bf16.mxu1 %v7685_v46  ;;  %v2818_v46 = vld [vmem:[#allocation10 + $0x348] sm:$0xff] }
 0x25a   :  { %5931 = vmatpush2.bf16.msra.mxu1 %v7684_v45  ;;  %v2810_v45 = vld [vmem:[#allocation10 + $0x308] sm:$0xff] }
 0x25b   :  { %5932 = vmatprep.subr.bf16.mxu1 %v7669_v50  ;;  %v7303_v50 = vcombine.high %v2810_v45, %v2818_v46 }
 0x25e   :  { %5933 = vmatpush2.bf16.msra.mxu1 %v7668_v49 }
 0x25f   :  { %5934 = vmatprep.subr.bf16.mxu1 %v7653_v55  ;;  %v7287_v55 = vcombine.high %v2794_v51, %v2802_v53 }
 0x262   :  { %5935 = vmatpush2.bf16.msra.mxu1 %v7652_v54  ;;  %v7302_v54 = vcombine.low %v2810_v45, %v2818_v46  ;;  %v1872_v46 = vrot.slane %v8568_v20, %v8538_v5 }
 0x263   :  { %5936 = vmatprep.subr.bf16.mxu1 %v7637_v58  ;;  %v7271_v58 = vcombine.high %v2778_v56, %v2786_v57 }
 0x266   :  { %5937 = vmatpush2.bf16.msra.mxu1 %v7636_v29  ;;  %v7286_v29 = vcombine.low %v2794_v51, %v2802_v53  ;;  %v2858_v51 = vld [vmem:[#allocation10 + $0x488] sm:$0xff] }
 0x267   :  { %5938 = vmatprep.subr.bf16.mxu1 %v7621_v61  ;;  %v7270_v61 = vcombine.low %v2778_v56, %v2786_v57  ;;  %v2866_v53 = vld [vmem:[#allocation10 + $0x4c8] sm:$0xff] }
 0x269   :  { %v2555_v18 = vpop.f32.mrf.mxu0 }
 0x26a   :  { %5939 = vmatpush2.bf16.msra.mxu1 %v7620_v26  ;;  %v2556_v12 = vadd.f32 %v2555_v18, %v1864_v22  ;;  %v7255_v26 = vcombine.high %v2762_v59, %v2770_v60  ;;  %v2954_v18 = vld [vmem:[#allocation10 + $0x788] sm:$0xff]  ;;  %v7351_v59 = vcombine.high %v2858_v51, %v2866_v53 }
 0x26b   :  { %5940 = vmatprep.subr.bf16.mxu1 %v7605_v0  ;;  %v2557_v19 = vpop.f32.mrf.mxu0  ;;  %v2738_v0 = vld [vmem:[#allocation10 + $0xc8] sm:$0xff] }
 0x26c   :  { %v2558_v27 = vadd.f32 %v2557_v19, %v1868_v21  ;;  %v7223_v7 = vcombine.high %v2730_v63, %v2738_v0  ;;  %v2962_v19 = vld [vmem:[#allocation10 + $0x7c8] sm:$0xff] }
 0x26d   :  { %v2559_v23 = vpop.f32.mrf.mxu0 }
 0x26e   :  { %5941 = vmatpush2.bf16.msra.mxu1 %v7604_v3  ;;  %v2560_v15 = vadd.f32 %v2559_v23, %v1864_v22  ;;  %v7238_v3 = vcombine.low %v2746_v62, %v2754_v1  ;;  %v7447_v22 = vcombine.high %v2954_v18, %v2962_v19  ;;  %v2938_v23 = vld [vmem:[#allocation10 + $0x708] sm:$0xff] }
 0x26f   :  { %5942 = vmatprep.subr.bf16.mxu1 %v7589_v9  ;;  %v2561_v10 = vpop.f32.mrf.mxu0  ;;  %v2722_v9 = vld [vmem:[#allocation10 + $0x48] sm:$0xff] }
 0x270   :  { %v2562_v33 = vadd.f32 %v2561_v10, %v1868_v21  ;;  %v7206_v21 = vcombine.low %v2714_v8, %v2722_v9  ;;  %v2922_v10 = vld [vmem:[#allocation10 + $0x688] sm:$0xff] }
 0x272   :  { %5943 = vmatpush2.bf16.msra.mxu1 %v7588_v11  ;;  %v7222_v11 = vcombine.low %v2730_v63, %v2738_v0  ;;  %v7350_v63 = vcombine.low %v2858_v51, %v2866_v53  ;;  %v3018_v53 = vld [vmem:[#allocation10 + $0x988] sm:$0xff] }
 0x273   :  { %5998 = vmatprep.subr.bf16.mxu1 %v7575_v16  ;;  %v7207_v16 = vcombine.high %v2714_v8, %v2722_v9 }
 0x2b2   :  { %v2598_v24 = vpop.f32.mrf.mxu1 }
 0x2b3   :  { %v2599_v32 = vadd.f32 %v2598_v24, %v2556_v12  ;;  %v2946_v24 = vld [vmem:[#allocation10 + $0x748] sm:$0xff] }
 0x2b4   :  { %v2600_v52 = vpop.f32.mrf.mxu1  ;;  %v7431_v12 = vcombine.high %v2938_v23, %v2946_v24 }
 0x2b5   :  { %v2601_v31 = vadd.f32 %v2600_v52, %v2558_v27  ;;  %v2693_v40 = vmul.f32 0.02, %v2599_v32  ;;  %v7446_v27 = vcombine.low %v2954_v18, %v2962_v19  ;;  %v2930_v52 = vld [vmem:[#allocation10 + $0x6c8] sm:$0xff] }
 0x2b6   :  { %v2602_v4 = vpop.f32.mrf.mxu1 }
 0x2b7   :  { %v2603_v36 = vadd.f32 %v2602_v4, %v2560_v15  ;;  %v2694_v38 = vmul.f32 0.02, %v2601_v31  ;;  %v2701_v47 = vmax.f32 %v2599_v32, %v2693_v40  ;;  %v7430_v15 = vcombine.low %v2938_v23, %v2946_v24  ;;  %v2906_v32 = vld [vmem:[#allocation10 + $0x608] sm:$0xff] }
 0x2b8   :  { %v2604_v37 = vpop.f32.mrf.mxu1  ;;  %v2914_v4 = vld [vmem:[#allocation10 + $0x648] sm:$0xff] }
 0x2b9   :  { %v2697_v34 = vmul.f32 0.02, %v2603_v36  ;;  %v2605_v39 = vadd.f32 %v2604_v37, %v2562_v33  ;;  %v2702_v43 = vmax.f32 %v2601_v31, %v2694_v38  ;;  %v7415_v31 = vcombine.high %v2922_v10, %v2930_v52  ;;  %v2890_v38 = vld [vmem:[#allocation10 + $0x588] sm:$0xff] }
 0x2ba   :  { %v7414_v33 = vcombine.low %v2922_v10, %v2930_v52  ;;  %v7399_v37 = vcombine.high %v2906_v32, %v2914_v4  ;;  %v3074_v52 = vld [vmem:[#allocation10 + $0xb48] sm:$0xff] }
 0x2bb   :  { %v2698_v41 = vmul.f32 0.02, %v2605_v39  ;;  %v2705_v42 = vmax.f32 %v2603_v36, %v2697_v34  ;;  %v2641_v36 = vpop.f32.mrf.mxu0  ;;  %v2898_v34 = vld [vmem:[#allocation10 + $0x5c8] sm:$0xff] }
 0x2bc   :  { %v7382_v45 = vcombine.low %v2890_v38, %v2898_v34  ;;  %v2642_v57 = vadd.f32 %v2641_v36, %v1872_v46 }
 0x2bd   :  { %v2706_v44 = vmax.f32 %v2605_v39, %v2698_v41  ;;  %v8576_v49 = vpack.c.bf16 %v2705_v42, %v2701_v47  ;;  %v7398_v39 = vcombine.low %v2906_v32, %v2914_v4  ;;  %v2643_v40 = vpop.f32.mrf.mxu0  ;;  %v7383_v41 = vcombine.high %v2890_v38, %v2898_v34  ;;  %v2874_v42 = vld [vmem:[#allocation10 + $0x508] sm:$0xff] }
 0x2be   :  { %v3050_v38 = vld [vmem:[#allocation10 + $0xa88] sm:$0xff] }
 0x2bf   :  { %v8574_v48 = vpack.c.bf16 %v2706_v44, %v2702_v43  ;;  %v2882_v43 = vld [vmem:[#allocation10 + $0x548] sm:$0xff]  ;;  %v1876_v44 = vrot.slane %v8568_v20, %v8541_v35  ;;  %v2645_v47 = vpop.f32.mrf.mxu0 }
 0x2c0   :  { %v7366_v56 = vcombine.low %v2874_v42, %v2882_v43  ;;  %v2646_v60 = vadd.f32 %v2645_v47, %v1872_v46  ;;  %v3058_v34 = vld [vmem:[#allocation10 + $0xac8] sm:$0xff]  ;;  %v2779_v47 = vld [vmem:[#allocation10 + $0x210] sm:$0xff] }
 0x2c1   :  { %5901 = vmatprep.mubr.bf16.mxu0 %v8574_v48  ;;  %v3042_v46 = vld [vmem:[#allocation10 + $0xa48] sm:$0xff]  ;;  %v7542_v51 = vcombine.low %v3050_v38, %v3058_v34 }
 0x2c2   :  { %5902 = vmatmul.mubr.bf16.vlgmr.msra.gmra.mxu0 %v8576_v49 }
 0x2c3   :  { %5956 = vmatpush1.bf16.msra.mxu0 %v7318_v6  ;;  %5987 = vmatprep.mubr.bf16.mxu0 %v8574_v48  ;;  %v7239_v6 = vcombine.high %v2746_v62, %v2754_v1  ;;  %v2850_v62 = vld [vmem:[#allocation10 + $0x448] sm:$0xff] }
 0x2c4   :  { %5957 = vmatprep.subr.bf16.mxu0 %v7303_v50  ;;  %v7367_v50 = vcombine.high %v2874_v42, %v2882_v43  ;;  %v7543_v43 = vcombine.high %v3050_v38, %v3058_v34  ;;  %v3194_v34 = vld [vmem:[#allocation10 + $0xf08] sm:$0xff] }
 0x2c7   :  { %5958 = vmatpush1.bf16.msra.mxu0 %v7302_v54 }
 0x2c8   :  { %5959 = vmatprep.subr.bf16.mxu0 %v7287_v55  ;;  %v2644_v55 = vadd.f32 %v2643_v40, %v1876_v44  ;;  %v2803_v40 = vld [vmem:[#allocation10 + $0x2d0] sm:$0xff] }
 0x2cb   :  { %5960 = vmatpush1.bf16.msra.mxu0 %v7286_v29  ;;  %v2647_v29 = vpop.f32.mrf.mxu0 }
 0x2cc   :  { %5961 = vmatprep.subr.bf16.mxu0 %v7271_v58 }
 0x2cf   :  { %5962 = vmatpush1.bf16.msra.mxu0 %v7270_v61 }
 0x2d0   :  { %5963 = vmatprep.subr.bf16.mxu0 %v7255_v26  ;;  %v2842_v26 = vld [vmem:[#allocation10 + $0x408] sm:$0xff] }
 0x2d3   :  { %5964 = vmatpush1.bf16.msra.mxu0 %v7254_v2  ;;  %v2648_v2 = vadd.f32 %v2647_v29, %v1876_v44 }
 0x2d4   :  { %5965 = vmatprep.subr.bf16.mxu0 %v7239_v6 }
 0x2d7   :  { %5966 = vmatpush1.bf16.msra.mxu0 %v7238_v3  ;;  %v7335_v3 = vcombine.high %v2842_v26, %v2850_v62 }
 0x2d8   :  { %5967 = vmatprep.subr.bf16.mxu0 %v7223_v7 }
 0x2db   :  { %5968 = vmatpush1.bf16.msra.mxu0 %v7222_v11  ;;  %v2827_v11 = vld [vmem:[#allocation10 + $0x390] sm:$0xff] }
 0x2dc   :  { %5969 = vmatprep.subr.bf16.mxu0 %v7207_v16  ;;  %v2835_v16 = vld [vmem:[#allocation10 + $0x3d0] sm:$0xff] }
 0x2dd   :  { %v7321_v23 = vcombine.high %v2827_v11, %v2835_v16 }
 0x2df   :  { %5970 = vmatpush1.bf16.msra.mxu0 %v7206_v21  ;;  %v7334_v21 = vcombine.low %v2842_v26, %v2850_v62  ;;  %v2747_v26 = vld [vmem:[#allocation10 + $0x110] sm:$0xff] }
 0x2e0   :  { %5971 = vmatprep.subr.bf16.mxu0 %v7447_v22  ;;  %v2755_v62 = vld [vmem:[#allocation10 + $0x150] sm:$0xff] }
 0x2e3   :  { %5972 = vmatpush2.bf16.msra.mxu0 %v7446_v27 }
 0x2e4   :  { %5973 = vmatprep.subr.bf16.mxu0 %v7431_v12  ;;  %v3066_v12 = vld [vmem:[#allocation10 + $0xb08] sm:$0xff] }
 0x2e5   :  { %v7559_v36 = vcombine.high %v3066_v12, %v3074_v52 }
 0x2e7   :  { %5974 = vmatpush2.bf16.msra.mxu0 %v7430_v15  ;;  %v2811_v15 = vld [vmem:[#allocation10 + $0x310] sm:$0xff] }
 0x2e8   :  { %5975 = vmatprep.subr.bf16.mxu0 %v7415_v31  ;;  %v2819_v31 = vld [vmem:[#allocation10 + $0x350] sm:$0xff] }
 0x2e9   :  { %v7304_v42 = vcombine.low %v2811_v15, %v2819_v31 }
 0x2eb   :  { %5976 = vmatpush2.bf16.msra.mxu0 %v7414_v33  ;;  %v7320_v33 = vcombine.low %v2827_v11, %v2835_v16 }
 0x2ec   :  { %5977 = vmatprep.subr.bf16.mxu0 %v7399_v37  ;;  %v7305_v37 = vcombine.high %v2811_v15, %v2819_v31  ;;  %v2955_v15 = vld [vmem:[#allocation10 + $0x790] sm:$0xff] }
 0x2ed   :  { %v2963_v31 = vld [vmem:[#allocation10 + $0x7d0] sm:$0xff] }
 0x2ee   :  { %v7449_v38 = vcombine.high %v2955_v15, %v2963_v31 }
 0x2ef   :  { %5978 = vmatpush2.bf16.msra.mxu0 %v7398_v39  ;;  %v2795_v39 = vld [vmem:[#allocation10 + $0x290] sm:$0xff] }
 0x2f0   :  { %5979 = vmatprep.subr.bf16.mxu0 %v7383_v41  ;;  %v7558_v41 = vcombine.low %v3066_v12, %v3074_v52  ;;  %v7289_v44 = vcombine.high %v2795_v39, %v2803_v40  ;;  %v7288_v13 = vcombine.low %v2795_v39, %v2803_v40  ;;  %v3218_v52 = vld [vmem:[#allocation10 + $0xfc8] sm:$0xff]  ;;  %v2939_v40 = vld [vmem:[#allocation10 + $0x710] sm:$0xff] }
 0x2f1   :  { %v3202_v39 = vld [vmem:[#allocation10 + $0xf48] sm:$0xff] }
 0x2f2   :  { %v2684_v54 = vpop.f32.mrf.mxu1 }
 0x2f3   :  { %5980 = vmatpush2.bf16.msra.mxu0 %v7382_v45  ;;  %v2685_v1 = vadd.f32 %v2684_v54, %v2642_v57  ;;  %v3034_v45 = vld [vmem:[#allocation10 + $0xa08] sm:$0xff] }
 0x2f4   :  { %v2686_v58 = vpop.f32.mrf.mxu1  ;;  %5981 = vmatprep.subr.bf16.mxu0 %v7367_v50  ;;  %v2787_v50 = vld [vmem:[#allocation10 + $0x250] sm:$0xff]  ;;  %v7527_v14 = vcombine.high %v3034_v45, %v3042_v46  ;;  %v3026_v54 = vld [vmem:[#allocation10 + $0x9c8] sm:$0xff]  ;;  %v7526_v57 = vcombine.low %v3034_v45, %v3042_v46 }
 0x2f5   :  { %v2687_v61 = vadd.f32 %v2686_v58, %v2644_v55  ;;  %v2695_v18 = vmul.f32 0.02, %v2685_v1  ;;  %v2763_v55 = vld [vmem:[#allocation10 + $0x190] sm:$0xff]  ;;  %v7272_v29 = vcombine.low %v2779_v47, %v2787_v50  ;;  %v7511_v58 = vcombine.high %v3018_v53, %v3026_v54  ;;  %v3178_v46 = vld [vmem:[#allocation10 + $0xe88] sm:$0xff] }
 0x2f6   :  { %v2688_v20 = vpop.f32.mrf.mxu1 }
 0x2f7   :  { %v2689_v6 = vadd.f32 %v2688_v20, %v2646_v60  ;;  %5982 = vmatpush2.bf16.msra.mxu0 %v7366_v56  ;;  %v2696_v7 = vmul.f32 0.02, %v2687_v61  ;;  %v2703_v10 = vmax.f32 %v2685_v1, %v2695_v18  ;;  %v2771_v56 = vld [vmem:[#allocation10 + $0x1d0] sm:$0xff]  ;;  %v3002_v60 = vld [vmem:[#allocation10 + $0x908] sm:$0xff]  ;;  %v7510_v1 = vcombine.low %v3018_v53, %v3026_v54 }
 0x2f8   :  { %v2690_v0 = vpop.f32.mrf.mxu1  ;;  %5983 = vmatprep.subr.bf16.mxu0 %v7351_v59  ;;  %v7257_v59 = vcombine.high %v2763_v55, %v2771_v56  ;;  %v7256_v20 = vcombine.low %v2763_v55, %v2771_v56  ;;  %v2970_v18 = vld [vmem:[#allocation10 + $0x808] sm:$0xff]  ;;  %v2907_v56 = vld [vmem:[#allocation10 + $0x610] sm:$0xff] }
 0x2f9   :  { %v2699_v8 = vmul.f32 0.02, %v2689_v6  ;;  %v2691_v9 = vadd.f32 %v2690_v0, %v2648_v2  ;;  %v2704_v24 = vmax.f32 %v2687_v61, %v2696_v7  ;;  %v3010_v61 = vld [vmem:[#allocation10 + $0x948] sm:$0xff]  ;;  %v2739_v7 = vld [vmem:[#allocation10 + $0xd0] sm:$0xff] }
 0x2fa   :  { %v7495_v2 = vcombine.high %v3002_v60, %v3010_v61  ;;  %v2994_v0 = vld [vmem:[#allocation10 + $0x8c8] sm:$0xff] }
 0x2fb   :  { %v2700_v19 = vmul.f32 0.02, %v2691_v9  ;;  %5984 = vmatpush2.bf16.msra.mxu0 %v7350_v63  ;;  %v2707_v22 = vmax.f32 %v2689_v6, %v2699_v8  ;;  %v7241_v6 = vcombine.high %v2747_v26, %v2755_v62  ;;  %v2986_v63 = vld [vmem:[#allocation10 + $0x888] sm:$0xff]  ;;  %v7494_v8 = vcombine.low %v3002_v60, %v3010_v61 }
 0x2fc   :  { %5985 = vmatprep.subr.bf16.mxu0 %v7335_v3  ;;  %v2731_v3 = vld [vmem:[#allocation10 + $0x90] sm:$0xff]  ;;  %v7479_v11 = vcombine.high %v2986_v63, %v2994_v0  ;;  %v3162_v54 = vld [vmem:[#allocation10 + $0xe08] sm:$0xff] }
 0x2fd   :  { %v2708_v27 = vmax.f32 %v2691_v9, %v2700_v19  ;;  %v8590_v4 = vpack.c.bf16 %v2707_v22, %v2703_v10  ;;  %v7240_v9 = vcombine.low %v2747_v26, %v2755_v62  ;;  %v7225_v16 = vcombine.high %v2731_v3, %v2739_v7  ;;  %v2978_v19 = vld [vmem:[#allocation10 + $0x848] sm:$0xff]  ;;  %v2723_v22 = vld [vmem:[#allocation10 + $0x50] sm:$0xff] }
 0x2fe   :  { %v3210_v10 = vld [vmem:[#allocation10 + $0xf88] sm:$0xff]  ;;  %v2891_v62 = vld [vmem:[#allocation10 + $0x590] sm:$0xff] }
 0x2ff   :  { %v8588_v32 = vpack.c.bf16 %v2708_v27, %v2704_v24  ;;  %5986 = vmatpush2.bf16.msra.mxu0 %v7334_v21  ;;  %v2715_v21 = vld [vmem:[#allocation10 + $0x10] sm:$0xff]  ;;  %v7224_v24 = vcombine.low %v2731_v3, %v2739_v7  ;;  %v7463_v27 = vcombine.high %v2970_v18, %v2978_v19  ;;  %v3170_v55 = vld [vmem:[#allocation10 + $0xe48] sm:$0xff] }
 0x300   :  { %6041 = vmatprep.subr.bf16.mxu0 %v7321_v23  ;;  %v7478_v23 = vcombine.low %v2986_v63, %v2994_v0  ;;  %v7209_v12 = vcombine.high %v2715_v21, %v2723_v22  ;;  %v3146_v61 = vld [vmem:[#allocation10 + $0xd88] sm:$0xff]  ;;  %v2875_v7 = vld [vmem:[#allocation10 + $0x510] sm:$0xff] }
 0x301   :  { %5944 = vmatprep.mubr.bf16.mxu1 %v8588_v32  ;;  %v3154_v26 = vld [vmem:[#allocation10 + $0xdc8] sm:$0xff] }
 0x302   :  { %5945 = vmatmul.mubr.bf16.vlgmr.msra.gmra.mxu1 %v8590_v4  ;;  %5988 = vmatmul.mubr.bf16.vlgmr.msra.gmra.mxu0 %v8576_v49  ;;  %v3130_v0 = vld [vmem:[#allocation10 + $0xd08] sm:$0xff] }
 0x303   :  { %5999 = vmatpush1.bf16.msra.mxu1 %v7574_v17  ;;  %6030 = vmatprep.mubr.bf16.mxu1 %v8588_v32  ;;  %v7273_v17 = vcombine.high %v2779_v47, %v2787_v50  ;;  %v3186_v47 = vld [vmem:[#allocation10 + $0xec8] sm:$0xff]  ;;  %v2923_v50 = vld [vmem:[#allocation10 + $0x690] sm:$0xff] }
 0x304   :  { %6042 = vmatpush1.bf16.msra.mxu0 %v7320_v33  ;;  %6073 = vmatprep.mubr.bf16.mxu0 %v8574_v48  ;;  %v7462_v33 = vcombine.low %v2970_v18, %v2978_v19  ;;  %v3138_v3 = vld [vmem:[#allocation10 + $0xd48] sm:$0xff] }
 0x305   :  { %6000 = vmatprep.subr.bf16.mxu1 %v7559_v36  ;;  %6043 = vmatprep.subr.bf16.mxu0 %v7305_v37  ;;  %v7208_v36 = vcombine.low %v2715_v21, %v2723_v22  ;;  %v7703_v37 = vcombine.high %v3210_v10, %v3218_v52  ;;  %v3114_v19 = vld [vmem:[#allocation10 + $0xc88] sm:$0xff]  ;;  %v2859_v22 = vld [vmem:[#allocation10 + $0x490] sm:$0xff] }
 0x306   :  { %v3122_v21 = vld [vmem:[#allocation10 + $0xcc8] sm:$0xff] }
 0x307   :  { %6001 = vmatpush1.bf16.msra.mxu1 %v7558_v41  ;;  %v2947_v41 = vld [vmem:[#allocation10 + $0x750] sm:$0xff] }
 0x308   :  { %6044 = vmatpush1.bf16.msra.mxu0 %v7304_v42  ;;  %6002 = vmatprep.subr.bf16.mxu1 %v7543_v43  ;;  %v7702_v42 = vcombine.low %v3210_v10, %v3218_v52  ;;  %v7448_v43 = vcombine.low %v2955_v15, %v2963_v31  ;;  %v7433_v45 = vcombine.high %v2939_v40, %v2947_v41  ;;  %v3098_v52 = vld [vmem:[#allocation10 + $0xc08] sm:$0xff]  ;;  %v2843_v31 = vld [vmem:[#allocation10 + $0x410] sm:$0xff] }
 0x309   :  { %6045 = vmatprep.subr.bf16.mxu0 %v7289_v44  ;;  %v7687_v44 = vcombine.high %v3194_v34, %v3202_v39  ;;  %v3106_v15 = vld [vmem:[#allocation10 + $0xc48] sm:$0xff] }
 0x30b   :  { %6003 = vmatpush1.bf16.msra.mxu1 %v7542_v51  ;;  %v2931_v51 = vld [vmem:[#allocation10 + $0x6d0] sm:$0xff] }
 0x30c   :  { %6046 = vmatpush1.bf16.msra.mxu0 %v7288_v13  ;;  %6004 = vmatprep.subr.bf16.mxu1 %v7527_v14  ;;  %v7686_v13 = vcombine.low %v3194_v34, %v3202_v39  ;;  %v7432_v14 = vcombine.low %v2939_v40, %v2947_v41  ;;  %v7417_v53 = vcombine.high %v2923_v50, %v2931_v51  ;;  %v3083_v39 = vld [vmem:[#allocation10 + $0xb90] sm:$0xff]  ;;  %v2828_v41 = vld [vmem:[#allocation10 + $0x398] sm:$0xff] }
 0x30d   :  { %6047 = vmatprep.subr.bf16.mxu0 %v7273_v17  ;;  %v7671_v17 = vcombine.high %v3178_v46, %v3186_v47  ;;  %v3091_v40 = vld [vmem:[#allocation10 + $0xbd0] sm:$0xff] }
 0x30f   :  { %6005 = vmatpush1.bf16.msra.mxu1 %v7526_v57  ;;  %v2915_v57 = vld [vmem:[#allocation10 + $0x650] sm:$0xff] }
 0x310   :  { %6048 = vmatpush1.bf16.msra.mxu0 %v7272_v29  ;;  %6006 = vmatprep.subr.bf16.mxu1 %v7511_v58  ;;  %v7670_v29 = vcombine.low %v3178_v46, %v3186_v47  ;;  %v7416_v58 = vcombine.low %v2923_v50, %v2931_v51  ;;  %v7401_v60 = vcombine.high %v2907_v56, %v2915_v57  ;;  %v3067_v47 = vld [vmem:[#allocation10 + $0xb10] sm:$0xff] }
 0x311   :  { %6049 = vmatprep.subr.bf16.mxu0 %v7257_v59  ;;  %v7655_v59 = vcombine.high %v3162_v54, %v3170_v55  ;;  %v3075_v50 = vld [vmem:[#allocation10 + $0xb50] sm:$0xff]  ;;  %v7576_v51 = vcombine.low %v3083_v39, %v3091_v40 }
 0x313   :  { %6007 = vmatpush1.bf16.msra.mxu1 %v7510_v1  ;;  %v2899_v1 = vld [vmem:[#allocation10 + $0x5d0] sm:$0xff] }
 0x314   :  { %6050 = vmatpush1.bf16.msra.mxu0 %v7256_v20  ;;  %6008 = vmatprep.subr.bf16.mxu1 %v7495_v2  ;;  %v7654_v20 = vcombine.low %v3162_v54, %v3170_v55  ;;  %v7400_v2 = vcombine.low %v2907_v56, %v2915_v57  ;;  %v7385_v63 = vcombine.high %v2891_v62, %v2899_v1  ;;  %v3051_v54 = vld [vmem:[#allocation10 + $0xa90] sm:$0xff]  ;;  %v2796_v57 = vld [vmem:[#allocation10 + $0x298] sm:$0xff] }
 0x315   :  { %6051 = vmatprep.subr.bf16.mxu0 %v7241_v6  ;;  %v7639_v6 = vcombine.high %v3146_v61, %v3154_v26  ;;  %v3059_v55 = vld [vmem:[#allocation10 + $0xad0] sm:$0xff] }
 0x317   :  { %6009 = vmatpush1.bf16.msra.mxu1 %v7494_v8  ;;  %v2883_v8 = vld [vmem:[#allocation10 + $0x550] sm:$0xff] }
 0x318   :  { %6052 = vmatpush1.bf16.msra.mxu0 %v7240_v9  ;;  %6010 = vmatprep.subr.bf16.mxu1 %v7479_v11  ;;  %v7638_v9 = vcombine.low %v3146_v61, %v3154_v26  ;;  %v7384_v11 = vcombine.low %v2891_v62, %v2899_v1  ;;  %v7369_v18 = vcombine.high %v2875_v7, %v2883_v8  ;;  %v3035_v26 = vld [vmem:[#allocation10 + $0xa10] sm:$0xff]  ;;  %v2780_v1 = vld [vmem:[#allocation10 + $0x218] sm:$0xff] }
 0x319   :  { %6053 = vmatprep.subr.bf16.mxu0 %v7225_v16  ;;  %v7623_v16 = vcombine.high %v3130_v0, %v3138_v3  ;;  %v3043_v62 = vld [vmem:[#allocation10 + $0xa50] sm:$0xff] }
 0x31b   :  { %6011 = vmatpush1.bf16.msra.mxu1 %v7478_v23  ;;  %v2867_v23 = vld [vmem:[#allocation10 + $0x4d0] sm:$0xff] }
 0x31c   :  { %6054 = vmatpush1.bf16.msra.mxu0 %v7224_v24  ;;  %6012 = vmatprep.subr.bf16.mxu1 %v7463_v27  ;;  %v7622_v24 = vcombine.low %v3130_v0, %v3138_v3  ;;  %v7368_v27 = vcombine.low %v2875_v7, %v2883_v8  ;;  %v7353_v10 = vcombine.high %v2859_v22, %v2867_v23  ;;  %v3019_v3 = vld [vmem:[#allocation10 + $0x990] sm:$0xff]  ;;  %v2764_v8 = vld [vmem:[#allocation10 + $0x198] sm:$0xff] }
 0x31d   :  { %6055 = vmatprep.subr.bf16.mxu0 %v7209_v12  ;;  %v7607_v12 = vcombine.high %v3114_v19, %v3122_v21  ;;  %v3027_v7 = vld [vmem:[#allocation10 + $0x9d0] sm:$0xff] }
 0x31f   :  { %6013 = vmatpush1.bf16.msra.mxu1 %v7462_v33  ;;  %v2851_v33 = vld [vmem:[#allocation10 + $0x450] sm:$0xff] }
 0x320   :  { %6056 = vmatpush1.bf16.msra.mxu0 %v7208_v36  ;;  %6014 = vmatprep.subr.bf16.mxu1 %v7703_v37  ;;  %v7606_v36 = vcombine.low %v3114_v19, %v3122_v21  ;;  %v7352_v37 = vcombine.low %v2859_v22, %v2867_v23  ;;  %v7337_v34 = vcombine.high %v2843_v31, %v2851_v33  ;;  %v3003_v21 = vld [vmem:[#allocation10 + $0x910] sm:$0xff]  ;;  %v2748_v23 = vld [vmem:[#allocation10 + $0x118] sm:$0xff] }
 0x321   :  { %6057 = vmatprep.subr.bf16.mxu0 %v7449_v38  ;;  %v7591_v38 = vcombine.high %v3098_v52, %v3106_v15  ;;  %v3011_v22 = vld [vmem:[#allocation10 + $0x950] sm:$0xff] }
 0x323   :  { %6015 = vmatpush2.bf16.msra.mxu1 %v7702_v42  ;;  %v2836_v42 = vld [vmem:[#allocation10 + $0x3d8] sm:$0xff] }
 0x324   :  { %6058 = vmatpush2.bf16.msra.mxu0 %v7448_v43  ;;  %6016 = vmatprep.subr.bf16.mxu1 %v7687_v44  ;;  %v7590_v43 = vcombine.low %v3098_v52, %v3106_v15  ;;  %v7336_v44 = vcombine.low %v2843_v31, %v2851_v33  ;;  %v7323_v46 = vcombine.high %v2828_v41, %v2836_v42  ;;  %v2987_v15 = vld [vmem:[#allocation10 + $0x890] sm:$0xff]  ;;  %v2732_v33 = vld [vmem:[#allocation10 + $0x98] sm:$0xff] }
 0x325   :  { %6059 = vmatprep.subr.bf16.mxu0 %v7433_v45  ;;  %v7577_v45 = vcombine.high %v3083_v39, %v3091_v40  ;;  %v2995_v31 = vld [vmem:[#allocation10 + $0x8d0] sm:$0xff] }
 0x326   :  { %v2971_v40 = vld [vmem:[#allocation10 + $0x810] sm:$0xff] }
 0x327   :  { %6017 = vmatpush2.bf16.msra.mxu1 %v7686_v13  ;;  %v2812_v13 = vld [vmem:[#allocation10 + $0x318] sm:$0xff] }
 0x328   :  { %6060 = vmatpush2.bf16.msra.mxu0 %v7432_v14  ;;  %6018 = vmatprep.subr.bf16.mxu1 %v7671_v17  ;;  %v2820_v14 = vld [vmem:[#allocation10 + $0x358] sm:$0xff]  ;;  %v7322_v17 = vcombine.low %v2828_v41, %v2836_v42  ;;  %v2979_v41 = vld [vmem:[#allocation10 + $0x850] sm:$0xff] }
 0x329   :  { %6061 = vmatprep.subr.bf16.mxu0 %v7417_v53  ;;  %v7561_v53 = vcombine.high %v3067_v47, %v3075_v50  ;;  %v7307_v56 = vcombine.high %v2812_v13, %v2820_v14  ;;  %v2716_v42 = vld [vmem:[#allocation10 + $0x18] sm:$0xff] }
 0x32b   :  { %6019 = vmatpush2.bf16.msra.mxu1 %v7670_v29  ;;  %v2804_v29 = vld [vmem:[#allocation10 + $0x2d8] sm:$0xff] }
 0x32c   :  { %6062 = vmatpush2.bf16.msra.mxu0 %v7416_v58  ;;  %6020 = vmatprep.subr.bf16.mxu1 %v7655_v59  ;;  %v7560_v58 = vcombine.low %v3067_v47, %v3075_v50  ;;  %v7306_v59 = vcombine.low %v2812_v13, %v2820_v14  ;;  %v7291_v61 = vcombine.high %v2796_v57, %v2804_v29  ;;  %v3211_v50 = vld [vmem:[#allocation10 + $0xf90] sm:$0xff]  ;;  %v2956_v13 = vld [vmem:[#allocation10 + $0x798] sm:$0xff] }
 0x32d   :  { %6063 = vmatprep.subr.bf16.mxu0 %v7401_v60  ;;  %v7545_v60 = vcombine.high %v3051_v54, %v3059_v55  ;;  %v2964_v14 = vld [vmem:[#allocation10 + $0x7d8] sm:$0xff] }
 0x32f   :  { %6021 = vmatpush2.bf16.msra.mxu1 %v7654_v20  ;;  %v2788_v20 = vld [vmem:[#allocation10 + $0x258] sm:$0xff] }
 0x330   :  { %6064 = vmatpush2.bf16.msra.mxu0 %v7400_v2  ;;  %6022 = vmatprep.subr.bf16.mxu1 %v7639_v6  ;;  %v7544_v2 = vcombine.low %v3051_v54, %v3059_v55  ;;  %v7290_v6 = vcombine.low %v2796_v57, %v2804_v29  ;;  %v7275_v0 = vcombine.high %v2780_v1, %v2788_v20  ;;  %v3203_v57 = vld [vmem:[#allocation10 + $0xf50] sm:$0xff]  ;;  %v2940_v29 = vld [vmem:[#allocation10 + $0x718] sm:$0xff] }
 0x331   :  { %6065 = vmatprep.subr.bf16.mxu0 %v7385_v63  ;;  %v7529_v63 = vcombine.high %v3035_v26, %v3043_v62  ;;  %v7451_v55 = vcombine.high %v2956_v13, %v2964_v14 }
 0x333   :  { %6023 = vmatpush2.bf16.msra.mxu1 %v7638_v9  ;;  %v2772_v9 = vld [vmem:[#allocation10 + $0x1d8] sm:$0xff] }
 0x334   :  { %6066 = vmatpush2.bf16.msra.mxu0 %v7384_v11  ;;  %6024 = vmatprep.subr.bf16.mxu1 %v7623_v16  ;;  %v7528_v11 = vcombine.low %v3035_v26, %v3043_v62  ;;  %v7274_v16 = vcombine.low %v2780_v1, %v2788_v20  ;;  %v7259_v19 = vcombine.high %v2764_v8, %v2772_v9  ;;  %v3179_v62 = vld [vmem:[#allocation10 + $0xe90] sm:$0xff]  ;;  %v2924_v20 = vld [vmem:[#allocation10 + $0x698] sm:$0xff] }
 0x335   :  { %6067 = vmatprep.subr.bf16.mxu0 %v7369_v18  ;;  %v7513_v18 = vcombine.high %v3019_v3, %v3027_v7  ;;  %v3187_v1 = vld [vmem:[#allocation10 + $0xed0] sm:$0xff] }
 0x337   :  { %6025 = vmatpush2.bf16.msra.mxu1 %v7622_v24  ;;  %v2756_v24 = vld [vmem:[#allocation10 + $0x158] sm:$0xff] }
 0x338   :  { %6068 = vmatpush2.bf16.msra.mxu0 %v7368_v27  ;;  %6026 = vmatprep.subr.bf16.mxu1 %v7607_v12  ;;  %v7512_v27 = vcombine.low %v3019_v3, %v3027_v7  ;;  %v7258_v12 = vcombine.low %v2764_v8, %v2772_v9  ;;  %v7243_v52 = vcombine.high %v2748_v23, %v2756_v24  ;;  %v3163_v7 = vld [vmem:[#allocation10 + $0xe10] sm:$0xff]  ;;  %v2908_v9 = vld [vmem:[#allocation10 + $0x618] sm:$0xff] }
 0x339   :  { %6069 = vmatprep.subr.bf16.mxu0 %v7353_v10  ;;  %v7497_v10 = vcombine.high %v3003_v21, %v3011_v22  ;;  %v3171_v8 = vld [vmem:[#allocation10 + $0xe50] sm:$0xff] }
 0x33b   :  { %6027 = vmatpush2.bf16.msra.mxu1 %v7606_v36  ;;  %v2740_v36 = vld [vmem:[#allocation10 + $0xd8] sm:$0xff] }
 0x33c   :  { %6070 = vmatpush2.bf16.msra.mxu0 %v7352_v37  ;;  %6028 = vmatprep.subr.bf16.mxu1 %v7591_v38  ;;  %v7496_v37 = vcombine.low %v3003_v21, %v3011_v22  ;;  %v7242_v38 = vcombine.low %v2748_v23, %v2756_v24  ;;  %v7227_v39 = vcombine.high %v2732_v33, %v2740_v36  ;;  %v3147_v22 = vld [vmem:[#allocation10 + $0xd90] sm:$0xff]  ;;  %v2892_v24 = vld [vmem:[#allocation10 + $0x598] sm:$0xff] }
 0x33d   :  { %6071 = vmatprep.subr.bf16.mxu0 %v7337_v34  ;;  %v7481_v34 = vcombine.high %v2987_v15, %v2995_v31  ;;  %v3155_v23 = vld [vmem:[#allocation10 + $0xdd0] sm:$0xff] }
 0x33f   :  { %6029 = vmatpush2.bf16.msra.mxu1 %v7590_v43  ;;  %v2724_v43 = vld [vmem:[#allocation10 + $0x58] sm:$0xff] }
 0x340   :  { %6072 = vmatpush2.bf16.msra.mxu0 %v7336_v44  ;;  %6084 = vmatprep.subr.bf16.mxu1 %v7577_v45  ;;  %v7480_v44 = vcombine.low %v2987_v15, %v2995_v31  ;;  %v7226_v45 = vcombine.low %v2732_v33, %v2740_v36  ;;  %v7211_v47 = vcombine.high %v2716_v42, %v2724_v43  ;;  %v3131_v31 = vld [vmem:[#allocation10 + $0xd10] sm:$0xff]  ;;  %v2876_v36 = vld [vmem:[#allocation10 + $0x518] sm:$0xff] }
 0x341   :  { %6127 = vmatprep.subr.bf16.mxu0 %v7323_v46  ;;  %v7465_v46 = vcombine.high %v2971_v40, %v2979_v41  ;;  %v3139_v33 = vld [vmem:[#allocation10 + $0xd50] sm:$0xff] }
 0x342   :  { %6031 = vmatmul.mubr.bf16.vlgmr.msra.gmra.mxu1 %v8590_v4 }
 0x343   :  { %6074 = vmatmul.mubr.bf16.vlgmr.msra.gmra.mxu0 %v8576_v49  ;;  %6085 = vmatpush1.bf16.msra.mxu1 %v7576_v51  ;;  %v3219_v51 = vld [vmem:[#allocation10 + $0xfd0] sm:$0xff] }
 0x344   :  { %6116 = vmatprep.mubr.bf16.mxu1 %v8588_v32  ;;  %6128 = vmatpush1.bf16.msra.mxu0 %v7322_v17  ;;  %v7464_v17 = vcombine.low %v2971_v40, %v2979_v41  ;;  %v7705_v54 = vcombine.high %v3211_v50, %v3219_v51  ;;  %v3115_v41 = vld [vmem:[#allocation10 + $0xc90] sm:$0xff] }
 0x345   :  { %6159 = vmatprep.mubr.bf16.mxu0 %v8574_v48  ;;  %6086 = vmatprep.subr.bf16.mxu1 %v7561_v53  ;;  %v7210_v53 = vcombine.low %v2716_v42, %v2724_v43  ;;  %v3123_v42 = vld [vmem:[#allocation10 + $0xcd0] sm:$0xff]  ;;  %v2860_v43 = vld [vmem:[#allocation10 + $0x498] sm:$0xff] }
 0x346   :  { %6129 = vmatprep.subr.bf16.mxu0 %v7307_v56  ;;  %v3195_v56 = vld [vmem:[#allocation10 + $0xf10] sm:$0xff] }
 0x347   :  { %6087 = vmatpush1.bf16.msra.mxu1 %v7560_v58  ;;  %v2948_v58 = vld [vmem:[#allocation10 + $0x758] sm:$0xff] }
 0x348   :  { %6130 = vmatpush1.bf16.msra.mxu0 %v7306_v59  ;;  %6088 = vmatprep.subr.bf16.mxu1 %v7545_v60  ;;  %v7704_v59 = vcombine.low %v3211_v50, %v3219_v51  ;;  %v7450_v60 = vcombine.low %v2956_v13, %v2964_v14  ;;  %v7435_v26 = vcombine.high %v2940_v29, %v2948_v58  ;;  %v3099_v51 = vld [vmem:[#allocation10 + $0xc10] sm:$0xff]  ;;  %v2844_v14 = vld [vmem:[#allocation10 + $0x418] sm:$0xff] }
 0x349   :  { %6131 = vmatprep.subr.bf16.mxu0 %v7291_v61  ;;  %v7689_v61 = vcombine.high %v3195_v56, %v3203_v57  ;;  %v3107_v13 = vld [vmem:[#allocation10 + $0xc50] sm:$0xff] }
 0x34b   :  { %6089 = vmatpush1.bf16.msra.mxu1 %v7544_v2  ;;  %v2932_v2 = vld [vmem:[#allocation10 + $0x6d8] sm:$0xff] }
 0x34c   :  { %6132 = vmatpush1.bf16.msra.mxu0 %v7290_v6  ;;  %6090 = vmatprep.subr.bf16.mxu1 %v7529_v63  ;;  %v7688_v6 = vcombine.low %v3195_v56, %v3203_v57  ;;  %v7434_v63 = vcombine.low %v2940_v29, %v2948_v58  ;;  %v7419_v3 = vcombine.high %v2924_v20, %v2932_v2  ;;  %v3084_v57 = vld [vmem:[#allocation10 + $0xb98] sm:$0xff]  ;;  %v2829_v58 = vld [vmem:[#allocation10 + $0x3a0] sm:$0xff] }
 0x34d   :  { %6133 = vmatprep.subr.bf16.mxu0 %v7275_v0  ;;  %v7673_v0 = vcombine.high %v3179_v62, %v3187_v1  ;;  %v3092_v29 = vld [vmem:[#allocation10 + $0xbd8] sm:$0xff] }
 0x34f   :  { %6091 = vmatpush1.bf16.msra.mxu1 %v7528_v11  ;;  %v2916_v11 = vld [vmem:[#allocation10 + $0x658] sm:$0xff] }
 0x350   :  { %6134 = vmatpush1.bf16.msra.mxu0 %v7274_v16  ;;  %6092 = vmatprep.subr.bf16.mxu1 %v7513_v18  ;;  %v7672_v16 = vcombine.low %v3179_v62, %v3187_v1  ;;  %v7418_v18 = vcombine.low %v2924_v20, %v2932_v2  ;;  %v7403_v21 = vcombine.high %v2908_v9, %v2916_v11  ;;  %v3068_v1 = vld [vmem:[#allocation10 + $0xb18] sm:$0xff] }
 0x351   :  { %6135 = vmatprep.subr.bf16.mxu0 %v7259_v19  ;;  %v7657_v19 = vcombine.high %v3163_v7, %v3171_v8  ;;  %v3076_v20 = vld [vmem:[#allocation10 + $0xb58] sm:$0xff]  ;;  %v7578_v2 = vcombine.low %v3084_v57, %v3092_v29 }
 0x353   :  { %6093 = vmatpush1.bf16.msra.mxu1 %v7512_v27  ;;  %v2900_v27 = vld [vmem:[#allocation10 + $0x5d8] sm:$0xff] }
 0x354   :  { %6136 = vmatpush1.bf16.msra.mxu0 %v7258_v12  ;;  %6094 = vmatprep.subr.bf16.mxu1 %v7497_v10  ;;  %v7656_v12 = vcombine.low %v3163_v7, %v3171_v8  ;;  %v7402_v10 = vcombine.low %v2908_v9, %v2916_v11  ;;  %v7387_v15 = vcombine.high %v2892_v24, %v2900_v27  ;;  %v3052_v7 = vld [vmem:[#allocation10 + $0xa98] sm:$0xff]  ;;  %v2797_v11 = vld [vmem:[#allocation10 + $0x2a0] sm:$0xff] }
 0x355   :  { %6137 = vmatprep.subr.bf16.mxu0 %v7243_v52  ;;  %v7641_v52 = vcombine.high %v3147_v22, %v3155_v23  ;;  %v3060_v8 = vld [vmem:[#allocation10 + $0xad8] sm:$0xff] }
 0x357   :  { %6095 = vmatpush1.bf16.msra.mxu1 %v7496_v37  ;;  %v2884_v37 = vld [vmem:[#allocation10 + $0x558] sm:$0xff] }
 0x358   :  { %6138 = vmatpush1.bf16.msra.mxu0 %v7242_v38  ;;  %6096 = vmatprep.subr.bf16.mxu1 %v7481_v34  ;;  %v7640_v38 = vcombine.low %v3147_v22, %v3155_v23  ;;  %v7386_v34 = vcombine.low %v2892_v24, %v2900_v27  ;;  %v7371_v40 = vcombine.high %v2876_v36, %v2884_v37  ;;  %v3036_v23 = vld [vmem:[#allocation10 + $0xa18] sm:$0xff]  ;;  %v2781_v27 = vld [vmem:[#allocation10 + $0x220] sm:$0xff] }
 0x359   :  { %6139 = vmatprep.subr.bf16.mxu0 %v7227_v39  ;;  %v7625_v39 = vcombine.high %v3131_v31, %v3139_v33  ;;  %v3044_v24 = vld [vmem:[#allocation10 + $0xa58] sm:$0xff] }
 0x35b   :  { %6097 = vmatpush1.bf16.msra.mxu1 %v7480_v44  ;;  %v2868_v44 = vld [vmem:[#allocation10 + $0x4d8] sm:$0xff] }
 0x35c   :  { %6140 = vmatpush1.bf16.msra.mxu0 %v7226_v45  ;;  %6098 = vmatprep.subr.bf16.mxu1 %v7465_v46  ;;  %v7624_v45 = vcombine.low %v3131_v31, %v3139_v33  ;;  %v7370_v46 = vcombine.low %v2876_v36, %v2884_v37  ;;  %v7355_v50 = vcombine.high %v2860_v43, %v2868_v44  ;;  %v3020_v33 = vld [vmem:[#allocation10 + $0x998] sm:$0xff]  ;;  %v2765_v37 = vld [vmem:[#allocation10 + $0x1a0] sm:$0xff] }
 0x35d   :  { %6141 = vmatprep.subr.bf16.mxu0 %v7211_v47  ;;  %v7609_v47 = vcombine.high %v3115_v41, %v3123_v42  ;;  %v3028_v36 = vld [vmem:[#allocation10 + $0x9d8] sm:$0xff] }
 0x35f   :  { %6099 = vmatpush1.bf16.msra.mxu1 %v7464_v17  ;;  %v2852_v17 = vld [vmem:[#allocation10 + $0x458] sm:$0xff] }
 0x360   :  { %6142 = vmatpush1.bf16.msra.mxu0 %v7210_v53  ;;  %6100 = vmatprep.subr.bf16.mxu1 %v7705_v54  ;;  %v7608_v53 = vcombine.low %v3115_v41, %v3123_v42  ;;  %v7354_v54 = vcombine.low %v2860_v43, %v2868_v44  ;;  %v7339_v56 = vcombine.high %v2844_v14, %v2852_v17  ;;  %v3004_v42 = vld [vmem:[#allocation10 + $0x918] sm:$0xff]  ;;  %v2749_v44 = vld [vmem:[#allocation10 + $0x120] sm:$0xff] }
 0x361   :  { %6143 = vmatprep.subr.bf16.mxu0 %v7451_v55  ;;  %v7593_v55 = vcombine.high %v3099_v51, %v3107_v13  ;;  %v3012_v43 = vld [vmem:[#allocation10 + $0x958] sm:$0xff] }
 0x363   :  { %6101 = vmatpush2.bf16.msra.mxu1 %v7704_v59  ;;  %v2837_v59 = vld [vmem:[#allocation10 + $0x3e0] sm:$0xff] }
 0x364   :  { %6144 = vmatpush2.bf16.msra.mxu0 %v7450_v60  ;;  %6102 = vmatprep.subr.bf16.mxu1 %v7689_v61  ;;  %v7592_v60 = vcombine.low %v3099_v51, %v3107_v13  ;;  %v7338_v61 = vcombine.low %v2844_v14, %v2852_v17  ;;  %v7325_v62 = vcombine.high %v2829_v58, %v2837_v59  ;;  %v2988_v13 = vld [vmem:[#allocation10 + $0x898] sm:$0xff]  ;;  %v2733_v17 = vld [vmem:[#allocation10 + $0xa0] sm:$0xff] }
 0x365   :  { %6145 = vmatprep.subr.bf16.mxu0 %v7435_v26  ;;  %v7579_v26 = vcombine.high %v3084_v57, %v3092_v29  ;;  %v2996_v14 = vld [vmem:[#allocation10 + $0x8d8] sm:$0xff] }
 0x366   :  { %v2972_v29 = vld [vmem:[#allocation10 + $0x818] sm:$0xff] }
 0x367   :  { %6103 = vmatpush2.bf16.msra.mxu1 %v7688_v6  ;;  %v2813_v6 = vld [vmem:[#allocation10 + $0x320] sm:$0xff] }
 0x368   :  { %6146 = vmatpush2.bf16.msra.mxu0 %v7434_v63  ;;  %6104 = vmatprep.subr.bf16.mxu1 %v7673_v0  ;;  %v2821_v63 = vld [vmem:[#allocation10 + $0x360] sm:$0xff]  ;;  %v7324_v0 = vcombine.low %v2829_v58, %v2837_v59  ;;  %v2980_v58 = vld [vmem:[#allocation10 + $0x858] sm:$0xff] }
 0x369   :  { %6147 = vmatprep.subr.bf16.mxu0 %v7419_v3  ;;  %v7563_v3 = vcombine.high %v3068_v1, %v3076_v20  ;;  %v7309_v9 = vcombine.high %v2813_v6, %v2821_v63  ;;  %v2717_v59 = vld [vmem:[#allocation10 + $0x20] sm:$0xff] }
 0x36b   :  { %6105 = vmatpush2.bf16.msra.mxu1 %v7672_v16  ;;  %v2805_v16 = vld [vmem:[#allocation10 + $0x2e0] sm:$0xff] }
 0x36c   :  { %6148 = vmatpush2.bf16.msra.mxu0 %v7418_v18  ;;  %6106 = vmatprep.subr.bf16.mxu1 %v7657_v19  ;;  %v7562_v18 = vcombine.low %v3068_v1, %v3076_v20  ;;  %v7308_v19 = vcombine.low %v2813_v6, %v2821_v63  ;;  %v7293_v22 = vcombine.high %v2797_v11, %v2805_v16  ;;  %v3212_v20 = vld [vmem:[#allocation10 + $0xf98] sm:$0xff]  ;;  %v2957_v6 = vld [vmem:[#allocation10 + $0x7a0] sm:$0xff] }
 0x36d   :  { %6149 = vmatprep.subr.bf16.mxu0 %v7403_v21  ;;  %v7547_v21 = vcombine.high %v3052_v7, %v3060_v8  ;;  %v2965_v63 = vld [vmem:[#allocation10 + $0x7e0] sm:$0xff] }
 0x36f   :  { %6107 = vmatpush2.bf16.msra.mxu1 %v7656_v12  ;;  %v2789_v12 = vld [vmem:[#allocation10 + $0x260] sm:$0xff] }
 0x370   :  { %6150 = vmatpush2.bf16.msra.mxu0 %v7402_v10  ;;  %6108 = vmatprep.subr.bf16.mxu1 %v7641_v52  ;;  %v7546_v10 = vcombine.low %v3052_v7, %v3060_v8  ;;  %v7292_v52 = vcombine.low %v2797_v11, %v2805_v16  ;;  %v7277_v31 = vcombine.high %v2781_v27, %v2789_v12  ;;  %v3204_v11 = vld [vmem:[#allocation10 + $0xf58] sm:$0xff]  ;;  %v2941_v16 = vld [vmem:[#allocation10 + $0x720] sm:$0xff] }
 0x371   :  { %6151 = vmatprep.subr.bf16.mxu0 %v7387_v15  ;;  %v7531_v15 = vcombine.high %v3036_v23, %v3044_v24  ;;  %v7453_v8 = vcombine.high %v2957_v6, %v2965_v63 }
 0x373   :  { %6109 = vmatpush2.bf16.msra.mxu1 %v7640_v38  ;;  %v2773_v38 = vld [vmem:[#allocation10 + $0x1e0] sm:$0xff] }
 0x374   :  { %6152 = vmatpush2.bf16.msra.mxu0 %v7386_v34  ;;  %6110 = vmatprep.subr.bf16.mxu1 %v7625_v39  ;;  %v7530_v34 = vcombine.low %v3036_v23, %v3044_v24  ;;  %v7276_v39 = vcombine.low %v2781_v27, %v2789_v12  ;;  %v7261_v41 = vcombine.high %v2765_v37, %v2773_v38  ;;  %v3180_v24 = vld [vmem:[#allocation10 + $0xe98] sm:$0xff]  ;;  %v2925_v12 = vld [vmem:[#allocation10 + $0x6a0] sm:$0xff] }
 0x375   :  { %6153 = vmatprep.subr.bf16.mxu0 %v7371_v40  ;;  %v7515_v40 = vcombine.high %v3020_v33, %v3028_v36  ;;  %v3188_v27 = vld [vmem:[#allocation10 + $0xed8] sm:$0xff] }
 0x377   :  { %6111 = vmatpush2.bf16.msra.mxu1 %v7624_v45  ;;  %v2757_v45 = vld [vmem:[#allocation10 + $0x160] sm:$0xff] }
 0x378   :  { %6154 = vmatpush2.bf16.msra.mxu0 %v7370_v46  ;;  %6112 = vmatprep.subr.bf16.mxu1 %v7609_v47  ;;  %v7514_v46 = vcombine.low %v3020_v33, %v3028_v36  ;;  %v7260_v47 = vcombine.low %v2765_v37, %v2773_v38  ;;  %v7245_v51 = vcombine.high %v2749_v44, %v2757_v45  ;;  %v3164_v36 = vld [vmem:[#allocation10 + $0xe18] sm:$0xff]  ;;  %v2909_v38 = vld [vmem:[#allocation10 + $0x620] sm:$0xff] }
 0x379   :  { %6155 = vmatprep.subr.bf16.mxu0 %v7355_v50  ;;  %v7499_v50 = vcombine.high %v3004_v42, %v3012_v43  ;;  %v3172_v37 = vld [vmem:[#allocation10 + $0xe58] sm:$0xff] }
 0x37b   :  { %6113 = vmatpush2.bf16.msra.mxu1 %v7608_v53  ;;  %v2741_v53 = vld [vmem:[#allocation10 + $0xe0] sm:$0xff] }
 0x37c   :  { %6156 = vmatpush2.bf16.msra.mxu0 %v7354_v54  ;;  %6114 = vmatprep.subr.bf16.mxu1 %v7593_v55  ;;  %v7498_v54 = vcombine.low %v3004_v42, %v3012_v43  ;;  %v7244_v55 = vcombine.low %v2749_v44, %v2757_v45  ;;  %v7229_v57 = vcombine.high %v2733_v17, %v2741_v53  ;;  %v3148_v43 = vld [vmem:[#allocation10 + $0xd98] sm:$0xff]  ;;  %v2893_v45 = vld [vmem:[#allocation10 + $0x5a0] sm:$0xff] }
 0x37d   :  { %6157 = vmatprep.subr.bf16.mxu0 %v7339_v56  ;;  %v7483_v56 = vcombine.high %v2988_v13, %v2996_v14  ;;  %v3156_v44 = vld [vmem:[#allocation10 + $0xdd8] sm:$0xff] }
 0x37f   :  { %6115 = vmatpush2.bf16.msra.mxu1 %v7592_v60  ;;  %v2725_v60 = vld [vmem:[#allocation10 + $0x60] sm:$0xff] }
 0x380   :  { %6158 = vmatpush2.bf16.msra.mxu0 %v7338_v61  ;;  %6170 = vmatprep.subr.bf16.mxu1 %v7579_v26  ;;  %v7482_v61 = vcombine.low %v2988_v13, %v2996_v14  ;;  %v7228_v26 = vcombine.low %v2733_v17, %v2741_v53  ;;  %v7213_v1 = vcombine.high %v2717_v59, %v2725_v60  ;;  %v3132_v14 = vld [vmem:[#allocation10 + $0xd18] sm:$0xff]  ;;  %v2877_v53 = vld [vmem:[#allocation10 + $0x520] sm:$0xff] }
 0x381   :  { %6213 = vmatprep.subr.bf16.mxu0 %v7325_v62  ;;  %v7467_v62 = vcombine.high %v2972_v29, %v2980_v58  ;;  %v3140_v17 = vld [vmem:[#allocation10 + $0xd58] sm:$0xff] }
 0x382   :  { %6117 = vmatmul.mubr.bf16.vlgmr.msra.gmra.mxu1 %v8590_v4 }
 0x383   :  { %6160 = vmatmul.mubr.bf16.vlgmr.msra.gmra.mxu0 %v8576_v49  ;;  %6171 = vmatpush1.bf16.msra.mxu1 %v7578_v2  ;;  %v3220_v2 = vld [vmem:[#allocation10 + $0xfd8] sm:$0xff] }
 0x384   :  { %6202 = vmatprep.mubr.bf16.mxu1 %v8588_v32  ;;  %6214 = vmatpush1.bf16.msra.mxu0 %v7324_v0  ;;  %v7466_v0 = vcombine.low %v2972_v29, %v2980_v58  ;;  %v7707_v7 = vcombine.high %v3212_v20, %v3220_v2  ;;  %v3116_v58 = vld [vmem:[#allocation10 + $0xc98] sm:$0xff] }
 0x385   :  { %6245 = vmatprep.mubr.bf16.mxu0 %v8574_v48  ;;  %6172 = vmatprep.subr.bf16.mxu1 %v7563_v3  ;;  %v7212_v3 = vcombine.low %v2717_v59, %v2725_v60  ;;  %v3124_v59 = vld [vmem:[#allocation10 + $0xcd8] sm:$0xff]  ;;  %v2861_v60 = vld [vmem:[#allocation10 + $0x4a0] sm:$0xff] }
 0x386   :  { %6215 = vmatprep.subr.bf16.mxu0 %v7309_v9  ;;  %v3196_v9 = vld [vmem:[#allocation10 + $0xf18] sm:$0xff] }
 0x387   :  { %6173 = vmatpush1.bf16.msra.mxu1 %v7562_v18  ;;  %v2949_v18 = vld [vmem:[#allocation10 + $0x760] sm:$0xff] }
 0x388   :  { %6216 = vmatpush1.bf16.msra.mxu0 %v7308_v19  ;;  %6174 = vmatprep.subr.bf16.mxu1 %v7547_v21  ;;  %v7706_v19 = vcombine.low %v3212_v20, %v3220_v2  ;;  %v7452_v21 = vcombine.low %v2957_v6, %v2965_v63  ;;  %v7437_v23 = vcombine.high %v2941_v16, %v2949_v18  ;;  %v3100_v2 = vld [vmem:[#allocation10 + $0xc18] sm:$0xff]  ;;  %v2845_v63 = vld [vmem:[#allocation10 + $0x420] sm:$0xff] }
 0x389   :  { %6217 = vmatprep.subr.bf16.mxu0 %v7293_v22  ;;  %v7691_v22 = vcombine.high %v3196_v9, %v3204_v11  ;;  %v3108_v6 = vld [vmem:[#allocation10 + $0xc58] sm:$0xff] }
 0x38b   :  { %6175 = vmatpush1.bf16.msra.mxu1 %v7546_v10  ;;  %v2933_v10 = vld [vmem:[#allocation10 + $0x6e0] sm:$0xff] }
 0x38c   :  { %6218 = vmatpush1.bf16.msra.mxu0 %v7292_v52  ;;  %6176 = vmatprep.subr.bf16.mxu1 %v7531_v15  ;;  %v7690_v52 = vcombine.low %v3196_v9, %v3204_v11  ;;  %v7436_v15 = vcombine.low %v2941_v16, %v2949_v18  ;;  %v7421_v33 = vcombine.high %v2925_v12, %v2933_v10  ;;  %v3085_v11 = vld [vmem:[#allocation10 + $0xba0] sm:$0xff]  ;;  %v2830_v18 = vld [vmem:[#allocation10 + $0x3a8] sm:$0xff] }
 0x38d   :  { %6219 = vmatprep.subr.bf16.mxu0 %v7277_v31  ;;  %v7675_v31 = vcombine.high %v3180_v24, %v3188_v27  ;;  %v3093_v16 = vld [vmem:[#allocation10 + $0xbe0] sm:$0xff] }
 0x38f   :  { %6177 = vmatpush1.bf16.msra.mxu1 %v7530_v34  ;;  %v2917_v34 = vld [vmem:[#allocation10 + $0x660] sm:$0xff] }
 0x390   :  { %6220 = vmatpush1.bf16.msra.mxu0 %v7276_v39  ;;  %6178 = vmatprep.subr.bf16.mxu1 %v7515_v40  ;;  %v7674_v39 = vcombine.low %v3180_v24, %v3188_v27  ;;  %v7420_v40 = vcombine.low %v2925_v12, %v2933_v10  ;;  %v7405_v42 = vcombine.high %v2909_v38, %v2917_v34  ;;  %v3069_v27 = vld [vmem:[#allocation10 + $0xb20] sm:$0xff] }
 0x391   :  { %6221 = vmatprep.subr.bf16.mxu0 %v7261_v41  ;;  %v7659_v41 = vcombine.high %v3164_v36, %v3172_v37  ;;  %v3077_v12 = vld [vmem:[#allocation10 + $0xb60] sm:$0xff]  ;;  %v7580_v10 = vcombine.low %v3085_v11, %v3093_v16 }
 0x393   :  { %6179 = vmatpush1.bf16.msra.mxu1 %v7514_v46  ;;  %v2901_v46 = vld [vmem:[#allocation10 + $0x5e0] sm:$0xff] }
 0x394   :  { %6222 = vmatpush1.bf16.msra.mxu0 %v7260_v47  ;;  %6180 = vmatprep.subr.bf16.mxu1 %v7499_v50  ;;  %v7658_v47 = vcombine.low %v3164_v36, %v3172_v37  ;;  %v7404_v50 = vcombine.low %v2909_v38, %v2917_v34  ;;  %v7389_v13 = vcombine.high %v2893_v45, %v2901_v46  ;;  %v3053_v36 = vld [vmem:[#allocation10 + $0xaa0] sm:$0xff]  ;;  %v2798_v34 = vld [vmem:[#allocation10 + $0x2a8] sm:$0xff] }
 0x395   :  { %6223 = vmatprep.subr.bf16.mxu0 %v7245_v51  ;;  %v7643_v51 = vcombine.high %v3148_v43, %v3156_v44  ;;  %v3061_v37 = vld [vmem:[#allocation10 + $0xae0] sm:$0xff] }
 0x397   :  { %6181 = vmatpush1.bf16.msra.mxu1 %v7498_v54  ;;  %v2885_v54 = vld [vmem:[#allocation10 + $0x560] sm:$0xff] }
 0x398   :  { %6224 = vmatpush1.bf16.msra.mxu0 %v7244_v55  ;;  %6182 = vmatprep.subr.bf16.mxu1 %v7483_v56  ;;  %v7642_v55 = vcombine.low %v3148_v43, %v3156_v44  ;;  %v7388_v56 = vcombine.low %v2893_v45, %v2901_v46  ;;  %v7373_v29 = vcombine.high %v2877_v53, %v2885_v54  ;;  %v3037_v44 = vld [vmem:[#allocation10 + $0xa20] sm:$0xff]  ;;  %v2782_v46 = vld [vmem:[#allocation10 + $0x228] sm:$0xff] }
 0x399   :  { %6225 = vmatprep.subr.bf16.mxu0 %v7229_v57  ;;  %v7627_v57 = vcombine.high %v3132_v14, %v3140_v17  ;;  %v3045_v45 = vld [vmem:[#allocation10 + $0xa60] sm:$0xff] }
 0x39b   :  { %6183 = vmatpush1.bf16.msra.mxu1 %v7482_v61  ;;  %v2869_v61 = vld [vmem:[#allocation10 + $0x4e0] sm:$0xff] }
 0x39c   :  { %6226 = vmatpush1.bf16.msra.mxu0 %v7228_v26  ;;  %6184 = vmatprep.subr.bf16.mxu1 %v7467_v62  ;;  %v7626_v26 = vcombine.low %v3132_v14, %v3140_v17  ;;  %v7372_v62 = vcombine.low %v2877_v53, %v2885_v54  ;;  %v7357_v20 = vcombine.high %v2861_v60, %v2869_v61  ;;  %v3021_v17 = vld [vmem:[#allocation10 + $0x9a0] sm:$0xff]  ;;  %v2766_v54 = vld [vmem:[#allocation10 + $0x1a8] sm:$0xff] }
 0x39d   :  { %6227 = vmatprep.subr.bf16.mxu0 %v7213_v1  ;;  %v7611_v1 = vcombine.high %v3116_v58, %v3124_v59  ;;  %v3029_v53 = vld [vmem:[#allocation10 + $0x9e0] sm:$0xff] }
 0x39f   :  { %6185 = vmatpush1.bf16.msra.mxu1 %v7466_v0  ;;  %v2853_v0 = vld [vmem:[#allocation10 + $0x460] sm:$0xff] }
 0x3a0   :  { %6228 = vmatpush1.bf16.msra.mxu0 %v7212_v3  ;;  %6186 = vmatprep.subr.bf16.mxu1 %v7707_v7  ;;  %v7610_v3 = vcombine.low %v3116_v58, %v3124_v59  ;;  %v7356_v7 = vcombine.low %v2861_v60, %v2869_v61  ;;  %v7341_v9 = vcombine.high %v2845_v63, %v2853_v0  ;;  %v3005_v59 = vld [vmem:[#allocation10 + $0x920] sm:$0xff]  ;;  %v2750_v61 = vld [vmem:[#allocation10 + $0x128] sm:$0xff] }
 0x3a1   :  { %6229 = vmatprep.subr.bf16.mxu0 %v7453_v8  ;;  %v7595_v8 = vcombine.high %v3100_v2, %v3108_v6  ;;  %v3013_v60 = vld [vmem:[#allocation10 + $0x960] sm:$0xff] }
 0x3a3   :  { %6187 = vmatpush2.bf16.msra.mxu1 %v7706_v19  ;;  %v2838_v19 = vld [vmem:[#allocation10 + $0x3e8] sm:$0xff] }
 0x3a4   :  { %6230 = vmatpush2.bf16.msra.mxu0 %v7452_v21  ;;  %6188 = vmatprep.subr.bf16.mxu1 %v7691_v22  ;;  %v7594_v21 = vcombine.low %v3100_v2, %v3108_v6  ;;  %v7340_v22 = vcombine.low %v2845_v63, %v2853_v0  ;;  %v7327_v24 = vcombine.high %v2830_v18, %v2838_v19  ;;  %v2989_v6 = vld [vmem:[#allocation10 + $0x8a0] sm:$0xff]  ;;  %v2734_v0 = vld [vmem:[#allocation10 + $0xa8] sm:$0xff] }
 0x3a5   :  { %6231 = vmatprep.subr.bf16.mxu0 %v7437_v23  ;;  %v7581_v23 = vcombine.high %v3085_v11, %v3093_v16  ;;  %v2997_v63 = vld [vmem:[#allocation10 + $0x8e0] sm:$0xff] }
 0x3a6   :  { %v2973_v16 = vld [vmem:[#allocation10 + $0x820] sm:$0xff] }
 0x3a7   :  { %6189 = vmatpush2.bf16.msra.mxu1 %v7690_v52  ;;  %v2814_v52 = vld [vmem:[#allocation10 + $0x328] sm:$0xff] }
 0x3a8   :  { %6232 = vmatpush2.bf16.msra.mxu0 %v7436_v15  ;;  %6190 = vmatprep.subr.bf16.mxu1 %v7675_v31  ;;  %v2822_v15 = vld [vmem:[#allocation10 + $0x368] sm:$0xff]  ;;  %v7326_v31 = vcombine.low %v2830_v18, %v2838_v19  ;;  %v2981_v18 = vld [vmem:[#allocation10 + $0x860] sm:$0xff] }
 0x3a9   :  { %6233 = vmatprep.subr.bf16.mxu0 %v7421_v33  ;;  %v7565_v33 = vcombine.high %v3069_v27, %v3077_v12  ;;  %v7311_v38 = vcombine.high %v2814_v52, %v2822_v15  ;;  %v2718_v19 = vld [vmem:[#allocation10 + $0x28] sm:$0xff] }
 0x3ab   :  { %6191 = vmatpush2.bf16.msra.mxu1 %v7674_v39  ;;  %v2806_v39 = vld [vmem:[#allocation10 + $0x2e8] sm:$0xff] }
 0x3ac   :  { %6234 = vmatpush2.bf16.msra.mxu0 %v7420_v40  ;;  %6192 = vmatprep.subr.bf16.mxu1 %v7659_v41  ;;  %v7564_v40 = vcombine.low %v3069_v27, %v3077_v12  ;;  %v7310_v41 = vcombine.low %v2814_v52, %v2822_v15  ;;  %v7295_v43 = vcombine.high %v2798_v34, %v2806_v39  ;;  %v3213_v12 = vld [vmem:[#allocation10 + $0xfa0] sm:$0xff]  ;;  %v2958_v52 = vld [vmem:[#allocation10 + $0x7a8] sm:$0xff] }
 0x3ad   :  { %6235 = vmatprep.subr.bf16.mxu0 %v7405_v42  ;;  %v7549_v42 = vcombine.high %v3053_v36, %v3061_v37  ;;  %v2966_v15 = vld [vmem:[#allocation10 + $0x7e8] sm:$0xff] }
 0x3af   :  { %6193 = vmatpush2.bf16.msra.mxu1 %v7658_v47  ;;  %v2790_v47 = vld [vmem:[#allocation10 + $0x268] sm:$0xff] }
 0x3b0   :  { %6236 = vmatpush2.bf16.msra.mxu0 %v7404_v50  ;;  %6194 = vmatprep.subr.bf16.mxu1 %v7643_v51  ;;  %v7548_v50 = vcombine.low %v3053_v36, %v3061_v37  ;;  %v7294_v51 = vcombine.low %v2798_v34, %v2806_v39  ;;  %v7279_v14 = vcombine.high %v2782_v46, %v2790_v47  ;;  %v3205_v34 = vld [vmem:[#allocation10 + $0xf60] sm:$0xff]  ;;  %v2942_v39 = vld [vmem:[#allocation10 + $0x728] sm:$0xff] }
 0x3b1   :  { %6237 = vmatprep.subr.bf16.mxu0 %v7389_v13  ;;  %v7533_v13 = vcombine.high %v3037_v44, %v3045_v45  ;;  %v7455_v37 = vcombine.high %v2958_v52, %v2966_v15 }
 0x3b3   :  { %6195 = vmatpush2.bf16.msra.mxu1 %v7642_v55  ;;  %v2774_v55 = vld [vmem:[#allocation10 + $0x1e8] sm:$0xff] }
 0x3b4   :  { %6238 = vmatpush2.bf16.msra.mxu0 %v7388_v56  ;;  %6196 = vmatprep.subr.bf16.mxu1 %v7627_v57  ;;  %v7532_v56 = vcombine.low %v3037_v44, %v3045_v45  ;;  %v7278_v57 = vcombine.low %v2782_v46, %v2790_v47  ;;  %v7263_v58 = vcombine.high %v2766_v54, %v2774_v55  ;;  %v3181_v45 = vld [vmem:[#allocation10 + $0xea0] sm:$0xff]  ;;  %v2926_v47 = vld [vmem:[#allocation10 + $0x6a8] sm:$0xff] }
 0x3b5   :  { %6239 = vmatprep.subr.bf16.mxu0 %v7373_v29  ;;  %v7517_v29 = vcombine.high %v3021_v17, %v3029_v53  ;;  %v3189_v46 = vld [vmem:[#allocation10 + $0xee0] sm:$0xff] }
 0x3b7   :  { %6197 = vmatpush2.bf16.msra.mxu1 %v7626_v26  ;;  %v2758_v26 = vld [vmem:[#allocation10 + $0x168] sm:$0xff] }
 0x3b8   :  { %6240 = vmatpush2.bf16.msra.mxu0 %v7372_v62  ;;  %6198 = vmatprep.subr.bf16.mxu1 %v7611_v1  ;;  %v7516_v62 = vcombine.low %v3021_v17, %v3029_v53  ;;  %v7262_v1 = vcombine.low %v2766_v54, %v2774_v55  ;;  %v7247_v2 = vcombine.high %v2750_v61, %v2758_v26  ;;  %v3165_v53 = vld [vmem:[#allocation10 + $0xe20] sm:$0xff]  ;;  %v2910_v55 = vld [vmem:[#allocation10 + $0x628] sm:$0xff] }
 0x3b9   :  { %6241 = vmatprep.subr.bf16.mxu0 %v7357_v20  ;;  %v7501_v20 = vcombine.high %v3005_v59, %v3013_v60  ;;  %v3173_v54 = vld [vmem:[#allocation10 + $0xe60] sm:$0xff] }
 0x3bb   :  { %6199 = vmatpush2.bf16.msra.mxu1 %v7610_v3  ;;  %v2742_v3 = vld [vmem:[#allocation10 + $0xe8] sm:$0xff] }
 0x3bc   :  { %6242 = vmatpush2.bf16.msra.mxu0 %v7356_v7  ;;  %6200 = vmatprep.subr.bf16.mxu1 %v7595_v8  ;;  %v7500_v7 = vcombine.low %v3005_v59, %v3013_v60  ;;  %v7246_v8 = vcombine.low %v2750_v61, %v2758_v26  ;;  %v7231_v11 = vcombine.high %v2734_v0, %v2742_v3  ;;  %v3149_v60 = vld [vmem:[#allocation10 + $0xda0] sm:$0xff]  ;;  %v2894_v26 = vld [vmem:[#allocation10 + $0x5a8] sm:$0xff] }
 0x3bd   :  { %6243 = vmatprep.subr.bf16.mxu0 %v7341_v9  ;;  %v7485_v9 = vcombine.high %v2989_v6, %v2997_v63  ;;  %v3157_v61 = vld [vmem:[#allocation10 + $0xde0] sm:$0xff] }
 0x3bf   :  { %6201 = vmatpush2.bf16.msra.mxu1 %v7594_v21  ;;  %v2726_v21 = vld [vmem:[#allocation10 + $0x68] sm:$0xff] }
 0x3c0   :  { %6244 = vmatpush2.bf16.msra.mxu0 %v7340_v22  ;;  %6256 = vmatprep.subr.bf16.mxu1 %v7581_v23  ;;  %v7484_v22 = vcombine.low %v2989_v6, %v2997_v63  ;;  %v7230_v23 = vcombine.low %v2734_v0, %v2742_v3  ;;  %v7215_v27 = vcombine.high %v2718_v19, %v2726_v21  ;;  %v3133_v63 = vld [vmem:[#allocation10 + $0xd20] sm:$0xff]  ;;  %v2878_v3 = vld [vmem:[#allocation10 + $0x528] sm:$0xff] }
 0x3c1   :  { %6299 = vmatprep.subr.bf16.mxu0 %v7327_v24  ;;  %v7469_v24 = vcombine.high %v2973_v16, %v2981_v18  ;;  %v3141_v0 = vld [vmem:[#allocation10 + $0xd60] sm:$0xff] }
 0x3c2   :  { %6203 = vmatmul.mubr.bf16.vlgmr.msra.gmra.mxu1 %v8590_v4 }
 0x3c3   :  { %6246 = vmatmul.mubr.bf16.vlgmr.msra.gmra.mxu0 %v8576_v49  ;;  %6257 = vmatpush1.bf16.msra.mxu1 %v7580_v10  ;;  %v3221_v10 = vld [vmem:[#allocation10 + $0xfe0] sm:$0xff] }
 0x3c4   :  { %6288 = vmatprep.mubr.bf16.mxu1 %v8588_v32  ;;  %6300 = vmatpush1.bf16.msra.mxu0 %v7326_v31  ;;  %v7468_v31 = vcombine.low %v2973_v16, %v2981_v18  ;;  %v7709_v36 = vcombine.high %v3213_v12, %v3221_v10  ;;  %v3117_v18 = vld [vmem:[#allocation10 + $0xca0] sm:$0xff] }
 0x3c5   :  { %6331 = vmatprep.mubr.bf16.mxu0 %v8574_v48  ;;  %6258 = vmatprep.subr.bf16.mxu1 %v7565_v33  ;;  %v7214_v33 = vcombine.low %v2718_v19, %v2726_v21  ;;  %v3125_v19 = vld [vmem:[#allocation10 + $0xce0] sm:$0xff]  ;;  %v2862_v21 = vld [vmem:[#allocation10 + $0x4a8] sm:$0xff] }
 0x3c6   :  { %6301 = vmatprep.subr.bf16.mxu0 %v7311_v38  ;;  %v3197_v38 = vld [vmem:[#allocation10 + $0xf20] sm:$0xff] }
 0x3c7   :  { %6259 = vmatpush1.bf16.msra.mxu1 %v7564_v40  ;;  %v2950_v40 = vld [vmem:[#allocation10 + $0x768] sm:$0xff] }
 0x3c8   :  { %6302 = vmatpush1.bf16.msra.mxu0 %v7310_v41  ;;  %6260 = vmatprep.subr.bf16.mxu1 %v7549_v42  ;;  %v7708_v41 = vcombine.low %v3213_v12, %v3221_v10  ;;  %v7454_v42 = vcombine.low %v2958_v52, %v2966_v15  ;;  %v7439_v44 = vcombine.high %v2942_v39, %v2950_v40  ;;  %v3101_v10 = vld [vmem:[#allocation10 + $0xc20] sm:$0xff]  ;;  %v2846_v15 = vld [vmem:[#allocation10 + $0x428] sm:$0xff] }
 0x3c9   :  { %6303 = vmatprep.subr.bf16.mxu0 %v7295_v43  ;;  %v7693_v43 = vcombine.high %v3197_v38, %v3205_v34  ;;  %v3109_v52 = vld [vmem:[#allocation10 + $0xc60] sm:$0xff] }
 0x3cb   :  { %6261 = vmatpush1.bf16.msra.mxu1 %v7548_v50  ;;  %v2934_v50 = vld [vmem:[#allocation10 + $0x6e8] sm:$0xff] }
 0x3cc   :  { %6304 = vmatpush1.bf16.msra.mxu0 %v7294_v51  ;;  %6262 = vmatprep.subr.bf16.mxu1 %v7533_v13  ;;  %v7692_v51 = vcombine.low %v3197_v38, %v3205_v34  ;;  %v7438_v13 = vcombine.low %v2942_v39, %v2950_v40  ;;  %v7423_v17 = vcombine.high %v2926_v47, %v2934_v50  ;;  %v3086_v34 = vld [vmem:[#allocation10 + $0xba8] sm:$0xff]  ;;  %v2831_v40 = vld [vmem:[#allocation10 + $0x3b0] sm:$0xff] }
 0x3cd   :  { %6305 = vmatprep.subr.bf16.mxu0 %v7279_v14  ;;  %v7677_v14 = vcombine.high %v3181_v45, %v3189_v46  ;;  %v3094_v39 = vld [vmem:[#allocation10 + $0xbe8] sm:$0xff] }
 0x3cf   :  { %6263 = vmatpush1.bf16.msra.mxu1 %v7532_v56  ;;  %v2918_v56 = vld [vmem:[#allocation10 + $0x668] sm:$0xff] }
 0x3d0   :  { %6306 = vmatpush1.bf16.msra.mxu0 %v7278_v57  ;;  %6264 = vmatprep.subr.bf16.mxu1 %v7517_v29  ;;  %v7676_v57 = vcombine.low %v3181_v45, %v3189_v46  ;;  %v7422_v29 = vcombine.low %v2926_v47, %v2934_v50  ;;  %v7407_v59 = vcombine.high %v2910_v55, %v2918_v56  ;;  %v3070_v46 = vld [vmem:[#allocation10 + $0xb28] sm:$0xff] }
 0x3d1   :  { %6307 = vmatprep.subr.bf16.mxu0 %v7263_v58  ;;  %v7661_v58 = vcombine.high %v3165_v53, %v3173_v54  ;;  %v3078_v47 = vld [vmem:[#allocation10 + $0xb68] sm:$0xff]  ;;  %v7582_v50 = vcombine.low %v3086_v34, %v3094_v39 }
 0x3d3   :  { %6265 = vmatpush1.bf16.msra.mxu1 %v7516_v62  ;;  %v2902_v62 = vld [vmem:[#allocation10 + $0x5e8] sm:$0xff] }
 0x3d4   :  { %6308 = vmatpush1.bf16.msra.mxu0 %v7262_v1  ;;  %6266 = vmatprep.subr.bf16.mxu1 %v7501_v20  ;;  %v7660_v1 = vcombine.low %v3165_v53, %v3173_v54  ;;  %v7406_v20 = vcombine.low %v2910_v55, %v2918_v56  ;;  %v7391_v6 = vcombine.high %v2894_v26, %v2902_v62  ;;  %v3054_v53 = vld [vmem:[#allocation10 + $0xaa8] sm:$0xff]  ;;  %v2799_v56 = vld [vmem:[#allocation10 + $0x2b0] sm:$0xff] }
 0x3d5   :  { %6309 = vmatprep.subr.bf16.mxu0 %v7247_v2  ;;  %v7645_v2 = vcombine.high %v3149_v60, %v3157_v61  ;;  %v3062_v54 = vld [vmem:[#allocation10 + $0xae8] sm:$0xff] }
 0x3d7   :  { %6267 = vmatpush1.bf16.msra.mxu1 %v7500_v7  ;;  %v2886_v7 = vld [vmem:[#allocation10 + $0x568] sm:$0xff] }
 0x3d8   :  { %6310 = vmatpush1.bf16.msra.mxu0 %v7246_v8  ;;  %6268 = vmatprep.subr.bf16.mxu1 %v7485_v9  ;;  %v7644_v8 = vcombine.low %v3149_v60, %v3157_v61  ;;  %v7390_v9 = vcombine.low %v2894_v26, %v2902_v62  ;;  %v7375_v16 = vcombine.high %v2878_v3, %v2886_v7  ;;  %v3038_v61 = vld [vmem:[#allocation10 + $0xa28] sm:$0xff]  ;;  %v2783_v62 = vld [vmem:[#allocation10 + $0x230] sm:$0xff] }
 0x3d9   :  { %6311 = vmatprep.subr.bf16.mxu0 %v7231_v11  ;;  %v7629_v11 = vcombine.high %v3133_v63, %v3141_v0  ;;  %v3046_v26 = vld [vmem:[#allocation10 + $0xa68] sm:$0xff] }
 0x3db   :  { %6269 = vmatpush1.bf16.msra.mxu1 %v7484_v22  ;;  %v2870_v22 = vld [vmem:[#allocation10 + $0x4e8] sm:$0xff] }
 0x3dc   :  { %6312 = vmatpush1.bf16.msra.mxu0 %v7230_v23  ;;  %6270 = vmatprep.subr.bf16.mxu1 %v7469_v24  ;;  %v7628_v23 = vcombine.low %v3133_v63, %v3141_v0  ;;  %v7374_v24 = vcombine.low %v2878_v3, %v2886_v7  ;;  %v7359_v12 = vcombine.high %v2862_v21, %v2870_v22  ;;  %v3022_v0 = vld [vmem:[#allocation10 + $0x9a8] sm:$0xff]  ;;  %v2767_v7 = vld [vmem:[#allocation10 + $0x1b0] sm:$0xff] }
 0x3dd   :  { %6313 = vmatprep.subr.bf16.mxu0 %v7215_v27  ;;  %v7613_v27 = vcombine.high %v3117_v18, %v3125_v19  ;;  %v3030_v3 = vld [vmem:[#allocation10 + $0x9e8] sm:$0xff] }
 0x3df   :  { %6271 = vmatpush1.bf16.msra.mxu1 %v7468_v31  ;;  %v2854_v31 = vld [vmem:[#allocation10 + $0x468] sm:$0xff] }
 0x3e0   :  { %6314 = vmatpush1.bf16.msra.mxu0 %v7214_v33  ;;  %6272 = vmatprep.subr.bf16.mxu1 %v7709_v36  ;;  %v7612_v33 = vcombine.low %v3117_v18, %v3125_v19  ;;  %v7358_v36 = vcombine.low %v2862_v21, %v2870_v22  ;;  %v7343_v38 = vcombine.high %v2846_v15, %v2854_v31  ;;  %v3006_v19 = vld [vmem:[#allocation10 + $0x928] sm:$0xff]  ;;  %v2751_v22 = vld [vmem:[#allocation10 + $0x130] sm:$0xff] }
 0x3e1   :  { %6315 = vmatprep.subr.bf16.mxu0 %v7455_v37  ;;  %v7597_v37 = vcombine.high %v3101_v10, %v3109_v52  ;;  %v3014_v21 = vld [vmem:[#allocation10 + $0x968] sm:$0xff] }
 0x3e3   :  { %6273 = vmatpush2.bf16.msra.mxu1 %v7708_v41  ;;  %v2839_v41 = vld [vmem:[#allocation10 + $0x3f0] sm:$0xff] }
 0x3e4   :  { %6316 = vmatpush2.bf16.msra.mxu0 %v7454_v42  ;;  %6274 = vmatprep.subr.bf16.mxu1 %v7693_v43  ;;  %v7596_v42 = vcombine.low %v3101_v10, %v3109_v52  ;;  %v7342_v43 = vcombine.low %v2846_v15, %v2854_v31  ;;  %v7329_v45 = vcombine.high %v2831_v40, %v2839_v41  ;;  %v2990_v52 = vld [vmem:[#allocation10 + $0x8a8] sm:$0xff]  ;;  %v2735_v31 = vld [vmem:[#allocation10 + $0xb0] sm:$0xff] }
 0x3e5   :  { %6317 = vmatprep.subr.bf16.mxu0 %v7439_v44  ;;  %v7583_v44 = vcombine.high %v3086_v34, %v3094_v39  ;;  %v2998_v15 = vld [vmem:[#allocation10 + $0x8e8] sm:$0xff] }
 0x3e6   :  { %v2974_v39 = vld [vmem:[#allocation10 + $0x828] sm:$0xff] }
 0x3e7   :  { %6275 = vmatpush2.bf16.msra.mxu1 %v7692_v51  ;;  %v2815_v51 = vld [vmem:[#allocation10 + $0x330] sm:$0xff] }
 0x3e8   :  { %6318 = vmatpush2.bf16.msra.mxu0 %v7438_v13  ;;  %6276 = vmatprep.subr.bf16.mxu1 %v7677_v14  ;;  %v2823_v13 = vld [vmem:[#allocation10 + $0x370] sm:$0xff]  ;;  %v7328_v14 = vcombine.low %v2831_v40, %v2839_v41  ;;  %v2982_v40 = vld [vmem:[#allocation10 + $0x868] sm:$0xff] }
 0x3e9   :  { %6319 = vmatprep.subr.bf16.mxu0 %v7423_v17  ;;  %v7567_v17 = vcombine.high %v3070_v46, %v3078_v47  ;;  %v7313_v55 = vcombine.high %v2815_v51, %v2823_v13  ;;  %v2719_v41 = vld [vmem:[#allocation10 + $0x30] sm:$0xff] }
 0x3eb   :  { %6277 = vmatpush2.bf16.msra.mxu1 %v7676_v57  ;;  %v2807_v57 = vld [vmem:[#allocation10 + $0x2f0] sm:$0xff] }
 0x3ec   :  { %6320 = vmatpush2.bf16.msra.mxu0 %v7422_v29  ;;  %6278 = vmatprep.subr.bf16.mxu1 %v7661_v58  ;;  %v7566_v29 = vcombine.low %v3070_v46, %v3078_v47  ;;  %v7312_v58 = vcombine.low %v2815_v51, %v2823_v13  ;;  %v7297_v60 = vcombine.high %v2799_v56, %v2807_v57  ;;  %v3214_v47 = vld [vmem:[#allocation10 + $0xfa8] sm:$0xff]  ;;  %v2959_v51 = vld [vmem:[#allocation10 + $0x7b0] sm:$0xff] }
 0x3ed   :  { %6321 = vmatprep.subr.bf16.mxu0 %v7407_v59  ;;  %v7551_v59 = vcombine.high %v3054_v53, %v3062_v54  ;;  %v2967_v13 = vld [vmem:[#allocation10 + $0x7f0] sm:$0xff] }
 0x3ef   :  { %6279 = vmatpush2.bf16.msra.mxu1 %v7660_v1  ;;  %v2791_v1 = vld [vmem:[#allocation10 + $0x270] sm:$0xff] }
 0x3f0   :  { %6322 = vmatpush2.bf16.msra.mxu0 %v7406_v20  ;;  %6280 = vmatprep.subr.bf16.mxu1 %v7645_v2  ;;  %v7550_v20 = vcombine.low %v3054_v53, %v3062_v54  ;;  %v7296_v2 = vcombine.low %v2799_v56, %v2807_v57  ;;  %v7281_v63 = vcombine.high %v2783_v62, %v2791_v1  ;;  %v3206_v56 = vld [vmem:[#allocation10 + $0xf68] sm:$0xff]  ;;  %v2943_v57 = vld [vmem:[#allocation10 + $0x730] sm:$0xff] }
 0x3f1   :  { %6323 = vmatprep.subr.bf16.mxu0 %v7391_v6  ;;  %v7535_v6 = vcombine.high %v3038_v61, %v3046_v26  ;;  %v7457_v54 = vcombine.high %v2959_v51, %v2967_v13 }
 0x3f3   :  { %6281 = vmatpush2.bf16.msra.mxu1 %v7644_v8  ;;  %v2775_v8 = vld [vmem:[#allocation10 + $0x1f0] sm:$0xff] }
 0x3f4   :  { %6324 = vmatpush2.bf16.msra.mxu0 %v7390_v9  ;;  %6282 = vmatprep.subr.bf16.mxu1 %v7629_v11  ;;  %v7534_v9 = vcombine.low %v3038_v61, %v3046_v26  ;;  %v7280_v11 = vcombine.low %v2783_v62, %v2791_v1  ;;  %v7265_v18 = vcombine.high %v2767_v7, %v2775_v8  ;;  %v3182_v26 = vld [vmem:[#allocation10 + $0xea8] sm:$0xff]  ;;  %v2927_v1 = vld [vmem:[#allocation10 + $0x6b0] sm:$0xff] }
 0x3f5   :  { %6325 = vmatprep.subr.bf16.mxu0 %v7375_v16  ;;  %v7519_v16 = vcombine.high %v3022_v0, %v3030_v3  ;;  %v3190_v62 = vld [vmem:[#allocation10 + $0xee8] sm:$0xff] }
 0x3f7   :  { %6283 = vmatpush2.bf16.msra.mxu1 %v7628_v23  ;;  %v2759_v23 = vld [vmem:[#allocation10 + $0x170] sm:$0xff] }
 0x3f8   :  { %6326 = vmatpush2.bf16.msra.mxu0 %v7374_v24  ;;  %6284 = vmatprep.subr.bf16.mxu1 %v7613_v27  ;;  %v7518_v24 = vcombine.low %v3022_v0, %v3030_v3  ;;  %v7264_v27 = vcombine.low %v2767_v7, %v2775_v8  ;;  %v7249_v10 = vcombine.high %v2751_v22, %v2759_v23  ;;  %v3166_v3 = vld [vmem:[#allocation10 + $0xe28] sm:$0xff]  ;;  %v2911_v8 = vld [vmem:[#allocation10 + $0x630] sm:$0xff] }
 0x3f9   :  { %6327 = vmatprep.subr.bf16.mxu0 %v7359_v12  ;;  %v7503_v12 = vcombine.high %v3006_v19, %v3014_v21  ;;  %v3174_v7 = vld [vmem:[#allocation10 + $0xe68] sm:$0xff] }
 0x3fb   :  { %6285 = vmatpush2.bf16.msra.mxu1 %v7612_v33  ;;  %v2743_v33 = vld [vmem:[#allocation10 + $0xf0] sm:$0xff] }
 0x3fc   :  { %6328 = vmatpush2.bf16.msra.mxu0 %v7358_v36  ;;  %6286 = vmatprep.subr.bf16.mxu1 %v7597_v37  ;;  %v7502_v36 = vcombine.low %v3006_v19, %v3014_v21  ;;  %v7248_v37 = vcombine.low %v2751_v22, %v2759_v23  ;;  %v7233_v34 = vcombine.high %v2735_v31, %v2743_v33  ;;  %v3150_v21 = vld [vmem:[#allocation10 + $0xda8] sm:$0xff]  ;;  %v2895_v23 = vld [vmem:[#allocation10 + $0x5b0] sm:$0xff] }
 0x3fd   :  { %6329 = vmatprep.subr.bf16.mxu0 %v7343_v38  ;;  %v7487_v38 = vcombine.high %v2990_v52, %v2998_v15  ;;  %v3158_v22 = vld [vmem:[#allocation10 + $0xde8] sm:$0xff] }
 0x3ff   :  { %6287 = vmatpush2.bf16.msra.mxu1 %v7596_v42  ;;  %v2727_v42 = vld [vmem:[#allocation10 + $0x70] sm:$0xff] }
 0x400   :  { %6330 = vmatpush2.bf16.msra.mxu0 %v7342_v43  ;;  %6342 = vmatprep.subr.bf16.mxu1 %v7583_v44  ;;  %v7486_v43 = vcombine.low %v2990_v52, %v2998_v15  ;;  %v7232_v44 = vcombine.low %v2735_v31, %v2743_v33  ;;  %v7217_v46 = vcombine.high %v2719_v41, %v2727_v42  ;;  %v3134_v15 = vld [vmem:[#allocation10 + $0xd28] sm:$0xff]  ;;  %v2879_v33 = vld [vmem:[#allocation10 + $0x530] sm:$0xff] }
 0x401   :  { %6385 = vmatprep.subr.bf16.mxu0 %v7329_v45  ;;  %v7471_v45 = vcombine.high %v2974_v39, %v2982_v40  ;;  %v3142_v31 = vld [vmem:[#allocation10 + $0xd68] sm:$0xff] }
 0x402   :  { %6289 = vmatmul.mubr.bf16.vlgmr.msra.gmra.mxu1 %v8590_v4 }
 0x403   :  { %6332 = vmatmul.mubr.bf16.vlgmr.msra.gmra.mxu0 %v8576_v49  ;;  %6343 = vmatpush1.bf16.msra.mxu1 %v7582_v50  ;;  %v3222_v50 = vld [vmem:[#allocation10 + $0xfe8] sm:$0xff] }
 0x404   :  { %6374 = vmatprep.mubr.bf16.mxu1 %v8588_v32  ;;  %6386 = vmatpush1.bf16.msra.mxu0 %v7328_v14  ;;  %v7470_v14 = vcombine.low %v2974_v39, %v2982_v40  ;;  %v7711_v53 = vcombine.high %v3214_v47, %v3222_v50  ;;  %v3118_v40 = vld [vmem:[#allocation10 + $0xca8] sm:$0xff] }
 0x405   :  { %6417 = vmatprep.mubr.bf16.mxu0 %v8574_v48  ;;  %6344 = vmatprep.subr.bf16.mxu1 %v7567_v17  ;;  %v7216_v17 = vcombine.low %v2719_v41, %v2727_v42  ;;  %v3126_v41 = vld [vmem:[#allocation10 + $0xce8] sm:$0xff]  ;;  %v2863_v42 = vld [vmem:[#allocation10 + $0x4b0] sm:$0xff] }
 0x406   :  { %6387 = vmatprep.subr.bf16.mxu0 %v7313_v55  ;;  %v3198_v55 = vld [vmem:[#allocation10 + $0xf28] sm:$0xff] }
 0x407   :  { %6345 = vmatpush1.bf16.msra.mxu1 %v7566_v29  ;;  %v2951_v29 = vld [vmem:[#allocation10 + $0x770] sm:$0xff] }
 0x408   :  { %6388 = vmatpush1.bf16.msra.mxu0 %v7312_v58  ;;  %6346 = vmatprep.subr.bf16.mxu1 %v7551_v59  ;;  %v7710_v58 = vcombine.low %v3214_v47, %v3222_v50  ;;  %v7456_v59 = vcombine.low %v2959_v51, %v2967_v13  ;;  %v7441_v61 = vcombine.high %v2943_v57, %v2951_v29  ;;  %v3102_v50 = vld [vmem:[#allocation10 + $0xc28] sm:$0xff]  ;;  %v2847_v13 = vld [vmem:[#allocation10 + $0x430] sm:$0xff] }
 0x409   :  { %6389 = vmatprep.subr.bf16.mxu0 %v7297_v60  ;;  %v7695_v60 = vcombine.high %v3198_v55, %v3206_v56  ;;  %v3110_v51 = vld [vmem:[#allocation10 + $0xc68] sm:$0xff] }
 0x40b   :  { %6347 = vmatpush1.bf16.msra.mxu1 %v7550_v20  ;;  %v2935_v20 = vld [vmem:[#allocation10 + $0x6f0] sm:$0xff] }
 0x40c   :  { %6390 = vmatpush1.bf16.msra.mxu0 %v7296_v2  ;;  %6348 = vmatprep.subr.bf16.mxu1 %v7535_v6  ;;  %v7694_v2 = vcombine.low %v3198_v55, %v3206_v56  ;;  %v7440_v6 = vcombine.low %v2943_v57, %v2951_v29  ;;  %v7425_v0 = vcombine.high %v2927_v1, %v2935_v20  ;;  %v3087_v56 = vld [vmem:[#allocation10 + $0xbb0] sm:$0xff]  ;;  %v2832_v29 = vld [vmem:[#allocation10 + $0x3b8] sm:$0xff] }
 0x40d   :  { %6391 = vmatprep.subr.bf16.mxu0 %v7281_v63  ;;  %v7679_v63 = vcombine.high %v3182_v26, %v3190_v62  ;;  %v3095_v57 = vld [vmem:[#allocation10 + $0xbf0] sm:$0xff] }
 0x40f   :  { %6349 = vmatpush1.bf16.msra.mxu1 %v7534_v9  ;;  %v2919_v9 = vld [vmem:[#allocation10 + $0x670] sm:$0xff] }
 0x410   :  { %6392 = vmatpush1.bf16.msra.mxu0 %v7280_v11  ;;  %6350 = vmatprep.subr.bf16.mxu1 %v7519_v16  ;;  %v7678_v11 = vcombine.low %v3182_v26, %v3190_v62  ;;  %v7424_v16 = vcombine.low %v2927_v1, %v2935_v20  ;;  %v7409_v19 = vcombine.high %v2911_v8, %v2919_v9  ;;  %v3071_v62 = vld [vmem:[#allocation10 + $0xb30] sm:$0xff] }
 0x411   :  { %6393 = vmatprep.subr.bf16.mxu0 %v7265_v18  ;;  %v7663_v18 = vcombine.high %v3166_v3, %v3174_v7  ;;  %v3079_v1 = vld [vmem:[#allocation10 + $0xb70] sm:$0xff]  ;;  %v7584_v20 = vcombine.low %v3087_v56, %v3095_v57 }
 0x413   :  { %6351 = vmatpush1.bf16.msra.mxu1 %v7518_v24  ;;  %v2903_v24 = vld [vmem:[#allocation10 + $0x5f0] sm:$0xff] }
 0x414   :  { %6394 = vmatpush1.bf16.msra.mxu0 %v7264_v27  ;;  %6352 = vmatprep.subr.bf16.mxu1 %v7503_v12  ;;  %v7662_v27 = vcombine.low %v3166_v3, %v3174_v7  ;;  %v7408_v12 = vcombine.low %v2911_v8, %v2919_v9  ;;  %v7393_v52 = vcombine.high %v2895_v23, %v2903_v24  ;;  %v3055_v3 = vld [vmem:[#allocation10 + $0xab0] sm:$0xff]  ;;  %v2800_v9 = vld [vmem:[#allocation10 + $0x2b8] sm:$0xff] }
 0x415   :  { %6395 = vmatprep.subr.bf16.mxu0 %v7249_v10  ;;  %v7647_v10 = vcombine.high %v3150_v21, %v3158_v22  ;;  %v3063_v7 = vld [vmem:[#allocation10 + $0xaf0] sm:$0xff] }
 0x417   :  { %6353 = vmatpush1.bf16.msra.mxu1 %v7502_v36  ;;  %v2887_v36 = vld [vmem:[#allocation10 + $0x570] sm:$0xff] }
 0x418   :  { %6396 = vmatpush1.bf16.msra.mxu0 %v7248_v37  ;;  %6354 = vmatprep.subr.bf16.mxu1 %v7487_v38  ;;  %v7646_v37 = vcombine.low %v3150_v21, %v3158_v22  ;;  %v7392_v38 = vcombine.low %v2895_v23, %v2903_v24  ;;  %v7377_v39 = vcombine.high %v2879_v33, %v2887_v36  ;;  %v3039_v22 = vld [vmem:[#allocation10 + $0xa30] sm:$0xff]  ;;  %v2784_v24 = vld [vmem:[#allocation10 + $0x238] sm:$0xff] }
 0x419   :  { %6397 = vmatprep.subr.bf16.mxu0 %v7233_v34  ;;  %v7631_v34 = vcombine.high %v3134_v15, %v3142_v31  ;;  %v3047_v23 = vld [vmem:[#allocation10 + $0xa70] sm:$0xff] }
 0x41b   :  { %6355 = vmatpush1.bf16.msra.mxu1 %v7486_v43  ;;  %v2871_v43 = vld [vmem:[#allocation10 + $0x4f0] sm:$0xff] }
 0x41c   :  { %6398 = vmatpush1.bf16.msra.mxu0 %v7232_v44  ;;  %6356 = vmatprep.subr.bf16.mxu1 %v7471_v45  ;;  %v7630_v44 = vcombine.low %v3134_v15, %v3142_v31  ;;  %v7376_v45 = vcombine.low %v2879_v33, %v2887_v36  ;;  %v7361_v47 = vcombine.high %v2863_v42, %v2871_v43  ;;  %v3023_v31 = vld [vmem:[#allocation10 + $0x9b0] sm:$0xff]  ;;  %v2768_v36 = vld [vmem:[#allocation10 + $0x1b8] sm:$0xff] }
 0x41d   :  { %6399 = vmatprep.subr.bf16.mxu0 %v7217_v46  ;;  %v7615_v46 = vcombine.high %v3118_v40, %v3126_v41  ;;  %v3031_v33 = vld [vmem:[#allocation10 + $0x9f0] sm:$0xff] }
 0x41f   :  { %6357 = vmatpush1.bf16.msra.mxu1 %v7470_v14  ;;  %v2855_v14 = vld [vmem:[#allocation10 + $0x470] sm:$0xff] }
 0x420   :  { %6400 = vmatpush1.bf16.msra.mxu0 %v7216_v17  ;;  %6358 = vmatprep.subr.bf16.mxu1 %v7711_v53  ;;  %v7614_v17 = vcombine.low %v3118_v40, %v3126_v41  ;;  %v7360_v53 = vcombine.low %v2863_v42, %v2871_v43  ;;  %v7345_v55 = vcombine.high %v2847_v13, %v2855_v14  ;;  %v3007_v40 = vld [vmem:[#allocation10 + $0x930] sm:$0xff]  ;;  %v2752_v42 = vld [vmem:[#allocation10 + $0x138] sm:$0xff] }
 0x421   :  { %6401 = vmatprep.subr.bf16.mxu0 %v7457_v54  ;;  %v7599_v54 = vcombine.high %v3102_v50, %v3110_v51  ;;  %v3015_v41 = vld [vmem:[#allocation10 + $0x970] sm:$0xff]  ;;  %v2760_v43 = vld [vmem:[#allocation10 + $0x178] sm:$0xff] }
 0x423   :  { %6359 = vmatpush2.bf16.msra.mxu1 %v7710_v58  ;;  %v2840_v58 = vld [vmem:[#allocation10 + $0x3f8] sm:$0xff] }
 0x424   :  { %6402 = vmatpush2.bf16.msra.mxu0 %v7456_v59  ;;  %6360 = vmatprep.subr.bf16.mxu1 %v7695_v60  ;;  %v7598_v59 = vcombine.low %v3102_v50, %v3110_v51  ;;  %v7344_v60 = vcombine.low %v2847_v13, %v2855_v14  ;;  %v7331_v26 = vcombine.high %v2832_v29, %v2840_v58  ;;  %v2991_v50 = vld [vmem:[#allocation10 + $0x8b0] sm:$0xff]  ;;  %v2736_v13 = vld [vmem:[#allocation10 + $0xb8] sm:$0xff] }
 0x425   :  { %6403 = vmatprep.subr.bf16.mxu0 %v7441_v61  ;;  %v7585_v61 = vcombine.high %v3087_v56, %v3095_v57  ;;  %v2999_v51 = vld [vmem:[#allocation10 + $0x8f0] sm:$0xff]  ;;  %v2744_v14 = vld [vmem:[#allocation10 + $0xf8] sm:$0xff] }
 0x426   :  { %v2975_v56 = vld [vmem:[#allocation10 + $0x830] sm:$0xff] }
 0x427   :  { %6361 = vmatpush2.bf16.msra.mxu1 %v7694_v2  ;;  %v2816_v2 = vld [vmem:[#allocation10 + $0x338] sm:$0xff]  ;;  %v2983_v57 = vld [vmem:[#allocation10 + $0x870] sm:$0xff] }
 0x428   :  { %6404 = vmatpush2.bf16.msra.mxu0 %v7440_v6  ;;  %6362 = vmatprep.subr.bf16.mxu1 %v7679_v63  ;;  %v2824_v6 = vld [vmem:[#allocation10 + $0x378] sm:$0xff]  ;;  %v7330_v63 = vcombine.low %v2832_v29, %v2840_v58 }
 0x429   :  { %6405 = vmatprep.subr.bf16.mxu0 %v7425_v0  ;;  %v7569_v0 = vcombine.high %v3071_v62, %v3079_v1  ;;  %v7315_v8 = vcombine.high %v2816_v2, %v2824_v6  ;;  %v2720_v29 = vld [vmem:[#allocation10 + $0x38] sm:$0xff] }
 0x42a   :  { %v2728_v58 = vld [vmem:[#allocation10 + $0x78] sm:$0xff] }
 0x42b   :  { %6363 = vmatpush2.bf16.msra.mxu1 %v7678_v11  ;;  %v2808_v11 = vld [vmem:[#allocation10 + $0x2f8] sm:$0xff] }
 0x42c   :  { %6406 = vmatpush2.bf16.msra.mxu0 %v7424_v16  ;;  %6364 = vmatprep.subr.bf16.mxu1 %v7663_v18  ;;  %v7568_v16 = vcombine.low %v3071_v62, %v3079_v1  ;;  %v7314_v18 = vcombine.low %v2816_v2, %v2824_v6  ;;  %v7299_v21 = vcombine.high %v2800_v9, %v2808_v11  ;;  %v3215_v62 = vld [vmem:[#allocation10 + $0xfb0] sm:$0xff]  ;;  %v2968_v2 = vld [vmem:[#allocation10 + $0x7f8] sm:$0xff] }
 0x42d   :  { %6407 = vmatprep.subr.bf16.mxu0 %v7409_v19  ;;  %v7553_v19 = vcombine.high %v3055_v3, %v3063_v7  ;;  %v3223_v1 = vld [vmem:[#allocation10 + $0xff0] sm:$0xff]  ;;  %v7472_v6 = vcombine.low %v2975_v56, %v2983_v57 }
 0x42f   :  { %6365 = vmatpush2.bf16.msra.mxu1 %v7662_v27  ;;  %v2792_v27 = vld [vmem:[#allocation10 + $0x278] sm:$0xff] }
 0x430   :  { %6408 = vmatpush2.bf16.msra.mxu0 %v7408_v12  ;;  %6366 = vmatprep.subr.bf16.mxu1 %v7647_v10  ;;  %v7552_v12 = vcombine.low %v3055_v3, %v3063_v7  ;;  %v7298_v10 = vcombine.low %v2800_v9, %v2808_v11  ;;  %v7283_v15 = vcombine.high %v2784_v24, %v2792_v27  ;;  %v3199_v7 = vld [vmem:[#allocation10 + $0xf30] sm:$0xff]  ;;  %v2944_v9 = vld [vmem:[#allocation10 + $0x738] sm:$0xff] }
 0x431   :  { %6409 = vmatprep.subr.bf16.mxu0 %v7393_v52  ;;  %v7537_v52 = vcombine.high %v3039_v22, %v3047_v23  ;;  %v2952_v11 = vld [vmem:[#allocation10 + $0x778] sm:$0xff] }
 0x433   :  { %6367 = vmatpush2.bf16.msra.mxu1 %v7646_v37  ;;  %v2776_v37 = vld [vmem:[#allocation10 + $0x1f8] sm:$0xff] }
 0x434   :  { %6410 = vmatpush2.bf16.msra.mxu0 %v7392_v38  ;;  %6368 = vmatprep.subr.bf16.mxu1 %v7631_v34  ;;  %v7282_v38 = vcombine.low %v2784_v24, %v2792_v27  ;;  %v7521_v34 = vcombine.high %v3023_v31, %v3031_v33  ;;  %v2928_v24 = vld [vmem:[#allocation10 + $0x6b8] sm:$0xff] }
 0x435   :  { %6411 = vmatprep.subr.bf16.mxu0 %v7377_v39  ;;  %v7267_v39 = vcombine.high %v2768_v36, %v2776_v37  ;;  %v2936_v27 = vld [vmem:[#allocation10 + $0x6f8] sm:$0xff] }
 0x437   :  { %6369 = vmatpush2.bf16.msra.mxu1 %v7630_v44  ;;  %v7520_v44 = vcombine.low %v3023_v31, %v3031_v33  ;;  %v3167_v31 = vld [vmem:[#allocation10 + $0xe30] sm:$0xff] }
 0x438   :  { %6412 = vmatpush2.bf16.msra.mxu0 %v7376_v45  ;;  %6370 = vmatprep.subr.bf16.mxu1 %v7615_v46  ;;  %v7266_v45 = vcombine.low %v2768_v36, %v2776_v37  ;;  %v7505_v46 = vcombine.high %v3007_v40, %v3015_v41  ;;  %v3175_v33 = vld [vmem:[#allocation10 + $0xe70] sm:$0xff]  ;;  %v2912_v36 = vld [vmem:[#allocation10 + $0x638] sm:$0xff] }
 0x439   :  { %6413 = vmatprep.subr.bf16.mxu0 %v7361_v47  ;;  %v7251_v47 = vcombine.high %v2752_v42, %v2760_v43  ;;  %v2920_v37 = vld [vmem:[#allocation10 + $0x678] sm:$0xff] }
 0x43b   :  { %6371 = vmatpush2.bf16.msra.mxu1 %v7614_v17  ;;  %v7504_v17 = vcombine.low %v3007_v40, %v3015_v41  ;;  %v3151_v40 = vld [vmem:[#allocation10 + $0xdb0] sm:$0xff] }
 0x43c   :  { %6414 = vmatpush2.bf16.msra.mxu0 %v7360_v53  ;;  %6372 = vmatprep.subr.bf16.mxu1 %v7599_v54  ;;  %v7250_v53 = vcombine.low %v2752_v42, %v2760_v43  ;;  %v7489_v54 = vcombine.high %v2991_v50, %v2999_v51  ;;  %v3159_v41 = vld [vmem:[#allocation10 + $0xdf0] sm:$0xff]  ;;  %v2896_v42 = vld [vmem:[#allocation10 + $0x5b8] sm:$0xff] }
 0x43d   :  { %6415 = vmatprep.subr.bf16.mxu0 %v7345_v55  ;;  %v7235_v55 = vcombine.high %v2736_v13, %v2744_v14  ;;  %v2904_v43 = vld [vmem:[#allocation10 + $0x5f8] sm:$0xff] }
 0x43f   :  { %6373 = vmatpush2.bf16.msra.mxu1 %v7598_v59  ;;  %v7488_v59 = vcombine.low %v2991_v50, %v2999_v51  ;;  %v3135_v50 = vld [vmem:[#allocation10 + $0xd30] sm:$0xff] }
 0x440   :  { %6416 = vmatpush2.bf16.msra.mxu0 %v7344_v60  ;;  %6428 = vmatprep.subr.bf16.mxu1 %v7585_v61  ;;  %v7234_v60 = vcombine.low %v2736_v13, %v2744_v14  ;;  %v7473_v61 = vcombine.high %v2975_v56, %v2983_v57  ;;  %v3143_v51 = vld [vmem:[#allocation10 + $0xd70] sm:$0xff]  ;;  %v2880_v13 = vld [vmem:[#allocation10 + $0x538] sm:$0xff] }
 0x441   :  { %6471 = vmatprep.subr.bf16.mxu0 %v7331_v26  ;;  %v7219_v26 = vcombine.high %v2720_v29, %v2728_v58  ;;  %v2888_v14 = vld [vmem:[#allocation10 + $0x578] sm:$0xff]  ;;  %v3119_v56 = vld [vmem:[#allocation10 + $0xcb0] sm:$0xff] }
 0x442   :  { %6375 = vmatmul.mubr.bf16.vlgmr.msra.gmra.mxu1 %v8590_v4  ;;  %v3127_v57 = vld [vmem:[#allocation10 + $0xcf0] sm:$0xff] }
 0x443   :  { %6418 = vmatmul.mubr.bf16.vlgmr.msra.gmra.mxu0 %v8576_v49  ;;  %6429 = vmatpush1.bf16.msra.mxu1 %v7584_v20  ;;  %v2960_v20 = vld [vmem:[#allocation10 + $0x7b8] sm:$0xff] }
 0x444   :  { %6460 = vmatprep.mubr.bf16.mxu1 %v8588_v32  ;;  %6472 = vmatpush1.bf16.msra.mxu0 %v7330_v63  ;;  %v7218_v63 = vcombine.low %v2720_v29, %v2728_v58  ;;  %v7459_v3 = vcombine.high %v2960_v20, %v2968_v2  ;;  %v2864_v29 = vld [vmem:[#allocation10 + $0x4b8] sm:$0xff] }
 0x445   :  { %6503 = vmatprep.mubr.bf16.mxu0 %v8574_v48  ;;  %6430 = vmatprep.subr.bf16.mxu1 %v7569_v0  ;;  %v7536_v48 = vcombine.low %v3039_v22, %v3047_v23  ;;  %v7713_v0 = vcombine.high %v3215_v62, %v3223_v1  ;;  %v3183_v22 = vld [vmem:[#allocation10 + $0xeb0] sm:$0xff]  ;;  %v2872_v58 = vld [vmem:[#allocation10 + $0x4f8] sm:$0xff] }
 0x446   :  { %6473 = vmatprep.subr.bf16.mxu0 %v7315_v8  ;;  %v3207_v8 = vld [vmem:[#allocation10 + $0xf70] sm:$0xff] }
 0x447   :  { %6431 = vmatpush1.bf16.msra.mxu1 %v7568_v16  ;;  %v7712_v16 = vcombine.low %v3215_v62, %v3223_v1  ;;  %v3191_v23 = vld [vmem:[#allocation10 + $0xef0] sm:$0xff] }
 0x448   :  { %6474 = vmatpush1.bf16.msra.mxu0 %v7314_v18  ;;  %6432 = vmatprep.subr.bf16.mxu1 %v7553_v19  ;;  %v7458_v18 = vcombine.low %v2960_v20, %v2968_v2  ;;  %v7697_v19 = vcombine.high %v3199_v7, %v3207_v8  ;;  %v3103_v62 = vld [vmem:[#allocation10 + $0xc30] sm:$0xff]  ;;  %v2848_v20 = vld [vmem:[#allocation10 + $0x438] sm:$0xff] }
 0x449   :  { %6475 = vmatprep.subr.bf16.mxu0 %v7299_v21  ;;  %v7443_v21 = vcombine.high %v2944_v9, %v2952_v11  ;;  %v3111_v1 = vld [vmem:[#allocation10 + $0xc70] sm:$0xff]  ;;  %v2856_v2 = vld [vmem:[#allocation10 + $0x478] sm:$0xff] }
 0x44b   :  { %6433 = vmatpush1.bf16.msra.mxu1 %v7552_v12  ;;  %v7696_v12 = vcombine.low %v3199_v7, %v3207_v8  ;;  %v3088_v7 = vld [vmem:[#allocation10 + $0xbb8] sm:$0xff] }
 0x44c   :  { %6476 = vmatpush1.bf16.msra.mxu0 %v7298_v10  ;;  %6434 = vmatprep.subr.bf16.mxu1 %v7537_v52  ;;  %v7442_v10 = vcombine.low %v2944_v9, %v2952_v11  ;;  %v7681_v52 = vcombine.high %v3183_v22, %v3191_v23  ;;  %v3096_v8 = vld [vmem:[#allocation10 + $0xbf8] sm:$0xff]  ;;  %v7600_v9 = vcombine.low %v3103_v62, %v3111_v1 }
 0x44d   :  { %6477 = vmatprep.subr.bf16.mxu0 %v7283_v15  ;;  %v7427_v15 = vcombine.high %v2928_v24, %v2936_v27  ;;  %v7346_v11 = vcombine.low %v2848_v20, %v2856_v2 }
 0x44f   :  { %6435 = vmatpush1.bf16.msra.mxu1 %v7536_v48  ;;  %v7680_v48 = vcombine.low %v3183_v22, %v3191_v23  ;;  %v3056_v23 = vld [vmem:[#allocation10 + $0xab8] sm:$0xff] }
 0x450   :  { %6478 = vmatpush1.bf16.msra.mxu0 %v7282_v38  ;;  %6436 = vmatprep.subr.bf16.mxu1 %v7521_v34  ;;  %v7426_v38 = vcombine.low %v2928_v24, %v2936_v27  ;;  %v7665_v34 = vcombine.high %v3167_v31, %v3175_v33  ;;  %v3064_v24 = vld [vmem:[#allocation10 + $0xaf8] sm:$0xff] }
 0x451   :  { %6479 = vmatprep.subr.bf16.mxu0 %v7267_v39  ;;  %v7411_v39 = vcombine.high %v2912_v36, %v2920_v37 }
 0x453   :  { %6437 = vmatpush1.bf16.msra.mxu1 %v7520_v44  ;;  %v7664_v44 = vcombine.low %v3167_v31, %v3175_v33  ;;  %v3024_v33 = vld [vmem:[#allocation10 + $0x9b8] sm:$0xff] }
 0x454   :  { %6480 = vmatpush1.bf16.msra.mxu0 %v7266_v45  ;;  %6438 = vmatprep.subr.bf16.mxu1 %v7505_v46  ;;  %v7410_v45 = vcombine.low %v2912_v36, %v2920_v37  ;;  %v7649_v46 = vcombine.high %v3151_v40, %v3159_v41  ;;  %v3032_v36 = vld [vmem:[#allocation10 + $0x9f8] sm:$0xff] }
 0x455   :  { %6481 = vmatprep.subr.bf16.mxu0 %v7251_v47  ;;  %v7395_v47 = vcombine.high %v2896_v42, %v2904_v43 }
 0x457   :  { %6439 = vmatpush1.bf16.msra.mxu1 %v7504_v17  ;;  %v7648_v17 = vcombine.low %v3151_v40, %v3159_v41  ;;  %v3000_v40 = vld [vmem:[#allocation10 + $0x8f8] sm:$0xff] }
 0x458   :  { %6482 = vmatpush1.bf16.msra.mxu0 %v7250_v53  ;;  %6440 = vmatprep.subr.bf16.mxu1 %v7489_v54  ;;  %v7394_v53 = vcombine.low %v2896_v42, %v2904_v43  ;;  %v7633_v54 = vcombine.high %v3135_v50, %v3143_v51  ;;  %v2976_v43 = vld [vmem:[#allocation10 + $0x838] sm:$0xff] }
 0x459   :  { %6483 = vmatprep.subr.bf16.mxu0 %v7235_v55  ;;  %v7379_v55 = vcombine.high %v2880_v13, %v2888_v14 }
 0x45b   :  { %6441 = vmatpush1.bf16.msra.mxu1 %v7488_v59  ;;  %v7632_v59 = vcombine.low %v3135_v50, %v3143_v51  ;;  %v3224_v50 = vld [vmem:[#allocation10 + $0xff8] sm:$0xff] }
 0x45c   :  { %6484 = vmatpush1.bf16.msra.mxu0 %v7234_v60  ;;  %6442 = vmatprep.subr.bf16.mxu1 %v7473_v61  ;;  %v7378_v60 = vcombine.low %v2880_v13, %v2888_v14  ;;  %v7617_v61 = vcombine.high %v3119_v56, %v3127_v57  ;;  %v3200_v14 = vld [vmem:[#allocation10 + $0xf38] sm:$0xff] }
 0x45d   :  { %6485 = vmatprep.subr.bf16.mxu0 %v7219_v26  ;;  %v7363_v26 = vcombine.high %v2864_v29, %v2872_v58 }
 0x45f   :  { %6443 = vmatpush1.bf16.msra.mxu1 %v7472_v6  ;;  %v7616_v6 = vcombine.low %v3119_v56, %v3127_v57  ;;  %v3192_v56 = vld [vmem:[#allocation10 + $0xef8] sm:$0xff] }
 0x460   :  { %6486 = vmatpush1.bf16.msra.mxu0 %v7218_v63  ;;  %6444 = vmatprep.subr.bf16.mxu1 %v7713_v0  ;;  %v7362_v63 = vcombine.low %v2864_v29, %v2872_v58  ;;  %v7601_v0 = vcombine.high %v3103_v62, %v3111_v1  ;;  %v3168_v58 = vld [vmem:[#allocation10 + $0xe38] sm:$0xff] }
 0x461   :  { %6487 = vmatprep.subr.bf16.mxu0 %v7459_v3  ;;  %v7347_v3 = vcombine.high %v2848_v20, %v2856_v2  ;;  %v3160_v62 = vld [vmem:[#allocation10 + $0xdf8] sm:$0xff] }
 0x462   :  { %v3136_v2 = vld [vmem:[#allocation10 + $0xd38] sm:$0xff] }
 0x463   :  { %6445 = vmatpush2.bf16.msra.mxu1 %v7712_v16  ;;  %v7587_v16 = vcombine.high %v3088_v7, %v3096_v8 }
 0x464   :  { %6488 = vmatpush2.bf16.msra.mxu0 %v7458_v18  ;;  %6446 = vmatprep.subr.bf16.mxu1 %v7697_v19  ;;  %v3072_v18 = vld [vmem:[#allocation10 + $0xb38] sm:$0xff] }
 0x465   :  { %6489 = vmatprep.subr.bf16.mxu0 %v7443_v21  ;;  %v3080_v19 = vld [vmem:[#allocation10 + $0xb78] sm:$0xff]  ;;  %v7586_v21 = vcombine.low %v3088_v7, %v3096_v8 }
 0x466   :  { %v7571_v22 = vcombine.high %v3072_v18, %v3080_v19  ;;  %v7570_v27 = vcombine.low %v3072_v18, %v3080_v19  ;;  %v3128_v7 = vld [vmem:[#allocation10 + $0xcf8] sm:$0xff] }
 0x467   :  { %6447 = vmatpush2.bf16.msra.mxu1 %v7696_v12  ;;  %v7555_v12 = vcombine.high %v3056_v23, %v3064_v24 }
 0x468   :  { %6490 = vmatpush2.bf16.msra.mxu0 %v7442_v10  ;;  %6448 = vmatprep.subr.bf16.mxu1 %v7681_v52  ;;  %v3040_v10 = vld [vmem:[#allocation10 + $0xa38] sm:$0xff] }
 0x469   :  { %6491 = vmatprep.subr.bf16.mxu0 %v7427_v15  ;;  %v3048_v52 = vld [vmem:[#allocation10 + $0xa78] sm:$0xff]  ;;  %v7554_v15 = vcombine.low %v3056_v23, %v3064_v24  ;;  %v5946_v23 = vpop.f32.mrf.mxu1 }
 0x46a   :  { %v7539_v31 = vcombine.high %v3040_v10, %v3048_v52  ;;  %v7538_v37 = vcombine.low %v3040_v10, %v3048_v52 }
 0x46b   :  { %6449 = vmatpush2.bf16.msra.mxu1 %v7680_v48  ;;  %v7523_v48 = vcombine.high %v3024_v33, %v3032_v36 }
 0x46c   :  { %6492 = vmatpush2.bf16.msra.mxu0 %v7426_v38  ;;  %6450 = vmatprep.subr.bf16.mxu1 %v7665_v34  ;;  %v3008_v38 = vld [vmem:[#allocation10 + $0x938] sm:$0xff]  ;;  %v7522_v34 = vcombine.low %v3024_v33, %v3032_v36 }
 0x46d   :  { %6493 = vmatprep.subr.bf16.mxu0 %v7411_v39  ;;  %v2992_v39 = vld [vmem:[#allocation10 + $0x8b8] sm:$0xff] }
 0x46e   :  { %v7491_v42 = vcombine.high %v2992_v39, %v3000_v40 }
 0x46f   :  { %6451 = vmatpush2.bf16.msra.mxu1 %v7664_v44  ;;  %v2984_v44 = vld [vmem:[#allocation10 + $0x878] sm:$0xff] }
 0x470   :  { %6494 = vmatpush2.bf16.msra.mxu0 %v7410_v45  ;;  %6452 = vmatprep.subr.bf16.mxu1 %v7649_v46  ;;  %v7490_v45 = vcombine.low %v2992_v39, %v3000_v40  ;;  %v7475_v46 = vcombine.high %v2976_v43, %v2984_v44  ;;  %v7474_v51 = vcombine.low %v2976_v43, %v2984_v44 }
 0x471   :  { %6495 = vmatprep.subr.bf16.mxu0 %v7395_v47  ;;  %v3216_v47 = vld [vmem:[#allocation10 + $0xfb8] sm:$0xff] }
 0x472   :  { %v7715_v13 = vcombine.high %v3216_v47, %v3224_v50 }
 0x473   :  { %6453 = vmatpush2.bf16.msra.mxu1 %v7648_v17  ;;  %v3208_v17 = vld [vmem:[#allocation10 + $0xf78] sm:$0xff] }
 0x474   :  { %6496 = vmatpush2.bf16.msra.mxu0 %v7394_v53  ;;  %6454 = vmatprep.subr.bf16.mxu1 %v7633_v54  ;;  %v7714_v53 = vcombine.low %v3216_v47, %v3224_v50  ;;  %v7699_v54 = vcombine.high %v3200_v14, %v3208_v17  ;;  %v7698_v57 = vcombine.low %v3200_v14, %v3208_v17  ;;  %v8646_v50 = vld [vmem:[#allocation11] sm:$0xff] }
 0x475   :  { %6497 = vmatprep.subr.bf16.mxu0 %v7379_v55  ;;  %v3184_v55 = vld [vmem:[#allocation10 + $0xeb8] sm:$0xff]  ;;  %v3236_v14 = vrot.slane %v8646_v50, %v8528_v30 }
 0x476   :  { %v7683_v29 = vcombine.high %v3184_v55, %v3192_v56 }
 0x477   :  { %6455 = vmatpush2.bf16.msra.mxu1 %v7632_v59  ;;  %v3176_v59 = vld [vmem:[#allocation10 + $0xe78] sm:$0xff] }
 0x478   :  { %6498 = vmatpush2.bf16.msra.mxu0 %v7378_v60  ;;  %6456 = vmatprep.subr.bf16.mxu1 %v7617_v61  ;;  %v7682_v60 = vcombine.low %v3184_v55, %v3192_v56  ;;  %v7667_v61 = vcombine.high %v3168_v58, %v3176_v59  ;;  %v7666_v1 = vcombine.low %v3168_v58, %v3176_v59 }
 0x479   :  { %6499 = vmatprep.subr.bf16.mxu0 %v7363_v26  ;;  %v3152_v26 = vld [vmem:[#allocation10 + $0xdb8] sm:$0xff] }
 0x47a   :  { %v7651_v20 = vcombine.high %v3152_v26, %v3160_v62 }
 0x47b   :  { %6457 = vmatpush2.bf16.msra.mxu1 %v7616_v6  ;;  %v3144_v6 = vld [vmem:[#allocation10 + $0xd78] sm:$0xff] }
 0x47c   :  { %6500 = vmatpush2.bf16.msra.mxu0 %v7362_v63  ;;  %6458 = vmatprep.subr.bf16.mxu1 %v7601_v0  ;;  %v7650_v63 = vcombine.low %v3152_v26, %v3160_v62  ;;  %v7635_v0 = vcombine.high %v3136_v2, %v3144_v6  ;;  %v7634_v8 = vcombine.low %v3136_v2, %v3144_v6  ;;  %v8665_v26 = vsub.s32 4, %v8520_v25 }
 0x47d   :  { %6501 = vmatprep.subr.bf16.mxu0 %v7347_v3  ;;  %v3120_v3 = vld [vmem:[#allocation10 + $0xcb8] sm:$0xff] }
 0x47e   :  { %v7618_v18 = vcombine.low %v3120_v3, %v3128_v7 }
 0x47f   :  { %6459 = vmatpush2.bf16.msra.mxu1 %v7600_v9  ;;  %v7619_v9 = vcombine.high %v3120_v3, %v3128_v7 }
 0x480   :  { %6502 = vmatpush2.bf16.msra.mxu0 %v7346_v11  ;;  %6514 = vmatprep.subr.bf16.mxu1 %v7587_v16  ;;  %v3104_v11 = vld [vmem:[#allocation10 + $0xc38] sm:$0xff] }
 0x481   :  { %v3112_v16 = vld [vmem:[#allocation10 + $0xc78] sm:$0xff] }
 0x482   :  { %6461 = vmatmul.mubr.bf16.vlgmr.msra.gmra.mxu1 %v8590_v4  ;;  %v7603_v19 = vcombine.high %v3104_v11, %v3112_v16 }
 0x483   :  { %6504 = vmatmul.mubr.bf16.vlgmr.msra.gmra.mxu0 %v8576_v49  ;;  %6515 = vmatpush1.bf16.msra.mxu1 %v7586_v21  ;;  %v3016_v49 = vld [vmem:[#allocation10 + $0x978] sm:$0xff]  ;;  %v7602_v21 = vcombine.low %v3104_v11, %v3112_v16  ;;  %v3251_v11 = vsub.s32 5, %v8520_v25 }
 0x484   :  { %6546 = vmatprep.mubr.bf16.mxu1 %v8588_v32  ;;  %6516 = vmatprep.subr.bf16.mxu1 %v7571_v22  ;;  %v7507_v32 = vcombine.high %v3008_v38, %v3016_v49  ;;  %v7506_v41 = vcombine.low %v3008_v38, %v3016_v49  ;;  %v5903_v22 = vpop.f32.mrf.mxu0 }
 0x486   :  { %v5905_v24 = vpop.f32.mrf.mxu0 }
 0x487   :  { %6517 = vmatpush1.bf16.msra.mxu1 %v7570_v27  ;;  %v5948_v27 = vpop.f32.mrf.mxu1 }
 0x488   :  { %6518 = vmatprep.subr.bf16.mxu1 %v7555_v12  ;;  %v5907_v12 = vpop.f32.mrf.mxu0 }
 0x489   :  { %v5950_v10 = vpop.f32.mrf.mxu1 }
 0x48a   :  { %v5909_v52 = vpop.f32.mrf.mxu0 }
 0x48b   :  { %6519 = vmatpush1.bf16.msra.mxu1 %v7554_v15  ;;  %v5910_v59 = vadd.f32 %v5909_v52, %v3236_v14 }
 0x48c   :  { %6520 = vmatprep.subr.bf16.mxu1 %v7539_v31  ;;  %v5989_v15 = vpop.f32.mrf.mxu0  ;;  %v5952_v31 = vpop.f32.mrf.mxu1 }
 0x48e   :  { %v6032_v33 = vpop.f32.mrf.mxu1  ;;  %v5991_v36 = vpop.f32.mrf.mxu0 }
 0x48f   :  { %6521 = vmatpush1.bf16.msra.mxu1 %v7538_v37 }
 0x490   :  { %6522 = vmatprep.subr.bf16.mxu1 %v7523_v48  ;;  %v6034_v37 = vpop.f32.mrf.mxu1  ;;  %v5993_v48 = vpop.f32.mrf.mxu0 }
 0x492   :  { %v6036_v38 = vpop.f32.mrf.mxu1  ;;  %v5995_v49 = vpop.f32.mrf.mxu0 }
 0x493   :  { %6523 = vmatpush1.bf16.msra.mxu1 %v7522_v34 }
 0x494   :  { %6524 = vmatprep.subr.bf16.mxu1 %v7507_v32  ;;  %v8624_v34 = vpop.f32.mrf.mxu0  ;;  %v6038_v32 = vpop.f32.mrf.mxu1 }
 0x496   :  { %v8626_v39 = vpop.f32.mrf.mxu1 }
 0x497   :  { %6525 = vmatpush1.bf16.msra.mxu1 %v7506_v41 }
 0x498   :  { %6526 = vmatprep.subr.bf16.mxu1 %v7491_v42  ;;  %v8630_v40 = vpop.f32.mrf.mxu1 }
 0x49a   :  { %v8634_v42 = vpop.f32.mrf.mxu1 }
 0x49b   :  { %6527 = vmatpush1.bf16.msra.mxu1 %v7490_v45 }
 0x49c   :  { %6528 = vmatprep.subr.bf16.mxu1 %v7475_v46  ;;  %v8640_v45 = vpop.f32.mrf.mxu1 }
 0x49e   :  { %v8642_v46 = vpop.f32.mrf.mxu1 }
 0x49f   :  { %6529 = vmatpush1.bf16.msra.mxu1 %v7474_v51 }
 0x4a0   :  { %6530 = vmatprep.subr.bf16.mxu1 %v7715_v13  ;;  %v8648_v51 = vpop.f32.mrf.mxu1  ;;  %v3232_v13 = vrot.slane %v8646_v50, %v8523_v28 }
 0x4a2   :  { %v8658_v55 = vpop.f32.mrf.mxu1  ;;  %v5904_v56 = vadd.f32 %v5903_v22, %v3232_v13  ;;  %v5908_v2 = vadd.f32 %v5907_v12, %v3232_v13  ;;  %v3252_v13 = vrot.slane %v8646_v50, %v3251_v11 }
 0x4a3   :  { %6531 = vmatpush2.bf16.msra.mxu1 %v7714_v53  ;;  %v6621_v53 = vld [vmem:[#allocation13] sm:$0xff] }
 0x4a4   :  { %6532 = vmatprep.subr.bf16.mxu1 %v7699_v54  ;;  %v3240_v54 = vrot.slane %v8646_v50, %v8538_v5  ;;  %v5947_v62 = vadd.f32 %v5946_v23, %v5904_v56  ;;  %v8669_v3 = vpop.f32.mrf.mxu1  ;;  %v8682_v12 = vunpack.c.h.bf16 %v6621_v53  ;;  %v3259_v56 = vsub.s32 7, %v8520_v25 }
 0x4a6   :  { %v5994_v6 = vadd.f32 %v5993_v48, %v3240_v54  ;;  %v6557_v23 = vmul.f32 0.02, %v5947_v62 }
 0x4a7   :  { %6533 = vmatpush2.bf16.msra.mxu1 %v7698_v57  ;;  %v5906_v57 = vadd.f32 %v5905_v24, %v3236_v14 }
 0x4a8   :  { %6534 = vmatprep.subr.bf16.mxu1 %v7683_v29  ;;  %v6623_v29 = vunpack.c.l.bf16 %v6621_v53 }
 0x4aa   :  { %v6634_v7 = vrot.slane %v6623_v29, %v8523_v28 }
 0x4ab   :  { %6535 = vmatpush2.bf16.msra.mxu1 %v7682_v60  ;;  %v5990_v60 = vadd.f32 %v5989_v15, %v3240_v54 }
 0x4ac   :  { %6536 = vmatprep.subr.bf16.mxu1 %v7667_v61  ;;  %v3244_v61 = vrot.slane %v8646_v50, %v8541_v35 }
 0x4ae   :  { %v5992_v16 = vadd.f32 %v5991_v36, %v3244_v61 }
 0x4af   :  { %6537 = vmatpush2.bf16.msra.mxu1 %v7666_v1  ;;  %v5949_v1 = vadd.f32 %v5948_v27, %v5906_v57  ;;  %v6642_v27 = vrot.slane %v6623_v29, %v8665_v26 }
 0x4b0   :  { %6538 = vmatprep.subr.bf16.mxu1 %v7651_v20  ;;  %v6035_v48 = vadd.f32 %v6034_v37, %v5992_v16 }
 0x4b1   :  { %v6558_v24 = vmul.f32 0.02, %v5949_v1  ;;  %v6722_v37 = vrot.slane %v6642_v27, %v8523_v28 }
 0x4b3   :  { %6539 = vmatpush2.bf16.msra.mxu1 %v7650_v63  ;;  %v5953_v63 = vadd.f32 %v5952_v31, %v5910_v59  ;;  %v5996_v31 = vadd.f32 %v5995_v49, %v3244_v61  ;;  %v6590_v49 = vmax.f32 %v5949_v1, %v6558_v24  ;;  %v6589_v61 = vmax.f32 %v5947_v62, %v6557_v23 }
 0x4b4   :  { %6540 = vmatprep.subr.bf16.mxu1 %v7635_v0  ;;  %v6033_v0 = vadd.f32 %v6032_v33, %v5990_v60  ;;  %v6650_v60 = vrot.slane %v8682_v12, %v8523_v28 }
 0x4b5   :  { %v6574_v15 = vmul.f32 0.02, %v5953_v63  ;;  %v6039_v53 = vadd.f32 %v6038_v32, %v5996_v31  ;;  %v3260_v31 = vrot.slane %v8646_v50, %v3259_v56 }
 0x4b6   :  { %v6559_v33 = vmul.f32 0.02, %v6033_v0  ;;  %v6730_v23 = vrot.slane %v6650_v60, %v8523_v28  ;;  %v6654_v60 = vrot.slane %v8682_v12, %v8538_v5 }
 0x4b7   :  { %6541 = vmatpush2.bf16.msra.mxu1 %v7634_v8  ;;  %v6638_v8 = vrot.slane %v6623_v29, %v8538_v5  ;;  %v6576_v27 = vmul.f32 0.02, %v6039_v53 }
 0x4b8   :  { %6542 = vmatprep.subr.bf16.mxu1 %v7619_v9  ;;  %v8674_v9 = vsub.s32 6, %v8520_v25 }
 0x4b9   :  { %v6718_v36 = vrot.slane %v6638_v8, %v8523_v28 }
 0x4ba   :  { %v3256_v1 = vrot.slane %v8646_v50, %v8674_v9 }
 0x4bb   :  { %6543 = vmatpush2.bf16.msra.mxu1 %v7618_v18  ;;  %v5951_v18 = vadd.f32 %v5950_v10, %v5908_v2  ;;  %v6714_v10 = vrot.slane %v6634_v7, %v8523_v28  ;;  %v6606_v2 = vmax.f32 %v5953_v63, %v6574_v15  ;;  %v6560_v7 = vmul.f32 0.02, %v6035_v48 }
 0x4bc   :  { %6544 = vmatprep.subr.bf16.mxu1 %v7603_v19  ;;  %v3248_v19 = vrot.slane %v8646_v50, %v8665_v26  ;;  %v6776_v63 = vmul.f32 %v6718_v36, %v6590_v49 }
 0x4bd   :  { %v6573_v14 = vmul.f32 0.02, %v5951_v18  ;;  %v6792_v15 = vmul.f32 %v6718_v36, %v6606_v2  ;;  %v6658_v2 = vrot.slane %v8682_v12, %v8665_v26 }
 0x4be   :  { %v6076_v59 = vadd.f32 %v8624_v34, %v3248_v19 }
 0x4bf   :  { %6545 = vmatpush2.bf16.msra.mxu1 %v7602_v21  ;;  %v6037_v21 = vadd.f32 %v6036_v38, %v5994_v6  ;;  %v6646_v38 = vrot.slane %v6623_v29, %v8674_v9  ;;  %v6591_v6 = vmax.f32 %v6033_v0, %v6559_v33  ;;  %v6605_v24 = vmax.f32 %v5951_v18, %v6573_v14 }
 0x4c0   :  { %v6119_v16 = vadd.f32 %v8626_v39, %v6076_v59 }
 0x4c1   :  { %v6575_v54 = vmul.f32 0.02, %v6037_v21  ;;  %v6726_v32 = vrot.slane %v6646_v38, %v8523_v28  ;;  %v6777_v18 = vmul.f32 %v6722_v37, %v6591_v6  ;;  %v6791_v49 = vmul.f32 %v6714_v10, %v6605_v24 }
 0x4c2   :  { %6547 = vmatmul.mubr.bf16.vlgmr.msra.gmra.mxu1 %v8590_v4  ;;  %v8628_v4 = vpop.f32.mrf.mxu0  ;;  %v8679_v22 = vpop.f32.mrf.mxu1  ;;  %v6561_v38 = vmul.f32 0.02, %v6119_v16 }
 0x4c3   :  { %v6607_v34 = vmax.f32 %v6037_v21, %v6575_v54  ;;  %v6078_v0 = vadd.f32 %v8628_v4, %v3252_v13  ;;  %v6592_v21 = vmax.f32 %v6035_v48, %v6560_v7  ;;  %v8719_v54 = vld [vmem:[#allocation11 + $0x8] sm:$0xff] }
 0x4c4   :  { %v8632_v41 = vpop.f32.mrf.mxu0  ;;  %v8693_v57 = vpop.f32.mrf.mxu1 }
 0x4c5   :  { %v6080_v8 = vadd.f32 %v8632_v41, %v3248_v19  ;;  %v6775_v19 = vmul.f32 %v6714_v10, %v6589_v61  ;;  %v6121_v14 = vadd.f32 %v8630_v40, %v6078_v0  ;;  %v6793_v59 = vmul.f32 %v6722_v37, %v6607_v34 }
 0x4c6   :  { %v8636_v43 = vpop.f32.mrf.mxu0  ;;  %v8709_v62 = vpop.f32.mrf.mxu1  ;;  %v6824_v40 = vadd.f32 %v6792_v15, %v6791_v49  ;;  %v3264_v10 = vrot.slane %v8719_v54, %v8523_v28  ;;  %v6778_v7 = vmul.f32 %v6726_v32, %v6592_v21 }
 0x4c7   :  { %v6123_v41 = vadd.f32 %v8634_v42, %v6080_v8  ;;  %v6082_v33 = vadd.f32 %v8636_v43, %v3252_v13  ;;  %v6608_v42 = vmax.f32 %v6039_v53, %v6576_v27  ;;  %v6807_v48 = vadd.f32 %v6776_v63, %v6775_v19  ;;  %v8729_v13 = vld [vmem:[#allocation13 + $0x8] sm:$0xff] }
 0x4c8   :  { %v8638_v44 = vpop.f32.mrf.mxu0  ;;  %v8725_v36 = vpop.f32.mrf.mxu1  ;;  %v6662_v53 = vrot.slane %v8682_v12, %v8674_v9  ;;  %v6593_v8 = vmax.f32 %v6119_v16, %v6561_v38  ;;  %v6562_v24 = vmul.f32 0.02, %v6121_v14  ;;  %v8741_v63 = vunpack.c.l.bf16 %v8729_v13 }
 0x4c9   :  { %v6162_v50 = vadd.f32 %v8638_v44, %v3256_v1  ;;  %v6577_v61 = vmul.f32 0.02, %v6123_v41  ;;  %v6125_v43 = vadd.f32 %v8640_v45, %v6082_v33  ;;  %v6808_v6 = vadd.f32 %v6807_v48, %v6777_v18 }
 0x4ca   :  { %v8644_v47 = vpop.f32.mrf.mxu0  ;;  %v6794_v34 = vmul.f32 %v6726_v32, %v6608_v42  ;;  %v6734_v12 = vrot.slane %v6654_v60, %v8523_v28  ;;  %v6738_v18 = vrot.slane %v6658_v2, %v8523_v28  ;;  %v3268_v16 = vrot.slane %v8719_v54, %v8528_v30 }
 0x4cb   :  { %v6205_v44 = vadd.f32 %v8642_v46, %v6162_v50  ;;  %v6825_v46 = vadd.f32 %v6824_v40, %v6793_v59  ;;  %v6164_v27 = vadd.f32 %v8644_v47, %v3260_v31  ;;  %v6609_v0 = vmax.f32 %v6123_v41, %v6577_v61 }
 0x4cc   :  { %v8654_v17 = vpop.f32.mrf.mxu0  ;;  %v6578_v15 = vmul.f32 0.02, %v6125_v43  ;;  %v6779_v32 = vmul.f32 %v6730_v23, %v6593_v8  ;;  %v6594_v38 = vmax.f32 %v6121_v14, %v6562_v24  ;;  %v6809_v49 = vadd.f32 %v6808_v6, %v6778_v7 }
 0x4cd   :  { %v6166_v19 = vadd.f32 %v8654_v17, %v3256_v1  ;;  %v6563_v33 = vmul.f32 0.02, %v6205_v44  ;;  %v6207_v47 = vadd.f32 %v8648_v51, %v6164_v27  ;;  %v6826_v17 = vadd.f32 %v6825_v46, %v6794_v34 }
 0x4ce   :  { %v8660_v58 = vpop.f32.mrf.mxu0  ;;  %v8754_v59 = vrot.slane %v6662_v53, %v8523_v28  ;;  %v6795_v42 = vmul.f32 %v6730_v23, %v6609_v0  ;;  %v6610_v60 = vmax.f32 %v6125_v43, %v6578_v15  ;;  %v6666_v30 = vrot.slane %v8741_v63, %v8523_v28 }
 0x4cf   :  { %v6209_v50 = vadd.f32 %v8658_v55, %v6166_v19  ;;  %v6595_v48 = vmax.f32 %v6205_v44, %v6563_v33  ;;  %v6168_v14 = vadd.f32 %v8660_v58, %v3260_v31  ;;  %v3272_v55 = vrot.slane %v8719_v54, %v8538_v5 }
 0x4d0   :  { %v8667_v20 = vpop.f32.mrf.mxu0  ;;  %v6670_v61 = vrot.slane %v8741_v63, %v8538_v5  ;;  %v6810_v40 = vadd.f32 %v6809_v49, %v6779_v32  ;;  %v6780_v2 = vmul.f32 %v6734_v12, %v6594_v38  ;;  %v6564_v53 = vmul.f32 0.02, %v6207_v47 }
 0x4d1   :  { %v6248_v1 = vadd.f32 %v8667_v20, %v3264_v10  ;;  %v6579_v23 = vmul.f32 0.02, %v6209_v50  ;;  %v6211_v58 = vadd.f32 %v8669_v3, %v6168_v14  ;;  %v6827_v31 = vadd.f32 %v6826_v17, %v6795_v42 }
 0x4d2   :  { %v8684_v52 = vpop.f32.mrf.mxu0  ;;  %v6796_v7 = vmul.f32 %v6734_v12, %v6610_v60  ;;  %v6781_v8 = vmul.f32 %v6738_v18, %v6595_v48  ;;  %v6746_v24 = vrot.slane %v6666_v30, %v8523_v28  ;;  %v8774_v15 = vrot.slane %v6670_v61, %v8523_v28 }
 0x4d3   :  { %v6291_v51 = vadd.f32 %v8679_v22, %v6248_v1  ;;  %v6250_v44 = vadd.f32 %v8684_v52, %v3268_v16  ;;  %v3276_v22 = vrot.slane %v8719_v54, %v8541_v35  ;;  %v6611_v3 = vmax.f32 %v6209_v50, %v6579_v23 }
 0x4d4   :  { %v8699_v29 = vpop.f32.mrf.mxu0  ;;  %v6580_v35 = vmul.f32 0.02, %v6211_v58  ;;  %v6674_v32 = vrot.slane %v8741_v63, %v8665_v26  ;;  %v8789_v61 = vunpack.c.h.bf16 %v8729_v13 }
 0x4d5   :  { %v6252_v6 = vadd.f32 %v8699_v29, %v3264_v10  ;;  %v6565_v34 = vmul.f32 0.02, %v6291_v51  ;;  %v6293_v0 = vadd.f32 %v8693_v57, %v6250_v44  ;;  %v6811_v29 = vadd.f32 %v6810_v40, %v6780_v2 }
 0x4d6   :  { %v8714_v39 = vpop.f32.mrf.mxu0  ;;  %v6596_v10 = vmax.f32 %v6207_v47, %v6564_v53  ;;  %v3280_v57 = vrot.slane %v8719_v54, %v8665_v26  ;;  %v6612_v48 = vmax.f32 %v6211_v58, %v6580_v35  ;;  %v6754_v14 = vrot.slane %v6674_v32, %v8523_v28 }
 0x4d7   :  { %v6295_v52 = vadd.f32 %v8709_v62, %v6252_v6  ;;  %v6254_v33 = vadd.f32 %v8714_v39, %v3268_v16  ;;  %v6812_v49 = vadd.f32 %v6811_v29, %v6781_v8  ;;  %v3284_v62 = vrot.slane %v8719_v54, %v3251_v11 }
 0x4d8   :  { %v8721_v4 = vpop.f32.mrf.mxu0  ;;  %v6597_v50 = vmax.f32 %v6291_v51, %v6565_v34  ;;  %v6566_v17 = vmul.f32 0.02, %v6293_v0  ;;  %v6797_v16 = vmul.f32 %v6738_v18, %v6611_v3  ;;  %v6798_v13 = vmul.f32 %v8754_v59, %v6612_v48 }
 0x4d9   :  { %v6334_v27 = vadd.f32 %v8721_v4, %v3272_v55  ;;  %v6828_v4 = vadd.f32 %v6827_v31, %v6796_v7  ;;  %v6581_v1 = vmul.f32 0.02, %v6295_v52  ;;  %v6297_v39 = vadd.f32 %v8725_v36, %v6254_v33 }
 0x4da   :  { %v8737_v45 = vpop.f32.mrf.mxu0  ;;  %v6678_v36 = vrot.slane %v8741_v63, %v8674_v9  ;;  %v6783_v18 = vmul.f32 %v6746_v24, %v6597_v50  ;;  %v6598_v23 = vmax.f32 %v6293_v0, %v6566_v17  ;;  %v6686_v17 = vrot.slane %v8789_v61, %v8538_v5 }
 0x4db   :  { %v6336_v42 = vadd.f32 %v8737_v45, %v3276_v22  ;;  %v6613_v45 = vmax.f32 %v6295_v52, %v6581_v1  ;;  %v6829_v44 = vadd.f32 %v6828_v4, %v6797_v16 }
 0x4dc   :  { %v6337_v41 = vpop.f32.mrf.mxu0  ;;  %v6784_v52 = vmul.f32 %v8774_v15, %v6598_v23 }
 0x4dd   :  { %v6338_v60 = vadd.f32 %v6337_v41, %v3272_v55  ;;  %v6582_v41 = vmul.f32 0.02, %v6297_v39  ;;  %v6799_v29 = vmul.f32 %v6746_v24, %v6613_v45  ;;  %v6830_v35 = vadd.f32 %v6829_v44, %v6798_v13 }
 0x4de   :  { %v6339_v43 = vpop.f32.mrf.mxu0  ;;  %v6690_v45 = vrot.slane %v8789_v61, %v8665_v26 }
 0x4df   :  { %v6340_v6 = vadd.f32 %v6339_v43, %v3276_v22  ;;  %v6831_v50 = vadd.f32 %v6830_v35, %v6799_v29 }
 0x4e0   :  { %v6770_v26 = vrot.slane %v6690_v45, %v8523_v28 }
 0x502   :  { %v6376_v37 = vpop.f32.mrf.mxu1 }
 0x503   :  { %v6419_v46 = vpop.f32.mrf.mxu0  ;;  %v6377_v12 = vadd.f32 %v6376_v37, %v6334_v27  ;;  %v6782_v37 = vmul.f32 %v8754_v59, %v6596_v10  ;;  %v6614_v10 = vmax.f32 %v6297_v39, %v6582_v41 }
 0x504   :  { %v8748_v21 = vpop.f32.mrf.mxu1  ;;  %v6420_v40 = vadd.f32 %v6419_v46, %v3280_v57 }
 0x505   :  { %v6421_v47 = vpop.f32.mrf.mxu0  ;;  %v6567_v30 = vmul.f32 0.02, %v6377_v12  ;;  %v6379_v51 = vadd.f32 %v8748_v21, %v6336_v42  ;;  %v6813_v55 = vadd.f32 %v6812_v49, %v6782_v37  ;;  %v6682_v21 = vrot.slane %v8789_v61, %v8523_v28 }
 0x506   :  { %v6380_v20 = vpop.f32.mrf.mxu1  ;;  %v6422_v7 = vadd.f32 %v6421_v47, %v3284_v62  ;;  %v6800_v24 = vmul.f32 %v8774_v15, %v6614_v10  ;;  %v3292_v15 = vrot.slane %v8719_v54, %v3259_v56 }
 0x507   :  { %v6381_v2 = vadd.f32 %v6380_v20, %v6338_v60  ;;  %v6423_v53 = vpop.f32.mrf.mxu0  ;;  %v6599_v31 = vmax.f32 %v6377_v12, %v6567_v30  ;;  %v6568_v46 = vmul.f32 0.02, %v6379_v51  ;;  %v6814_v0 = vadd.f32 %v6813_v55, %v6783_v18 }
 0x508   :  { %v6382_v19 = vpop.f32.mrf.mxu1  ;;  %v6424_v20 = vadd.f32 %v6423_v53, %v3280_v57  ;;  %v6758_v12 = vrot.slane %v6678_v36, %v8523_v28  ;;  %v6762_v32 = vrot.slane %v6682_v21, %v8523_v28  ;;  %v3288_v60 = vrot.slane %v8719_v54, %v8674_v9 }
 0x509   :  { %v6583_v63 = vmul.f32 0.02, %v6381_v2  ;;  %v6383_v34 = vadd.f32 %v6382_v19, %v6340_v6  ;;  %v6425_v27 = vpop.f32.mrf.mxu0  ;;  %v6785_v33 = vmul.f32 %v6754_v14, %v6599_v31  ;;  %v6600_v4 = vmax.f32 %v6379_v51, %v6568_v46 }
 0x50a   :  { %v6426_v57 = vadd.f32 %v6425_v27, %v3284_v62  ;;  %v6815_v47 = vadd.f32 %v6814_v0, %v6784_v52  ;;  %v6832_v62 = vadd.f32 %v6831_v50, %v6800_v24  ;;  %v6766_v51 = vrot.slane %v6686_v17, %v8523_v28  ;;  %v7716_v17 = vld [vmem:[#allocation2] ss:$0 sm:$0xff] }
 0x50b   :  { %v6615_v49 = vmax.f32 %v6381_v2, %v6583_v63  ;;  %v6584_v19 = vmul.f32 0.02, %v6383_v34  ;;  %v6786_v30 = vmul.f32 %v6758_v12, %v6600_v4  ;;  %v6694_v6 = vrot.slane %v8789_v61, %v8674_v9 }
 0x50c   :  { %v6816_v48 = vadd.f32 %v6815_v47, %v6785_v33 }
 0x50d   :  { %v6774_v27 = vrot.slane %v6694_v6, %v8523_v28 }
 0x50e   :  { %v6817_v41 = vadd.f32 %v6816_v48, %v6786_v30 }
 0x542   :  { %v6462_v38 = vpop.f32.mrf.mxu1 }
 0x543   :  { %v6463_v58 = vadd.f32 %v6462_v38, %v6420_v40  ;;  %v6505_v22 = vpop.f32.mrf.mxu0  ;;  %v6616_v40 = vmax.f32 %v6383_v34, %v6584_v19 }
 0x544   :  { %v6464_v11 = vpop.f32.mrf.mxu1  ;;  %v6506_v23 = vadd.f32 %v6505_v22, %v3288_v60 }
 0x545   :  { %v6569_v43 = vmul.f32 0.02, %v6463_v58  ;;  %v6465_v3 = vadd.f32 %v6464_v11, %v6422_v7  ;;  %v6507_v37 = vpop.f32.mrf.mxu0  ;;  %v6801_v11 = vmul.f32 %v6754_v14, %v6615_v49  ;;  %v6802_v14 = vmul.f32 %v6758_v12, %v6616_v40 }
 0x546   :  { %v6466_v8 = vpop.f32.mrf.mxu1 }
 0x547   :  { %v6467_v59 = vadd.f32 %v6466_v8, %v6424_v20  ;;  %v6601_v1 = vmax.f32 %v6463_v58, %v6569_v43  ;;  %v6570_v39 = vmul.f32 0.02, %v6465_v3  ;;  %v6509_v53 = vpop.f32.mrf.mxu0  ;;  %v6833_v55 = vadd.f32 %v6832_v62, %v6801_v11 }
 0x548   :  { %v6468_v38 = vpop.f32.mrf.mxu1  ;;  %v6508_v58 = vadd.f32 %v6507_v37, %v3292_v15  ;;  %v6510_v8 = vadd.f32 %v6509_v53, %v3288_v60 }
 0x549   :  { %v6585_v16 = vmul.f32 0.02, %v6467_v59  ;;  %v6469_v42 = vadd.f32 %v6468_v38, %v6426_v57  ;;  %v6787_v5 = vmul.f32 %v6762_v32, %v6601_v1  ;;  %v6602_v36 = vmax.f32 %v6465_v3, %v6570_v39  ;;  %v6511_v31 = vpop.f32.mrf.mxu0 }
 0x54a   :  { %v6834_v20 = vadd.f32 %v6833_v55, %v6802_v14  ;;  %v6512_v0 = vadd.f32 %v6511_v31, %v3292_v15 }
 0x54b   :  { %v6617_v2 = vmax.f32 %v6467_v59, %v6585_v16  ;;  %v6586_v18 = vmul.f32 0.02, %v6469_v42  ;;  %v6788_v13 = vmul.f32 %v6766_v51, %v6602_v36  ;;  %v6818_v21 = vadd.f32 %v6817_v41, %v6787_v5 }
 0x54d   :  { %v6803_v56 = vmul.f32 %v6762_v32, %v6617_v2  ;;  %v6618_v54 = vmax.f32 %v6469_v42, %v6586_v18  ;;  %v6819_v22 = vadd.f32 %v6818_v21, %v6788_v13 }
 0x54f   :  { %v6835_v29 = vadd.f32 %v6834_v20, %v6803_v56  ;;  %v6804_v10 = vmul.f32 %v6766_v51, %v6618_v54 }
 0x551   :  { %v6836_v28 = vadd.f32 %v6835_v29, %v6804_v10 }
 0x582   :  { %v6548_v44 = vpop.f32.mrf.mxu1 }
 0x583   :  { %v6549_v25 = vadd.f32 %v6548_v44, %v6506_v23 }
 0x584   :  { %v6550_v7 = vpop.f32.mrf.mxu1 }
 0x585   :  { %v6571_v46 = vmul.f32 0.02, %v6549_v25  ;;  %v6551_v63 = vadd.f32 %v6550_v7, %v6508_v58 }
 0x586   :  { %v6552_v34 = vpop.f32.mrf.mxu1 }
 0x587   :  { %v6603_v52 = vmax.f32 %v6549_v25, %v6571_v46  ;;  %v6572_v9 = vmul.f32 0.02, %v6551_v63  ;;  %v6553_v61 = vadd.f32 %v6552_v34, %v6510_v8 }
 0x588   :  { %v6554_v43 = vpop.f32.mrf.mxu1 }
 0x589   :  { %v6604_v3 = vmax.f32 %v6551_v63, %v6572_v9  ;;  %v6587_v59 = vmul.f32 0.02, %v6553_v61  ;;  %v6555_v35 = vadd.f32 %v6554_v43, %v6512_v0  ;;  %v6789_v33 = vmul.f32 %v6770_v26, %v6603_v52 }
 0x58b   :  { %v6619_v12 = vmax.f32 %v6553_v61, %v6587_v59  ;;  %v6588_v32 = vmul.f32 0.02, %v6555_v35  ;;  %v6790_v38 = vmul.f32 %v6774_v27, %v6604_v3  ;;  %v6820_v4 = vadd.f32 %v6819_v22, %v6789_v33 }
 0x58d   :  { %v6805_v49 = vmul.f32 %v6770_v26, %v6619_v12  ;;  %v6620_v19 = vmax.f32 %v6555_v35, %v6588_v32  ;;  %v6821_v57 = vadd.f32 %v6820_v4, %v6790_v38 }
 0x58f   :  { %6822 = vadd.xlane.f32.xlu0 %v6821_v57  ;;  %v6806_v47 = vmul.f32 %v6774_v27, %v6620_v19  ;;  %v6837_v50 = vadd.f32 %v6836_v28, %v6805_v49 }
 0x591   :  { %v6838_v24 = vadd.f32 %v6837_v50, %v6806_v47 }
 0x593   :  { %6839 = vadd.xlane.f32.xlu0 %v6838_v24 }
 0x618   :  { %v6823_v1 = vpop.xlane.xlu0 %6822 }
 0x619   :  { %v6848_v39 = vadd.f32 %v7716_v17, %v6823_v1 }
 0x61b   :  { %v6850_v37 = vsub.f32 0.0, %v6848_v39 }
 0x61c   :  { %v6840_v16 = vpop.xlane.xlu0 %6839 }
 0x61d   :  { %v6852_v42 = vmul.f32 1.442695, %v6850_v37  ;;  %v6849_v60 = vadd.f32 %v7716_v17, %v6840_v16 }
 0x61f   :  { %8225 = vpow2.f32 %v6852_v42  ;;  %v6851_v48 = vsub.f32 0.0, %v6849_v60 }
 0x621   :  { %v6854_v30 = vmul.f32 1.442695, %v6851_v48 }
 0x623   :  { %8227 = vpow2.f32 %v6854_v30 }
 0x62c   :  { %v8226_v11 = vpop.eup %8225 }
 0x62d   :  { %v6856_v40 = vadd.f32 1.0, %v8226_v11 }
 0x62f   :  { %8229 = vrcp.f32 %v6856_v40 }
 0x630   :  { %v8228_v62 = vpop.eup %8227 }
 0x631   :  { %v6857_v51 = vadd.f32 1.0, %v8228_v62 }
 0x633   :  { %8231 = vrcp.f32 %v6857_v51 }
 0x63c   :  { %v8230_v15 = vpop.eup %8229 }
 0x63d   :  { %6861 = vst.msk [vmem:[%s8830_s9] sm:$0xff] %vm6860_vm1, %v8230_v15 }
 0x640   :  { %v8232_v5 = vpop.eup %8231 }
 0x641   :  { %6862 = vst.msk [vmem:[%s8830_s9 + $0x8] sm:$0xff] %vm6860_vm1, %v8232_v5 }
 0x642   :  { %6867 = vsyncpa [#allocation4], 1 }
 0x643   :  { %6868 = vsyncpa [#allocation6], 1 }
 0x644   :  { %6869 = vsyncpa [#allocation9], 1 }
 0x645   :  { %6870 = vsyncpa [#allocation12], 1 }

</bundles_post_ra>
